<compile_context>
chip_gen: v5e
topology: v5e:2x2
jax: 0.10.0
libtpu: 0.0.40
codegen_flags: <defaults>
</compile_context>

<pallas_src>
import functools
import math

import jax
import jax.numpy as jnp
import numpy as np
from jax.experimental import pallas as pl
from jax.experimental.pallas import tpu as pltpu  # imported for TPU backend parity; no grid params needed

_RMS_EPS = 1.1920928955078125e-07  # torch.finfo(torch.float32).eps


def _rmsnorm(x, w):
    ms = jnp.mean(x * x, axis=-1, keepdims=True)
    return x * jax.lax.rsqrt(ms + _RMS_EPS) * w


# ----------------------------------------------------------------------------
# Fused kernel: (B*S, D) embeddings -> L transformer blocks -> (B*S, V) logits.
# Single invocation (no grid); all weights + activations live in VMEM.
# ----------------------------------------------------------------------------
def minikl_fused_kernel(x_ref, cos_ref, sin_ref, cossin_ref, sinsq_ref,
                        head_mask_ref, attn_bias_ref,
                        n1_ref, wq_ref, bq_ref, wqr_ref, bqr_ref,
                        wv_ref, bv_ref, wo_ref, bo_ref,
                        n2_ref, wab_ref, bab_ref, wd_ref, bd_ref,
                        wfc_ref, bfc_ref, out_ref,
                        *, num_heads, d_head, num_layers, d_ff_pad):
    f32 = jnp.float32
    x = x_ref[...]                        # (BS, D) batch*seq packed along sublanes
    BS, D = x.shape
    H = num_heads
    F = d_ff_pad

    cos = cos_ref[...]                    # (BS, D) RoPE tables (tiled heads+batch)
    sin = sin_ref[...]
    cos_sin = cossin_ref[...]             # precomputed host-side
    sin_sq = sinsq_ref[...]
    head_mask = head_mask_ref[...]        # (H*BS, D)  1.0 where col belongs to head
    attn_bias = attn_bias_ref[...]        # (H*BS, BS) 0 / -1e30 causal+batch mask
    scale = 1.0 / math.sqrt(d_head)

    for l in range(num_layers):
        # ---------------- attention sub-block (pre-norm + residual) ----------
        h1 = _rmsnorm(x, n1_ref[l])
        q = jnp.dot(h1, wq_ref[l], preferred_element_type=f32) + bq_ref[l]
        t = jnp.dot(h1, wqr_ref[l], preferred_element_type=f32) + bqr_ref[l]   # = q @ R
        v = jnp.dot(h1, wv_ref[l], preferred_element_type=f32) + bv_ref[l]
        # TODO(synk): w_k projection is dead code in the reference (k = rope(q)),
        # so it is intentionally not computed.

        q_r = q * cos + t * sin                              # RoPE(q)
        k_r = q_r * cos + t * cos_sin - q * sin_sq           # RoPE(RoPE(q)) (ref bug)

        # Heads packed along sublanes: one score matmul / softmax / P@V pass.
        q_big = jnp.concatenate([q_r] * H, axis=0) * head_mask            # (H*BS, D)
        s = jax.lax.dot_general(q_big, k_r, (((1,), (1,)), ((), ())),
                                preferred_element_type=f32) * scale       # (H*BS, BS)
        s = s + attn_bias                                                 # causal + cross-batch mask
        m = jnp.max(s, axis=-1, keepdims=True)
        p = jnp.exp(s - m)
        p = p * pl.reciprocal(jnp.sum(p, axis=-1, keepdims=True), approx=False)
        c = jnp.dot(p, v, preferred_element_type=f32) * head_mask         # (H*BS, D)
        ctx = c[0:BS, :]
        for h in range(1, H):                 # fold head blocks back to (BS, D)
            ctx = ctx + c[h * BS:(h + 1) * BS, :]
        x = x + jnp.dot(ctx, wo_ref[l], preferred_element_type=f32) + bo_ref[l]

        # ---------------- GLU feed-forward sub-block (pre-norm + residual) ---
        h2 = _rmsnorm(x, n2_ref[l])
        ab = jnp.dot(h2, wab_ref[l], preferred_element_type=f32) + bab_ref[l]  # (BS, 2F)
        a = ab[:, :F]                         # lane-128-aligned slices: free
        b = ab[:, F:]
        up = a * (jax.nn.sigmoid(b) * b)
        x = x + jnp.dot(up, wd_ref[l], preferred_element_type=f32) + bd_ref[l]

    # ---------------- final vocabulary projection (lane-dense store) ---------
    out_ref[...] = jnp.dot(x, wfc_ref[...], preferred_element_type=f32) + bfc_ref[...]


def minikl_forward(tokens, emb, params, cos, sin, cos_sin, sin_sq,
                   head_mask, attn_bias, wfc, bfc,
                   *, num_heads, d_head, d_ff_pad):
    # Embedding lookup (token gather) as plain-JAX glue; fused by XLA into the
    # same jit as the single pallas_call.
    B, S = tokens.shape
    D = emb.shape[1]
    V = wfc.shape[1]
    L = params["wq"].shape[0]
    x = jnp.take(emb, tokens.reshape(-1), axis=0).astype(jnp.float32)   # (B*S, D)

    kern = functools.partial(minikl_fused_kernel, num_heads=num_heads,
                             d_head=d_head, num_layers=L, d_ff_pad=d_ff_pad)
    out = pl.pallas_call(
        kern,
        out_shape=jax.ShapeDtypeStruct((B * S, V), jnp.float32),
        # No grid: single invocation, whole arrays VMEM-resident (default specs);
        # nothing is double-buffered and there is no per-step overhead.
    )(x, cos, sin, cos_sin, sin_sq, head_mask, attn_bias,
      params["n1"], params["wq"], params["bq"], params["wqr"], params["bqr"],
      params["wv"], params["bv"], params["wo"], params["bo"],
      params["n2"], params["wab"], params["bab"], params["wd"], params["bd"],
      wfc, bfc)
    return out.reshape(B, S, V)


# ----------------------------------------------------------------------------
# Host-side parameter / constant construction.
# ----------------------------------------------------------------------------
def init_layer(key, D, dff):
    ks = jax.random.split(key, 12)
    w = lambda k, s: jax.random.normal(k, s, jnp.float32) * 0.1
    return dict(
        n1=jnp.ones((1, D), jnp.float32),
        wq=w(ks[0], (D, D)), bq=w(ks[1], (1, D)),
        wv=w(ks[2], (D, D)), bv=w(ks[3], (1, D)),
        wo=w(ks[4], (D, D)), bo=w(ks[5], (1, D)),
        n2=jnp.ones((1, D), jnp.float32),
        wa=w(ks[6], (D, dff)), ba=w(ks[7], (1, dff)),
        wb=w(ks[8], (D, dff)), bb=w(ks[9], (1, dff)),
        wd=w(ks[10], (dff, D)), bd=w(ks[11], (1, D)),
    )


def make_rot_matrix(d_head, num_heads):
    # Signed pair-permutation R with (x@R)[2i] = x[2i+1], (x@R)[2i+1] = -x[2i].
    P = np.zeros((d_head, d_head), np.float32)
    for j in range(d_head // 2):
        P[2 * j + 1, 2 * j] = 1.0
        P[2 * j, 2 * j + 1] = -1.0
    return jnp.asarray(np.kron(np.eye(num_heads, dtype=np.float32), P))


def make_rope_tables(B, S, d_head, H, theta):
    pos = jnp.arange(S, dtype=jnp.float32)[:, None]
    i = jnp.arange(d_head // 2, dtype=jnp.float32)
    omega = jnp.exp(-2.0 * i / d_head * math.log(theta))
    ang = pos * omega
    cos = jnp.tile(jnp.repeat(jnp.cos(ang), 2, axis=-1), (1, H))   # (S, D)
    sin = jnp.tile(jnp.repeat(jnp.sin(ang), 2, axis=-1), (1, H))
    cos = jnp.tile(cos, (B, 1))                                    # (B*S, D)
    sin = jnp.tile(sin, (B, 1))
    return cos, sin, cos * sin, sin * sin


def make_masks(B, S, H, d_head, D):
    BS = B * S
    r = np.arange(H * BS)
    head_mask = (r[:, None] // BS == np.arange(D)[None, :] // d_head).astype(np.float32)
    bs_r = r % BS
    b_r, i_r = bs_r // S, bs_r % S
    c = np.arange(BS)
    b_c, j_c = c // S, c % S
    allowed = (b_r[:, None] == b_c[None, :]) & (j_c[None, :] <= i_r[:, None])
    # -1e30 additive fill (not -inf): safe because every query row has at
    # least one allowed key (its own position).
    attn_bias = np.where(allowed, 0.0, -1e30).astype(np.float32)
    return jnp.asarray(head_mask), jnp.asarray(attn_bias)


def pack_params(layers, d_ff_pad, rot):
    stack = lambda name: jnp.stack([p[name] for p in layers], axis=0)
    dff = layers[0]["wa"].shape[1]
    pc = d_ff_pad - dff
    hp = jax.lax.Precision.HIGHEST
    wq, bq = stack("wq"), stack("bq")
    wa = jnp.pad(stack("wa"), ((0, 0), (0, 0), (0, pc)))
    ba = jnp.pad(stack("ba"), ((0, 0), (0, 0), (0, pc)))
    wb = jnp.pad(stack("wb"), ((0, 0), (0, 0), (0, pc)))
    bb = jnp.pad(stack("bb"), ((0, 0), (0, 0), (0, pc)))
    return dict(
        n1=stack("n1"), wq=wq, bq=bq,
        # Fold R into the q projection (bit-exact: R is a signed permutation).
        wqr=jnp.einsum("lde,ef->ldf", wq, rot, precision=hp),
        bqr=jnp.einsum("lde,ef->ldf", bq, rot, precision=hp),
        wv=stack("wv"), bv=stack("bv"), wo=stack("wo"), bo=stack("bo"),
        n2=stack("n2"),
        # Fused GLU up-projection: [wa | wb] -> one (D, 2F) matmul per layer;
        # the a/b split point (lane 128) is tile-aligned.
        wab=jnp.concatenate([wa, wb], axis=-1),
        bab=jnp.concatenate([ba, bb], axis=-1),
        wd=jnp.pad(stack("wd"), ((0, 0), (0, pc), (0, 0))),
        bd=stack("bd"),
    )


# ----------------------------------------------------------------------------
# Pure-JAX reference (mirrors the PyTorch module, unpadded d_ff) for a sanity
# check of the fused kernel.
# ----------------------------------------------------------------------------
def reference_forward(tokens, emb, layer_list, wfc, bfc, *, num_heads, d_head, theta):
    hp = jax.lax.Precision.HIGHEST
    x = jnp.take(emb, tokens, axis=0)
    B, S, D = x.shape
    pos = jnp.arange(S, dtype=jnp.float32)[:, None]
    i = jnp.arange(d_head // 2, dtype=jnp.float32)
    omega = jnp.exp(-2.0 * i / d_head * math.log(theta))
    cos = jnp.repeat(jnp.cos(pos * omega), 2, axis=-1)
    sin = jnp.repeat(jnp.sin(pos * omega), 2, axis=-1)

    def rope(t):  # (B, H, S, dh)
        rot = jnp.stack([t[..., 1::2], -t[..., 0::2]], axis=-1).reshape(t.shape)
        return t * cos + rot * sin

    def rms(t, w):
        return t * jax.lax.rsqrt(jnp.mean(t * t, -1, keepdims=True) + _RMS_EPS) * w

    causal = jnp.tril(jnp.ones((S, S), bool))
    for p in layer_list:
        h = rms(x, p["n1"])
        q = jnp.einsum("bsd,de->bse", h, p["wq"], precision=hp) + p["bq"]
        v = jnp.einsum("bsd,de->bse", h, p["wv"], precision=hp) + p["bv"]
        q = q.reshape(B, S, num_heads, d_head).transpose(0, 2, 1, 3)
        v = v.reshape(B, S, num_heads, d_head).transpose(0, 2, 1, 3)
        q = rope(q)
        k = rope(q)  # reference bug reproduced: k = rope(rope(q)); w_k unused
        s = jnp.einsum("bhqd,bhkd->bhqk", q, k, precision=hp) / math.sqrt(d_head)
        s = jnp.where(causal, s, -jnp.inf)
        pa = jax.nn.softmax(s, axis=-1)
        ctx = jnp.einsum("bhqk,bhkd->bhqd", pa, v, precision=hp)
        ctx = ctx.transpose(0, 2, 1, 3).reshape(B, S, D)
        x = x + jnp.einsum("bsd,de->bse", ctx, p["wo"], precision=hp) + p["bo"]
        h2 = rms(x, p["n2"])
        a = jnp.einsum("bsd,df->bsf", h2, p["wa"], precision=hp) + p["ba"]
        b = jnp.einsum("bsd,df->bsf", h2, p["wb"], precision=hp) + p["bb"]
        up = a * (jax.nn.sigmoid(b) * b)
        x = x + jnp.einsum("bsf,fd->bsd", up, p["wd"], precision=hp) + p["bd"]
    return jnp.einsum("bsd,dv->bsv", x, wfc, precision=hp) + bfc


if __name__ == "__main__":
    # Small config consistent with MiniKLConfig (num_heads == g, as in the
    # default config; required by the reference's k = rope(q) bug).
    batch, seq_len = 2, 16
    d_model, num_heads, g = 32, 4, 4
    d_head = d_model // num_heads
    num_layers = 2
    vocab_size = 128
    theta = 1.0e6
    d_ff = 2 * 4 * d_model // 3       # GLU hidden = 85
    d_ff_pad = 128                    # padded to the 128-lane width (zeros)

    key = jax.random.PRNGKey(0)
    k_emb, k_tok, k_fc_w, k_fc_b, *k_layers = jax.random.split(key, 4 + num_layers)

    emb_table = jax.random.normal(k_emb, (vocab_size, d_model), jnp.float32) * 0.1
    tokens = jax.random.randint(k_tok, (batch, seq_len), 0, vocab_size)
    wfc = jax.random.normal(k_fc_w, (d_model, vocab_size), jnp.float32) * 0.1
    bfc = jax.random.normal(k_fc_b, (1, vocab_size), jnp.float32) * 0.1
    layer_list = [init_layer(k, d_model, d_ff) for k in k_layers]

    rot = make_rot_matrix(d_head, num_heads)
    params = pack_params(layer_list, d_ff_pad, rot)
    cos, sin, cos_sin, sin_sq = make_rope_tables(batch, seq_len, d_head, num_heads, theta)
    head_mask, attn_bias = make_masks(batch, seq_len, num_heads, d_head, d_model)

    fwd = jax.jit(functools.partial(minikl_forward, num_heads=num_heads,
                                    d_head=d_head, d_ff_pad=d_ff_pad))
    logits = fwd(tokens, emb_table, params, cos, sin, cos_sin, sin_sq,
                 head_mask, attn_bias, wfc, bfc)
    jax.block_until_ready(logits)

    assert logits.shape == (batch, seq_len, vocab_size)
    assert bool(jnp.all(jnp.isfinite(logits)))

    # Sanity check against a straightforward (unpadded, per-head) JAX reference.
    ref = reference_forward(tokens, emb_table, layer_list, wfc, bfc,
                            num_heads=num_heads, d_head=d_head, theta=theta)
    max_err = float(jnp.max(jnp.abs(logits - ref)))
    assert max_err < 5e-3, f"kernel/reference mismatch: max abs err = {max_err}"

    print("KERNEL_OK")
</pallas_src>

<mosaic_0001>
module attributes {stable_mosaic.version = 11 : i64} {
  func.func @minikl_fused_kernel(%arg0: memref<32x32xf32, #tpu.memory_space<vmem>>, %arg1: memref<32x32xf32, #tpu.memory_space<vmem>>, %arg2: memref<32x32xf32, #tpu.memory_space<vmem>>, %arg3: memref<32x32xf32, #tpu.memory_space<vmem>>, %arg4: memref<32x32xf32, #tpu.memory_space<vmem>>, %arg5: memref<128x32xf32, #tpu.memory_space<vmem>>, %arg6: memref<128x32xf32, #tpu.memory_space<vmem>>, %arg7: memref<2x1x32xf32, #tpu.memory_space<vmem>>, %arg8: memref<2x32x32xf32, #tpu.memory_space<vmem>>, %arg9: memref<2x1x32xf32, #tpu.memory_space<vmem>>, %arg10: memref<2x32x32xf32, #tpu.memory_space<vmem>>, %arg11: memref<2x1x32xf32, #tpu.memory_space<vmem>>, %arg12: memref<2x32x32xf32, #tpu.memory_space<vmem>>, %arg13: memref<2x1x32xf32, #tpu.memory_space<vmem>>, %arg14: memref<2x32x32xf32, #tpu.memory_space<vmem>>, %arg15: memref<2x1x32xf32, #tpu.memory_space<vmem>>, %arg16: memref<2x1x32xf32, #tpu.memory_space<vmem>>, %arg17: memref<2x32x256xf32, #tpu.memory_space<vmem>>, %arg18: memref<2x1x256xf32, #tpu.memory_space<vmem>>, %arg19: memref<2x128x32xf32, #tpu.memory_space<vmem>>, %arg20: memref<2x1x32xf32, #tpu.memory_space<vmem>>, %arg21: memref<32x128xf32, #tpu.memory_space<vmem>>, %arg22: memref<1x128xf32, #tpu.memory_space<vmem>>, %arg23: memref<32x128xf32, #tpu.memory_space<vmem>>) attributes {dimension_semantics = [], scalar_prefetch = 0 : i64, scratch_operands = 0 : i64, tpu.core_type = #tpu.core_type<tc>} {
    %c0 = arith.constant 0 : index
    %c0_0 = arith.constant 0 : index
    %0 = vector.load %arg0[%c0, %c0_0] : memref<32x32xf32, #tpu.memory_space<vmem>>, vector<32x32xf32>
    %c0_1 = arith.constant 0 : index
    %c0_2 = arith.constant 0 : index
    %1 = vector.load %arg1[%c0_1, %c0_2] : memref<32x32xf32, #tpu.memory_space<vmem>>, vector<32x32xf32>
    %c0_3 = arith.constant 0 : index
    %c0_4 = arith.constant 0 : index
    %2 = vector.load %arg2[%c0_3, %c0_4] : memref<32x32xf32, #tpu.memory_space<vmem>>, vector<32x32xf32>
    %c0_5 = arith.constant 0 : index
    %c0_6 = arith.constant 0 : index
    %3 = vector.load %arg3[%c0_5, %c0_6] : memref<32x32xf32, #tpu.memory_space<vmem>>, vector<32x32xf32>
    %c0_7 = arith.constant 0 : index
    %c0_8 = arith.constant 0 : index
    %4 = vector.load %arg4[%c0_7, %c0_8] : memref<32x32xf32, #tpu.memory_space<vmem>>, vector<32x32xf32>
    %c0_9 = arith.constant 0 : index
    %c0_10 = arith.constant 0 : index
    %5 = vector.load %arg5[%c0_9, %c0_10] : memref<128x32xf32, #tpu.memory_space<vmem>>, vector<128x32xf32>
    %c0_11 = arith.constant 0 : index
    %c0_12 = arith.constant 0 : index
    %6 = vector.load %arg6[%c0_11, %c0_12] : memref<128x32xf32, #tpu.memory_space<vmem>>, vector<128x32xf32>
    %c0_13 = arith.constant 0 : index
    %c0_14 = arith.constant 0 : index
    %c0_15 = arith.constant 0 : index
    %7 = vector.load %arg7[%c0_13, %c0_14, %c0_15] : memref<2x1x32xf32, #tpu.memory_space<vmem>>, vector<1x1x32xf32>
    %8 = vector.shape_cast %7 : vector<1x1x32xf32> to vector<1x32xf32>
    %9 = arith.mulf %0, %0 : vector<32x32xf32>
    %cst = arith.constant dense<0.000000e+00> : vector<32xf32>
    %10 = vector.multi_reduction <add>, %9, %cst [1] : vector<32x32xf32> to vector<32xf32>
    %11 = vector.shape_cast %10 : vector<32xf32> to vector<32x1xf32>
    %cst_16 = arith.constant 3.200000e+01 : f32
    %12 = vector.broadcast %cst_16 : f32 to vector<32x1xf32>
    %13 = arith.divf %11, %12 : vector<32x1xf32>
    %cst_17 = arith.constant 1.1920929E-7 : f32
    %14 = vector.broadcast %cst_17 : f32 to vector<32x1xf32>
    %15 = arith.addf %13, %14 : vector<32x1xf32>
    %16 = math.rsqrt %15 : vector<32x1xf32>
    %17 = vector.broadcast %16 : vector<32x1xf32> to vector<32x32xf32>
    %18 = arith.mulf %0, %17 : vector<32x32xf32>
    %19 = vector.broadcast %8 : vector<1x32xf32> to vector<32x32xf32>
    %20 = arith.mulf %18, %19 : vector<32x32xf32>
    %c0_18 = arith.constant 0 : index
    %c0_19 = arith.constant 0 : index
    %c0_20 = arith.constant 0 : index
    %21 = vector.load %arg8[%c0_18, %c0_19, %c0_20] : memref<2x32x32xf32, #tpu.memory_space<vmem>>, vector<1x32x32xf32>
    %22 = vector.shape_cast %21 : vector<1x32x32xf32> to vector<32x32xf32>
    %cst_21 = arith.constant dense<0.000000e+00> : vector<32x32xf32>
    %23 = tpu.matmul %20, %22, %cst_21 {dimension_numbers = #tpu.dot_dimension_numbers<[1], [0], [0], [1], [0, 0, 1, 1], [], []>} : vector<32x32xf32>, vector<32x32xf32>, vector<32x32xf32> -> vector<32x32xf32>
    %c0_22 = arith.constant 0 : index
    %c0_23 = arith.constant 0 : index
    %c0_24 = arith.constant 0 : index
    %24 = vector.load %arg9[%c0_22, %c0_23, %c0_24] : memref<2x1x32xf32, #tpu.memory_space<vmem>>, vector<1x1x32xf32>
    %25 = vector.shape_cast %24 : vector<1x1x32xf32> to vector<1x32xf32>
    %26 = vector.broadcast %25 : vector<1x32xf32> to vector<32x32xf32>
    %27 = arith.addf %23, %26 : vector<32x32xf32>
    %c0_25 = arith.constant 0 : index
    %c0_26 = arith.constant 0 : index
    %c0_27 = arith.constant 0 : index
    %28 = vector.load %arg10[%c0_25, %c0_26, %c0_27] : memref<2x32x32xf32, #tpu.memory_space<vmem>>, vector<1x32x32xf32>
    %29 = vector.shape_cast %28 : vector<1x32x32xf32> to vector<32x32xf32>
    %cst_28 = arith.constant dense<0.000000e+00> : vector<32x32xf32>
    %30 = tpu.matmul %20, %29, %cst_28 {dimension_numbers = #tpu.dot_dimension_numbers<[1], [0], [0], [1], [0, 0, 1, 1], [], []>} : vector<32x32xf32>, vector<32x32xf32>, vector<32x32xf32> -> vector<32x32xf32>
    %c0_29 = arith.constant 0 : index
    %c0_30 = arith.constant 0 : index
    %c0_31 = arith.constant 0 : index
    %31 = vector.load %arg11[%c0_29, %c0_30, %c0_31] : memref<2x1x32xf32, #tpu.memory_space<vmem>>, vector<1x1x32xf32>
    %32 = vector.shape_cast %31 : vector<1x1x32xf32> to vector<1x32xf32>
    %33 = vector.broadcast %32 : vector<1x32xf32> to vector<32x32xf32>
    %34 = arith.addf %30, %33 : vector<32x32xf32>
    %c0_32 = arith.constant 0 : index
    %c0_33 = arith.constant 0 : index
    %c0_34 = arith.constant 0 : index
    %35 = vector.load %arg12[%c0_32, %c0_33, %c0_34] : memref<2x32x32xf32, #tpu.memory_space<vmem>>, vector<1x32x32xf32>
    %36 = vector.shape_cast %35 : vector<1x32x32xf32> to vector<32x32xf32>
    %cst_35 = arith.constant dense<0.000000e+00> : vector<32x32xf32>
    %37 = tpu.matmul %20, %36, %cst_35 {dimension_numbers = #tpu.dot_dimension_numbers<[1], [0], [0], [1], [0, 0, 1, 1], [], []>} : vector<32x32xf32>, vector<32x32xf32>, vector<32x32xf32> -> vector<32x32xf32>
    %c0_36 = arith.constant 0 : index
    %c0_37 = arith.constant 0 : index
    %c0_38 = arith.constant 0 : index
    %38 = vector.load %arg13[%c0_36, %c0_37, %c0_38] : memref<2x1x32xf32, #tpu.memory_space<vmem>>, vector<1x1x32xf32>
    %39 = vector.shape_cast %38 : vector<1x1x32xf32> to vector<1x32xf32>
    %40 = vector.broadcast %39 : vector<1x32xf32> to vector<32x32xf32>
    %41 = arith.addf %37, %40 : vector<32x32xf32>
    %42 = arith.mulf %27, %1 : vector<32x32xf32>
    %43 = arith.mulf %34, %2 : vector<32x32xf32>
    %44 = arith.addf %42, %43 : vector<32x32xf32>
    %45 = arith.mulf %44, %1 : vector<32x32xf32>
    %46 = arith.mulf %34, %3 : vector<32x32xf32>
    %47 = arith.addf %45, %46 : vector<32x32xf32>
    %48 = arith.mulf %27, %4 : vector<32x32xf32>
    %49 = arith.subf %47, %48 : vector<32x32xf32>
    %50 = tpu.concatenate %44, %44, %44, %44 in 0 : vector<32x32xf32>, vector<32x32xf32>, vector<32x32xf32>, vector<32x32xf32> -> vector<128x32xf32>
    %51 = arith.mulf %50, %5 : vector<128x32xf32>
    %cst_39 = arith.constant dense<0.000000e+00> : vector<128x32xf32>
    %52 = tpu.matmul %51, %49, %cst_39 {dimension_numbers = #tpu.dot_dimension_numbers<[1], [1], [0], [0], [0, 0, 1, 0], [], []>} : vector<128x32xf32>, vector<32x32xf32>, vector<128x32xf32> -> vector<128x32xf32>
    %cst_40 = arith.constant 0.353553385 : f32
    %53 = vector.broadcast %cst_40 : f32 to vector<128x32xf32>
    %54 = arith.mulf %52, %53 : vector<128x32xf32>
    %55 = arith.addf %54, %6 : vector<128x32xf32>
    %cst_41 = arith.constant dense<0xFF800000> : vector<128xf32>
    %56 = vector.multi_reduction <maximumf>, %55, %cst_41 [1] : vector<128x32xf32> to vector<128xf32>
    %57 = vector.shape_cast %56 : vector<128xf32> to vector<128x1xf32>
    %58 = vector.broadcast %57 : vector<128x1xf32> to vector<128x32xf32>
    %59 = arith.subf %55, %58 : vector<128x32xf32>
    %60 = math.exp %59 : vector<128x32xf32>
    %cst_42 = arith.constant dense<0.000000e+00> : vector<128xf32>
    %61 = vector.multi_reduction <add>, %60, %cst_42 [1] : vector<128x32xf32> to vector<128xf32>
    %62 = vector.shape_cast %61 : vector<128xf32> to vector<128x1xf32>
    %63 = tpu.reciprocal %62 : vector<128x1xf32> -> vector<128x1xf32>
    %64 = vector.broadcast %63 : vector<128x1xf32> to vector<128x32xf32>
    %65 = arith.mulf %60, %64 : vector<128x32xf32>
    %cst_43 = arith.constant dense<0.000000e+00> : vector<128x32xf32>
    %66 = tpu.matmul %65, %41, %cst_43 {dimension_numbers = #tpu.dot_dimension_numbers<[1], [0], [0], [1], [0, 0, 1, 1], [], []>} : vector<128x32xf32>, vector<32x32xf32>, vector<128x32xf32> -> vector<128x32xf32>
    %67 = arith.mulf %66, %5 : vector<128x32xf32>
    %68 = vector.extract_strided_slice %67 {offsets = [0, 0], sizes = [32, 32], strides = [1, 1]} : vector<128x32xf32> to vector<32x32xf32>
    %69 = vector.extract_strided_slice %67 {offsets = [32, 0], sizes = [32, 32], strides = [1, 1]} : vector<128x32xf32> to vector<32x32xf32>
    %70 = arith.addf %68, %69 : vector<32x32xf32>
    %71 = vector.extract_strided_slice %67 {offsets = [64, 0], sizes = [32, 32], strides = [1, 1]} : vector<128x32xf32> to vector<32x32xf32>
    %72 = arith.addf %70, %71 : vector<32x32xf32>
    %73 = vector.extract_strided_slice %67 {offsets = [96, 0], sizes = [32, 32], strides = [1, 1]} : vector<128x32xf32> to vector<32x32xf32>
    %74 = arith.addf %72, %73 : vector<32x32xf32>
    %c0_44 = arith.constant 0 : index
    %c0_45 = arith.constant 0 : index
    %c0_46 = arith.constant 0 : index
    %75 = vector.load %arg14[%c0_44, %c0_45, %c0_46] : memref<2x32x32xf32, #tpu.memory_space<vmem>>, vector<1x32x32xf32>
    %76 = vector.shape_cast %75 : vector<1x32x32xf32> to vector<32x32xf32>
    %cst_47 = arith.constant dense<0.000000e+00> : vector<32x32xf32>
    %77 = tpu.matmul %74, %76, %cst_47 {dimension_numbers = #tpu.dot_dimension_numbers<[1], [0], [0], [1], [0, 0, 1, 1], [], []>} : vector<32x32xf32>, vector<32x32xf32>, vector<32x32xf32> -> vector<32x32xf32>
    %78 = arith.addf %0, %77 : vector<32x32xf32>
    %c0_48 = arith.constant 0 : index
    %c0_49 = arith.constant 0 : index
    %c0_50 = arith.constant 0 : index
    %79 = vector.load %arg15[%c0_48, %c0_49, %c0_50] : memref<2x1x32xf32, #tpu.memory_space<vmem>>, vector<1x1x32xf32>
    %80 = vector.shape_cast %79 : vector<1x1x32xf32> to vector<1x32xf32>
    %81 = vector.broadcast %80 : vector<1x32xf32> to vector<32x32xf32>
    %82 = arith.addf %78, %81 : vector<32x32xf32>
    %c0_51 = arith.constant 0 : index
    %c0_52 = arith.constant 0 : index
    %c0_53 = arith.constant 0 : index
    %83 = vector.load %arg16[%c0_51, %c0_52, %c0_53] : memref<2x1x32xf32, #tpu.memory_space<vmem>>, vector<1x1x32xf32>
    %84 = vector.shape_cast %83 : vector<1x1x32xf32> to vector<1x32xf32>
    %85 = arith.mulf %82, %82 : vector<32x32xf32>
    %cst_54 = arith.constant dense<0.000000e+00> : vector<32xf32>
    %86 = vector.multi_reduction <add>, %85, %cst_54 [1] : vector<32x32xf32> to vector<32xf32>
    %87 = vector.shape_cast %86 : vector<32xf32> to vector<32x1xf32>
    %cst_55 = arith.constant 3.200000e+01 : f32
    %88 = vector.broadcast %cst_55 : f32 to vector<32x1xf32>
    %89 = arith.divf %87, %88 : vector<32x1xf32>
    %cst_56 = arith.constant 1.1920929E-7 : f32
    %90 = vector.broadcast %cst_56 : f32 to vector<32x1xf32>
    %91 = arith.addf %89, %90 : vector<32x1xf32>
    %92 = math.rsqrt %91 : vector<32x1xf32>
    %93 = vector.broadcast %92 : vector<32x1xf32> to vector<32x32xf32>
    %94 = arith.mulf %82, %93 : vector<32x32xf32>
    %95 = vector.broadcast %84 : vector<1x32xf32> to vector<32x32xf32>
    %96 = arith.mulf %94, %95 : vector<32x32xf32>
    %c0_57 = arith.constant 0 : index
    %c0_58 = arith.constant 0 : index
    %c0_59 = arith.constant 0 : index
    %97 = vector.load %arg17[%c0_57, %c0_58, %c0_59] : memref<2x32x256xf32, #tpu.memory_space<vmem>>, vector<1x32x256xf32>
    %98 = vector.shape_cast %97 : vector<1x32x256xf32> to vector<32x256xf32>
    %cst_60 = arith.constant dense<0.000000e+00> : vector<32x256xf32>
    %99 = tpu.matmul %96, %98, %cst_60 {dimension_numbers = #tpu.dot_dimension_numbers<[1], [0], [0], [1], [0, 0, 1, 1], [], []>} : vector<32x32xf32>, vector<32x256xf32>, vector<32x256xf32> -> vector<32x256xf32>
    %c0_61 = arith.constant 0 : index
    %c0_62 = arith.constant 0 : index
    %c0_63 = arith.constant 0 : index
    %100 = vector.load %arg18[%c0_61, %c0_62, %c0_63] : memref<2x1x256xf32, #tpu.memory_space<vmem>>, vector<1x1x256xf32>
    %101 = vector.shape_cast %100 : vector<1x1x256xf32> to vector<1x256xf32>
    %102 = vector.broadcast %101 : vector<1x256xf32> to vector<32x256xf32>
    %103 = arith.addf %99, %102 : vector<32x256xf32>
    %104 = vector.extract_strided_slice %103 {offsets = [0, 0], sizes = [32, 128], strides = [1, 1]} : vector<32x256xf32> to vector<32x128xf32>
    %105 = vector.extract_strided_slice %103 {offsets = [0, 128], sizes = [32, 128], strides = [1, 1]} : vector<32x256xf32> to vector<32x128xf32>
    %106 = arith.negf %105 : vector<32x128xf32>
    %107 = math.exp %106 : vector<32x128xf32>
    %cst_64 = arith.constant 1.000000e+00 : f32
    %108 = vector.broadcast %cst_64 : f32 to vector<32x128xf32>
    %109 = arith.addf %108, %107 : vector<32x128xf32>
    %110 = arith.divf %108, %109 : vector<32x128xf32>
    %111 = arith.mulf %110, %105 : vector<32x128xf32>
    %112 = arith.mulf %104, %111 : vector<32x128xf32>
    %c0_65 = arith.constant 0 : index
    %c0_66 = arith.constant 0 : index
    %c0_67 = arith.constant 0 : index
    %113 = vector.load %arg19[%c0_65, %c0_66, %c0_67] : memref<2x128x32xf32, #tpu.memory_space<vmem>>, vector<1x128x32xf32>
    %114 = vector.shape_cast %113 : vector<1x128x32xf32> to vector<128x32xf32>
    %cst_68 = arith.constant dense<0.000000e+00> : vector<32x32xf32>
    %115 = tpu.matmul %112, %114, %cst_68 {dimension_numbers = #tpu.dot_dimension_numbers<[1], [0], [0], [1], [0, 0, 1, 1], [], []>} : vector<32x128xf32>, vector<128x32xf32>, vector<32x32xf32> -> vector<32x32xf32>
    %116 = arith.addf %82, %115 : vector<32x32xf32>
    %c0_69 = arith.constant 0 : index
    %c0_70 = arith.constant 0 : index
    %c0_71 = arith.constant 0 : index
    %117 = vector.load %arg20[%c0_69, %c0_70, %c0_71] : memref<2x1x32xf32, #tpu.memory_space<vmem>>, vector<1x1x32xf32>
    %118 = vector.shape_cast %117 : vector<1x1x32xf32> to vector<1x32xf32>
    %119 = vector.broadcast %118 : vector<1x32xf32> to vector<32x32xf32>
    %120 = arith.addf %116, %119 : vector<32x32xf32>
    %c1 = arith.constant 1 : index
    %c0_72 = arith.constant 0 : index
    %c0_73 = arith.constant 0 : index
    %121 = vector.load %arg7[%c1, %c0_72, %c0_73] : memref<2x1x32xf32, #tpu.memory_space<vmem>>, vector<1x1x32xf32>
    %122 = vector.shape_cast %121 : vector<1x1x32xf32> to vector<1x32xf32>
    %123 = arith.mulf %120, %120 : vector<32x32xf32>
    %cst_74 = arith.constant dense<0.000000e+00> : vector<32xf32>
    %124 = vector.multi_reduction <add>, %123, %cst_74 [1] : vector<32x32xf32> to vector<32xf32>
    %125 = vector.shape_cast %124 : vector<32xf32> to vector<32x1xf32>
    %cst_75 = arith.constant 3.200000e+01 : f32
    %126 = vector.broadcast %cst_75 : f32 to vector<32x1xf32>
    %127 = arith.divf %125, %126 : vector<32x1xf32>
    %cst_76 = arith.constant 1.1920929E-7 : f32
    %128 = vector.broadcast %cst_76 : f32 to vector<32x1xf32>
    %129 = arith.addf %127, %128 : vector<32x1xf32>
    %130 = math.rsqrt %129 : vector<32x1xf32>
    %131 = vector.broadcast %130 : vector<32x1xf32> to vector<32x32xf32>
    %132 = arith.mulf %120, %131 : vector<32x32xf32>
    %133 = vector.broadcast %122 : vector<1x32xf32> to vector<32x32xf32>
    %134 = arith.mulf %132, %133 : vector<32x32xf32>
    %c1_77 = arith.constant 1 : index
    %c0_78 = arith.constant 0 : index
    %c0_79 = arith.constant 0 : index
    %135 = vector.load %arg8[%c1_77, %c0_78, %c0_79] : memref<2x32x32xf32, #tpu.memory_space<vmem>>, vector<1x32x32xf32>
    %136 = vector.shape_cast %135 : vector<1x32x32xf32> to vector<32x32xf32>
    %cst_80 = arith.constant dense<0.000000e+00> : vector<32x32xf32>
    %137 = tpu.matmul %134, %136, %cst_80 {dimension_numbers = #tpu.dot_dimension_numbers<[1], [0], [0], [1], [0, 0, 1, 1], [], []>} : vector<32x32xf32>, vector<32x32xf32>, vector<32x32xf32> -> vector<32x32xf32>
    %c1_81 = arith.constant 1 : index
    %c0_82 = arith.constant 0 : index
    %c0_83 = arith.constant 0 : index
    %138 = vector.load %arg9[%c1_81, %c0_82, %c0_83] : memref<2x1x32xf32, #tpu.memory_space<vmem>>, vector<1x1x32xf32>
    %139 = vector.shape_cast %138 : vector<1x1x32xf32> to vector<1x32xf32>
    %140 = vector.broadcast %139 : vector<1x32xf32> to vector<32x32xf32>
    %141 = arith.addf %137, %140 : vector<32x32xf32>
    %c1_84 = arith.constant 1 : index
    %c0_85 = arith.constant 0 : index
    %c0_86 = arith.constant 0 : index
    %142 = vector.load %arg10[%c1_84, %c0_85, %c0_86] : memref<2x32x32xf32, #tpu.memory_space<vmem>>, vector<1x32x32xf32>
    %143 = vector.shape_cast %142 : vector<1x32x32xf32> to vector<32x32xf32>
    %cst_87 = arith.constant dense<0.000000e+00> : vector<32x32xf32>
    %144 = tpu.matmul %134, %143, %cst_87 {dimension_numbers = #tpu.dot_dimension_numbers<[1], [0], [0], [1], [0, 0, 1, 1], [], []>} : vector<32x32xf32>, vector<32x32xf32>, vector<32x32xf32> -> vector<32x32xf32>
    %c1_88 = arith.constant 1 : index
    %c0_89 = arith.constant 0 : index
    %c0_90 = arith.constant 0 : index
    %145 = vector.load %arg11[%c1_88, %c0_89, %c0_90] : memref<2x1x32xf32, #tpu.memory_space<vmem>>, vector<1x1x32xf32>
    %146 = vector.shape_cast %145 : vector<1x1x32xf32> to vector<1x32xf32>
    %147 = vector.broadcast %146 : vector<1x32xf32> to vector<32x32xf32>
    %148 = arith.addf %144, %147 : vector<32x32xf32>
    %c1_91 = arith.constant 1 : index
    %c0_92 = arith.constant 0 : index
    %c0_93 = arith.constant 0 : index
    %149 = vector.load %arg12[%c1_91, %c0_92, %c0_93] : memref<2x32x32xf32, #tpu.memory_space<vmem>>, vector<1x32x32xf32>
    %150 = vector.shape_cast %149 : vector<1x32x32xf32> to vector<32x32xf32>
    %cst_94 = arith.constant dense<0.000000e+00> : vector<32x32xf32>
    %151 = tpu.matmul %134, %150, %cst_94 {dimension_numbers = #tpu.dot_dimension_numbers<[1], [0], [0], [1], [0, 0, 1, 1], [], []>} : vector<32x32xf32>, vector<32x32xf32>, vector<32x32xf32> -> vector<32x32xf32>
    %c1_95 = arith.constant 1 : index
    %c0_96 = arith.constant 0 : index
    %c0_97 = arith.constant 0 : index
    %152 = vector.load %arg13[%c1_95, %c0_96, %c0_97] : memref<2x1x32xf32, #tpu.memory_space<vmem>>, vector<1x1x32xf32>
    %153 = vector.shape_cast %152 : vector<1x1x32xf32> to vector<1x32xf32>
    %154 = vector.broadcast %153 : vector<1x32xf32> to vector<32x32xf32>
    %155 = arith.addf %151, %154 : vector<32x32xf32>
    %156 = arith.mulf %141, %1 : vector<32x32xf32>
    %157 = arith.mulf %148, %2 : vector<32x32xf32>
    %158 = arith.addf %156, %157 : vector<32x32xf32>
    %159 = arith.mulf %158, %1 : vector<32x32xf32>
    %160 = arith.mulf %148, %3 : vector<32x32xf32>
    %161 = arith.addf %159, %160 : vector<32x32xf32>
    %162 = arith.mulf %141, %4 : vector<32x32xf32>
    %163 = arith.subf %161, %162 : vector<32x32xf32>
    %164 = tpu.concatenate %158, %158, %158, %158 in 0 : vector<32x32xf32>, vector<32x32xf32>, vector<32x32xf32>, vector<32x32xf32> -> vector<128x32xf32>
    %165 = arith.mulf %164, %5 : vector<128x32xf32>
    %cst_98 = arith.constant dense<0.000000e+00> : vector<128x32xf32>
    %166 = tpu.matmul %165, %163, %cst_98 {dimension_numbers = #tpu.dot_dimension_numbers<[1], [1], [0], [0], [0, 0, 1, 0], [], []>} : vector<128x32xf32>, vector<32x32xf32>, vector<128x32xf32> -> vector<128x32xf32>
    %cst_99 = arith.constant 0.353553385 : f32
    %167 = vector.broadcast %cst_99 : f32 to vector<128x32xf32>
    %168 = arith.mulf %166, %167 : vector<128x32xf32>
    %169 = arith.addf %168, %6 : vector<128x32xf32>
    %cst_100 = arith.constant dense<0xFF800000> : vector<128xf32>
    %170 = vector.multi_reduction <maximumf>, %169, %cst_100 [1] : vector<128x32xf32> to vector<128xf32>
    %171 = vector.shape_cast %170 : vector<128xf32> to vector<128x1xf32>
    %172 = vector.broadcast %171 : vector<128x1xf32> to vector<128x32xf32>
    %173 = arith.subf %169, %172 : vector<128x32xf32>
    %174 = math.exp %173 : vector<128x32xf32>
    %cst_101 = arith.constant dense<0.000000e+00> : vector<128xf32>
    %175 = vector.multi_reduction <add>, %174, %cst_101 [1] : vector<128x32xf32> to vector<128xf32>
    %176 = vector.shape_cast %175 : vector<128xf32> to vector<128x1xf32>
    %177 = tpu.reciprocal %176 : vector<128x1xf32> -> vector<128x1xf32>
    %178 = vector.broadcast %177 : vector<128x1xf32> to vector<128x32xf32>
    %179 = arith.mulf %174, %178 : vector<128x32xf32>
    %cst_102 = arith.constant dense<0.000000e+00> : vector<128x32xf32>
    %180 = tpu.matmul %179, %155, %cst_102 {dimension_numbers = #tpu.dot_dimension_numbers<[1], [0], [0], [1], [0, 0, 1, 1], [], []>} : vector<128x32xf32>, vector<32x32xf32>, vector<128x32xf32> -> vector<128x32xf32>
    %181 = arith.mulf %180, %5 : vector<128x32xf32>
    %182 = vector.extract_strided_slice %181 {offsets = [0, 0], sizes = [32, 32], strides = [1, 1]} : vector<128x32xf32> to vector<32x32xf32>
    %183 = vector.extract_strided_slice %181 {offsets = [32, 0], sizes = [32, 32], strides = [1, 1]} : vector<128x32xf32> to vector<32x32xf32>
    %184 = arith.addf %182, %183 : vector<32x32xf32>
    %185 = vector.extract_strided_slice %181 {offsets = [64, 0], sizes = [32, 32], strides = [1, 1]} : vector<128x32xf32> to vector<32x32xf32>
    %186 = arith.addf %184, %185 : vector<32x32xf32>
    %187 = vector.extract_strided_slice %181 {offsets = [96, 0], sizes = [32, 32], strides = [1, 1]} : vector<128x32xf32> to vector<32x32xf32>
    %188 = arith.addf %186, %187 : vector<32x32xf32>
    %c1_103 = arith.constant 1 : index
    %c0_104 = arith.constant 0 : index
    %c0_105 = arith.constant 0 : index
    %189 = vector.load %arg14[%c1_103, %c0_104, %c0_105] : memref<2x32x32xf32, #tpu.memory_space<vmem>>, vector<1x32x32xf32>
    %190 = vector.shape_cast %189 : vector<1x32x32xf32> to vector<32x32xf32>
    %cst_106 = arith.constant dense<0.000000e+00> : vector<32x32xf32>
    %191 = tpu.matmul %188, %190, %cst_106 {dimension_numbers = #tpu.dot_dimension_numbers<[1], [0], [0], [1], [0, 0, 1, 1], [], []>} : vector<32x32xf32>, vector<32x32xf32>, vector<32x32xf32> -> vector<32x32xf32>
    %192 = arith.addf %120, %191 : vector<32x32xf32>
    %c1_107 = arith.constant 1 : index
    %c0_108 = arith.constant 0 : index
    %c0_109 = arith.constant 0 : index
    %193 = vector.load %arg15[%c1_107, %c0_108, %c0_109] : memref<2x1x32xf32, #tpu.memory_space<vmem>>, vector<1x1x32xf32>
    %194 = vector.shape_cast %193 : vector<1x1x32xf32> to vector<1x32xf32>
    %195 = vector.broadcast %194 : vector<1x32xf32> to vector<32x32xf32>
    %196 = arith.addf %192, %195 : vector<32x32xf32>
    %c1_110 = arith.constant 1 : index
    %c0_111 = arith.constant 0 : index
    %c0_112 = arith.constant 0 : index
    %197 = vector.load %arg16[%c1_110, %c0_111, %c0_112] : memref<2x1x32xf32, #tpu.memory_space<vmem>>, vector<1x1x32xf32>
    %198 = vector.shape_cast %197 : vector<1x1x32xf32> to vector<1x32xf32>
    %199 = arith.mulf %196, %196 : vector<32x32xf32>
    %cst_113 = arith.constant dense<0.000000e+00> : vector<32xf32>
    %200 = vector.multi_reduction <add>, %199, %cst_113 [1] : vector<32x32xf32> to vector<32xf32>
    %201 = vector.shape_cast %200 : vector<32xf32> to vector<32x1xf32>
    %cst_114 = arith.constant 3.200000e+01 : f32
    %202 = vector.broadcast %cst_114 : f32 to vector<32x1xf32>
    %203 = arith.divf %201, %202 : vector<32x1xf32>
    %cst_115 = arith.constant 1.1920929E-7 : f32
    %204 = vector.broadcast %cst_115 : f32 to vector<32x1xf32>
    %205 = arith.addf %203, %204 : vector<32x1xf32>
    %206 = math.rsqrt %205 : vector<32x1xf32>
    %207 = vector.broadcast %206 : vector<32x1xf32> to vector<32x32xf32>
    %208 = arith.mulf %196, %207 : vector<32x32xf32>
    %209 = vector.broadcast %198 : vector<1x32xf32> to vector<32x32xf32>
    %210 = arith.mulf %208, %209 : vector<32x32xf32>
    %c1_116 = arith.constant 1 : index
    %c0_117 = arith.constant 0 : index
    %c0_118 = arith.constant 0 : index
    %211 = vector.load %arg17[%c1_116, %c0_117, %c0_118] : memref<2x32x256xf32, #tpu.memory_space<vmem>>, vector<1x32x256xf32>
    %212 = vector.shape_cast %211 : vector<1x32x256xf32> to vector<32x256xf32>
    %cst_119 = arith.constant dense<0.000000e+00> : vector<32x256xf32>
    %213 = tpu.matmul %210, %212, %cst_119 {dimension_numbers = #tpu.dot_dimension_numbers<[1], [0], [0], [1], [0, 0, 1, 1], [], []>} : vector<32x32xf32>, vector<32x256xf32>, vector<32x256xf32> -> vector<32x256xf32>
    %c1_120 = arith.constant 1 : index
    %c0_121 = arith.constant 0 : index
    %c0_122 = arith.constant 0 : index
    %214 = vector.load %arg18[%c1_120, %c0_121, %c0_122] : memref<2x1x256xf32, #tpu.memory_space<vmem>>, vector<1x1x256xf32>
    %215 = vector.shape_cast %214 : vector<1x1x256xf32> to vector<1x256xf32>
    %216 = vector.broadcast %215 : vector<1x256xf32> to vector<32x256xf32>
    %217 = arith.addf %213, %216 : vector<32x256xf32>
    %218 = vector.extract_strided_slice %217 {offsets = [0, 0], sizes = [32, 128], strides = [1, 1]} : vector<32x256xf32> to vector<32x128xf32>
    %219 = vector.extract_strided_slice %217 {offsets = [0, 128], sizes = [32, 128], strides = [1, 1]} : vector<32x256xf32> to vector<32x128xf32>
    %220 = arith.negf %219 : vector<32x128xf32>
    %221 = math.exp %220 : vector<32x128xf32>
    %cst_123 = arith.constant 1.000000e+00 : f32
    %222 = vector.broadcast %cst_123 : f32 to vector<32x128xf32>
    %223 = arith.addf %222, %221 : vector<32x128xf32>
    %224 = arith.divf %222, %223 : vector<32x128xf32>
    %225 = arith.mulf %224, %219 : vector<32x128xf32>
    %226 = arith.mulf %218, %225 : vector<32x128xf32>
    %c1_124 = arith.constant 1 : index
    %c0_125 = arith.constant 0 : index
    %c0_126 = arith.constant 0 : index
    %227 = vector.load %arg19[%c1_124, %c0_125, %c0_126] : memref<2x128x32xf32, #tpu.memory_space<vmem>>, vector<1x128x32xf32>
    %228 = vector.shape_cast %227 : vector<1x128x32xf32> to vector<128x32xf32>
    %cst_127 = arith.constant dense<0.000000e+00> : vector<32x32xf32>
    %229 = tpu.matmul %226, %228, %cst_127 {dimension_numbers = #tpu.dot_dimension_numbers<[1], [0], [0], [1], [0, 0, 1, 1], [], []>} : vector<32x128xf32>, vector<128x32xf32>, vector<32x32xf32> -> vector<32x32xf32>
    %230 = arith.addf %196, %229 : vector<32x32xf32>
    %c1_128 = arith.constant 1 : index
    %c0_129 = arith.constant 0 : index
    %c0_130 = arith.constant 0 : index
    %231 = vector.load %arg20[%c1_128, %c0_129, %c0_130] : memref<2x1x32xf32, #tpu.memory_space<vmem>>, vector<1x1x32xf32>
    %232 = vector.shape_cast %231 : vector<1x1x32xf32> to vector<1x32xf32>
    %233 = vector.broadcast %232 : vector<1x32xf32> to vector<32x32xf32>
    %234 = arith.addf %230, %233 : vector<32x32xf32>
    %c0_131 = arith.constant 0 : index
    %c0_132 = arith.constant 0 : index
    %235 = vector.load %arg21[%c0_131, %c0_132] : memref<32x128xf32, #tpu.memory_space<vmem>>, vector<32x128xf32>
    %cst_133 = arith.constant dense<0.000000e+00> : vector<32x128xf32>
    %236 = tpu.matmul %234, %235, %cst_133 {dimension_numbers = #tpu.dot_dimension_numbers<[1], [0], [0], [1], [0, 0, 1, 1], [], []>} : vector<32x32xf32>, vector<32x128xf32>, vector<32x128xf32> -> vector<32x128xf32>
    %c0_134 = arith.constant 0 : index
    %c0_135 = arith.constant 0 : index
    %237 = vector.load %arg22[%c0_134, %c0_135] : memref<1x128xf32, #tpu.memory_space<vmem>>, vector<1x128xf32>
    %238 = vector.broadcast %237 : vector<1x128xf32> to vector<32x128xf32>
    %239 = arith.addf %236, %238 : vector<32x128xf32>
    %c0_136 = arith.constant 0 : index
    %c0_137 = arith.constant 0 : index
    %240 = vector.load %arg23[%c0_136, %c0_137] : memref<32x128xf32, #tpu.memory_space<vmem>>, vector<32x128xf32>
    tpu.vector_store %arg23[%c0_136, %c0_137], %239 {strides = array<i32>} : memref<32x128xf32, #tpu.memory_space<vmem>>, vector<32x128xf32>,
    return
  }
}

</mosaic_0001>

<bundles_post_ra>
// kernel: minikl_forward.1
= control target key start
LH: loop header
LB: loop body
LE: loop exit
PB: predicated region body
PF: predicated region fallthrough
CT: control target
= control target key end

     0   :  { %s4765_s0 = inlined_call_operand.vmem [shape: f32[32,32], index: 0, kind: input, shape index: {}]   ;;  %s4766_s1 = inlined_call_operand.vmem [shape: f32[32,32], index: 1, kind: input, shape index: {}]   ;;  %s4767_s2 = inlined_call_operand.vmem [shape: f32[32,32], index: 2, kind: input, shape index: {}]   ;;  %s4768_s3 = inlined_call_operand.vmem [shape: f32[32,32], index: 3, kind: input, shape index: {}]   ;;  %s4769_s4 = inlined_call_operand.vmem [shape: f32[32,32], index: 4, kind: input, shape index: {}]   ;;  %s4770_s5 = inlined_call_operand.vmem [shape: f32[128,32], index: 5, kind: input, shape index: {}]   ;;  %s4771_s6 = inlined_call_operand.vmem [shape: f32[128,32], index: 6, kind: input, shape index: {}]   ;;  %s4772_s7 = inlined_call_operand.vmem [shape: f32[2,1,32], index: 7, kind: input, shape index: {}]   ;;  %s4773_s8 = inlined_call_operand.vmem [shape: f32[2,32,32], index: 8, kind: input, shape index: {}]   ;;  %s4774_s9 = inlined_call_operand.vmem [shape: f32[2,1,32], index: 9, kind: input, shape index: {}]   ;;  %s4775_s10 = inlined_call_operand.vmem [shape: f32[2,32,32], index: 10, kind: input, shape index: {}]   ;;  %s4776_s11 = inlined_call_operand.vmem [shape: f32[2,1,32], index: 11, kind: input, shape index: {}]   ;;  %s4777_s12 = inlined_call_operand.vmem [shape: f32[2,32,32], index: 12, kind: input, shape index: {}]   ;;  %s4778_s13 = inlined_call_operand.vmem [shape: f32[2,1,32], index: 13, kind: input, shape index: {}]   ;;  %s4779_s14 = inlined_call_operand.vmem [shape: f32[2,32,32], index: 14, kind: input, shape index: {}]   ;;  %s4780_s15 = inlined_call_operand.vmem [shape: f32[2,1,32], index: 15, kind: input, shape index: {}]   ;;  %s4781_s16 = inlined_call_operand.vmem [shape: f32[2,1,32], index: 16, kind: input, shape index: {}]   ;;  %s4782_s17 = inlined_call_operand.vmem [shape: f32[2,32,256], index: 17, kind: input, shape index: {}]   ;;  %s4783_s18 = inlined_call_operand.vmem [shape: f32[2,1,256], index: 18, kind: input, shape index: {}]   ;;  %s4784_s19 = inlined_call_operand.vmem [shape: f32[2,128,32], index: 19, kind: input, shape index: {}]   ;;  %s4785_s20 = inlined_call_operand.vmem [shape: f32[2,1,32], index: 20, kind: input, shape index: {}]   ;;  %s4786_s21 = inlined_call_operand.vmem [shape: f32[32,128], index: 21, kind: input, shape index: {}]   ;;  %s4787_s22 = inlined_call_operand.vmem [shape: f32[1,128], index: 22, kind: input, shape index: {}]   ;;  %s4788_s23 = inlined_call_operand.hbm [shape: f32[32,128], index: 23, kind: output, shape index: {}]  }
   0x1   :  { %4797 = sst [smem:[#allocation5_spill]] %s4765_s0 }
   0x2   :  { %4798 = sst [smem:[#allocation6_spill]] %s4766_s1 }
   0x3   :  { %4799 = sst [smem:[#allocation7_spill]] %s4767_s2 }
   0x4   :  { %4800 = sst [smem:[#allocation8_spill]] %s4768_s3 }
   0x5   :  { %4801 = sst [smem:[#allocation9_spill]] %s4769_s4 }
   0x6   :  { %4802 = sst [smem:[#allocation10_spill]] %s4770_s5 }
   0x7   :  { %4803 = sst [smem:[#allocation11_spill]] %s4771_s6 }
   0x8   :  { %4804 = sst [smem:[#allocation12_spill]] %s4772_s7 }
   0x9   :  { %4805 = sst [smem:[#allocation13_spill]] %s4787_s22 }
   0xa   :  { %4806 = sst [smem:[#allocation14_spill]] %s4788_s23 }
   0xb   :  { %s4807_s24 = sld [smem:[#allocation5_spill]]  ;;  %vm132_vm0 = vcmask 261120  }
  0x11   :  { %v3412_v0 = vld [vmem:[%s4807_s24] sm:$0xff]  ;;  %v3417_v1 = vld [vmem:[%s4807_s24 + $0x10] sm:$0xff]  ;;  %v3422_v2 = vld [vmem:[%s4807_s24 + $0x8] sm:$0xff] }
  0x12   :  { %v128_v3 = vmul.f32 %v3412_v0, %v3412_v0  ;;  %v130_v4 = vmul.f32 %v3417_v1, %v3417_v1  ;;  %v3431_v5 = vld [vmem:[%s4807_s24 + $0x18] sm:$0xff]  ;;  %v129_v8 = vmul.f32 %v3422_v2, %v3422_v2 }
  0x13   :  { %v131_v9 = vmul.f32 %v3431_v5, %v3431_v5 }
  0x14   :  { %v133_v6 = vsel %vm132_vm0, %v128_v3, 0.0  ;;  %v139_v7 = vsel %vm132_vm0, %v130_v4, 0.0 }
  0x15   :  { %134 = vadd.xlane.f32.xlu0 %v133_v6  ;;  %140 = vadd.xlane.f32.xlu1 %v139_v7 }
  0x16   :  { %28 = vsyncpa [#allocation3], 0  ;;  %v136_v10 = vsel %vm132_vm0, %v129_v8, 0.0  ;;  %v142_v11 = vsel %vm132_vm0, %v131_v9, 0.0  ;;  %v3285_v12 = vmov 32.0   ;;  %v214_v16 = vld [vmem:[%s4773_s8 + $0x18] sm:$0xff] }
  0x17   :  { %2997 = vrcp.f32 %v3285_v12  ;;  %v263_v17 = vld [vmem:[%s4775_s10 + $0x18] sm:$0xff]  ;;  %243 = vmatpush.msra.mxu0 %v214_v16  ;;  %v213_v19 = vld [vmem:[%s4773_s8 + $0x10] sm:$0xff]  ;;  %v212_v23 = vld [vmem:[%s4773_s8 + $0x8] sm:$0xff]  ;;  %s4808_s2 = sld [smem:[#allocation12_spill]]  ;;  %s3286_s23 = smov [#allocation2]  }
  0x18   :  { %v300_v18 = vld [vmem:[%s4777_s12 + $0x18] sm:$0xff]  ;;  %280 = vmatpush.msra.mxu1 %v263_v17  ;;  %v262_v20 = vld [vmem:[%s4775_s10 + $0x10] sm:$0xff]  ;;  %v261_v24 = vld [vmem:[%s4775_s10 + $0x8] sm:$0xff]  ;;  %s4809_s0 = sld [smem:[#allocation6_spill]]  ;;  %s2780_s26 = sshll.u32 %s3286_s23, 4  ;;  %s2781_s26 = int_to_ptr.vmem [resolvable:$true] %s2780_s26 }
  0x19   :  { %317 = vmatpush.msra.mxu2 %v300_v18  ;;  %v299_v21 = vld [vmem:[%s4777_s12 + $0x10] sm:$0xff]  ;;  %244 = vmatpush.msra.mxu0 %v213_v19  ;;  %v298_v25 = vld [vmem:[%s4777_s12 + $0x8] sm:$0xff]  ;;  %v211_v26 = vld [vmem:[%s4773_s8] sm:$0xff]  ;;  %s4810_s25 = sld [smem:[#allocation7_spill]] }
  0x1a   :  { %281 = vmatpush.msra.mxu1 %v262_v20  ;;  %v260_v27 = vld [vmem:[%s4775_s10] sm:$0xff]  ;;  %s4811_s6 = sld [smem:[#allocation8_spill]] }
  0x1b   :  { %318 = vmatpush.msra.mxu2 %v299_v21  ;;  %245 = vmatpush.msra.mxu0 %v212_v23  ;;  %v297_v28 = vld [vmem:[%s4777_s12] sm:$0xff]  ;;  %s4812_s3 = sld [smem:[#allocation9_spill]] }
  0x1c   :  { %282 = vmatpush.msra.mxu1 %v261_v24  ;;  %s4813_s27 = sld [smem:[#allocation10_spill]] }
  0x1d   :  { %137 = vadd.xlane.f32.xlu0 %v136_v10  ;;  %143 = vadd.xlane.f32.xlu1 %v142_v11  ;;  %v2998_v13 = vpop.eup %2997  ;;  %v2982_v55 = vld [vmem:[%s4808_s2] ss:$0 sm:$0xff]  ;;  %s4814_s7 = sld [smem:[#allocation11_spill]] }
  0x1e   :  { %v146_v14 = vmul.f32 32.0, %v2998_v13  ;;  %319 = vmatpush.msra.mxu2 %v298_v25  ;;  %246 = vmatpush.msra.mxu0 %v211_v26  ;;  %vm150_vm1 = vweird.f32 %v2998_v13  ;;  %v2984_v25 = vld [vmem:[%s4776_s11] ss:$0 sm:$0xff]  ;;  %s4816_s22 = sld [smem:[#allocation14_spill]] }
  0x1f   :  { %283 = vmatpush.msra.mxu1 %v260_v27 }
  0x20   :  { %v147_v15 = vsub.f32 1.0, %v146_v14  ;;  %320 = vmatpush.msra.mxu2 %v297_v28  ;;  %v81_v28 = vld [vmem:[%s4809_s0 + $0x10] sm:$0xff] }
  0x22   :  { %v148_v22 = vmul.f32 %v2998_v13, %v147_v15 }
  0x24   :  { %v149_v29 = vadd.f32 %v2998_v13, %v148_v22  ;;  %s2782_s29 = sshll.u32 %s4816_s22, 4  ;;  %s2783_s29 = int_to_ptr.hbm [resolvable:$true] %s2782_s29 }
  0x26   :  { %v3477_v30 = vsel %vm150_vm1, %v2998_v13, %v149_v29  ;;  %v85_v29 = vld [vmem:[%s4810_s25 + $0x10] sm:$0xff] }
  0x88   :  { %v135_v31 = vpop.xlane.xlu0 %134  ;;  %v141_v32 = vpop.xlane.xlu1 %140 }
  0x89   :  { %v152_v33 = vmul.f32 %v3477_v30, %v135_v31  ;;  %v154_v34 = vmul.f32 %v3477_v30, %v141_v32  ;;  %v80_v32 = vld [vmem:[%s4809_s0 + $0x8] sm:$0xff] }
  0x8b   :  { %v156_v35 = vadd.f32 1.1920929e-07, %v152_v33  ;;  %v158_v36 = vadd.f32 1.1920929e-07, %v154_v34 }
  0x8d   :  { %2999 = vrsqrt.f32 %v156_v35  ;;  %vm166_vm3 = vweird.f32 %v156_v35  ;;  %vm186_vm6 = vweird.f32 %v158_v36 }
  0x8e   :  { %3001 = vrsqrt.f32 %v158_v36 }
  0x90   :  { %v138_v37 = vpop.xlane.xlu0 %137  ;;  %v144_v38 = vpop.xlane.xlu1 %143 }
  0x91   :  { %v153_v39 = vmul.f32 %v3477_v30, %v138_v37  ;;  %v155_v40 = vmul.f32 %v3477_v30, %v144_v38  ;;  %v84_v37 = vld [vmem:[%s4810_s25 + $0x8] sm:$0xff]  ;;  %v82_v38 = vld [vmem:[%s4809_s0 + $0x18] sm:$0xff] }
  0x93   :  { %v3000_v41 = vpop.eup %2999  ;;  %v157_v42 = vadd.f32 1.1920929e-07, %v153_v39  ;;  %v159_v43 = vadd.f32 1.1920929e-07, %v155_v40  ;;  %v86_v40 = vld [vmem:[%s4810_s25 + $0x18] sm:$0xff] }
  0x94   :  { %v3002_v44 = vpop.eup %3001  ;;  %v161_v45 = vmul.f32 %v3000_v41, %v156_v35  ;;  %vm167_vm2 = vweird.f32 %v3000_v41 }
  0x95   :  { %3003 = vrsqrt.f32 %v157_v42  ;;  %v181_v47 = vmul.f32 %v3002_v44, %v158_v36  ;;  %vm168_vm4 = vmor %vm166_vm3, %vm167_vm2  ;;  %vm187_vm7 = vweird.f32 %v3002_v44  ;;  %vm176_vm8 = vweird.f32 %v157_v42 }
  0x96   :  { %v162_v46 = vmul.f32 %v3000_v41, %v161_v45  ;;  %3005 = vrsqrt.f32 %v159_v43  ;;  %vm188_vm10 = vmor %vm186_vm6, %vm187_vm7  ;;  %vm196_vm11 = vweird.f32 %v159_v43 }
  0x97   :  { %v182_v50 = vmul.f32 %v3002_v44, %v181_v47  ;;  %v79_v47 = vld [vmem:[%s4809_s0] sm:$0xff] }
  0x98   :  { %v163_v48 = vmul.f32 0.5, %v162_v46 }
  0x99   :  { %v183_v56 = vmul.f32 0.5, %v182_v50 }
  0x9a   :  { %v164_v49 = vsub.f32 1.5, %v163_v48  ;;  %v83_v48 = vld [vmem:[%s4810_s25] sm:$0xff] }
  0x9b   :  { %v3004_v51 = vpop.eup %3003  ;;  %v184_v63 = vsub.f32 1.5, %v183_v56 }
  0x9c   :  { %v3006_v52 = vpop.eup %3005  ;;  %v165_v53 = vmul.f32 %v3000_v41, %v164_v49  ;;  %v171_v54 = vmul.f32 %v3004_v51, %v157_v42  ;;  %vm177_vm5 = vweird.f32 %v3004_v51 }
  0x9d   :  { %v191_v58 = vmul.f32 %v3006_v52, %v159_v43  ;;  %vm178_vm9 = vmor %vm176_vm8, %vm177_vm5  ;;  %v185_v7 = vmul.f32 %v3002_v44, %v184_v63  ;;  %vm197_vm12 = vweird.f32 %v3006_v52 }
  0x9e   :  { %v172_v57 = vmul.f32 %v3004_v51, %v171_v54  ;;  %v169_v59 = vsel %vm168_vm4, %v3000_v41, %v165_v53  ;;  %vm198_vm13 = vmor %vm196_vm11, %vm197_vm12  ;;  %v90_v53 = vld [vmem:[%s4811_s6 + $0x18] sm:$0xff] }
  0x9f   :  { %v200_v60 = vmul.f32 %v169_v59, %v3412_v0  ;;  %v192_v4 = vmul.f32 %v3006_v52, %v191_v58  ;;  %v189_v12 = vsel %vm188_vm10, %v3002_v44, %v185_v7  ;;  %v94_v58 = vld [vmem:[%s4812_s3 + $0x18] sm:$0xff]  ;;  %v2985_v59 = vld [vmem:[%s4778_s13] ss:$0 sm:$0xff] }
  0xa0   :  { %v173_v61 = vmul.f32 0.5, %v172_v57  ;;  %v202_v13 = vmul.f32 %v189_v12, %v3417_v1  ;;  %v89_v57 = vld [vmem:[%s4811_s6 + $0x10] sm:$0xff] }
  0xa1   :  { %v207_v62 = vmul.f32 %v2982_v55, %v200_v60  ;;  %v193_v8 = vmul.f32 0.5, %v192_v4 }
  0xa2   :  { %v174_v3 = vsub.f32 1.5, %v173_v61  ;;  %v209_v15 = vmul.f32 %v2982_v55, %v202_v13 }
  0xa3   :  { %2794 = vmatmul.msk.f32.vlgmr.msra.gmra.mxu0 %vm132_vm0, %v207_v62  ;;  %2798 = vmatmul.msk.f32.vlgmr.msra.gmra.mxu1 %vm132_vm0, %v207_v62  ;;  %v194_v11 = vsub.f32 1.5, %v193_v8 }
  0xa4   :  { %v175_v6 = vmul.f32 %v3004_v51, %v174_v3  ;;  %2802 = vmatmul.msk.f32.vlgmr.msra.gmra.mxu2 %vm132_vm0, %v207_v62 }
  0xa5   :  { %v195_v14 = vmul.f32 %v3006_v52, %v194_v11 }
  0xa6   :  { %v179_v0 = vsel %vm178_vm9, %v3004_v51, %v175_v6 }
  0xa7   :  { %v201_v9 = vmul.f32 %v179_v0, %v3422_v2  ;;  %v199_v16 = vsel %vm198_vm13, %v3006_v52, %v195_v14  ;;  %v88_v0 = vld [vmem:[%s4811_s6 + $0x8] sm:$0xff] }
  0xa8   :  { %v203_v2 = vmul.f32 %v199_v16, %v3431_v5  ;;  %v2983_v5 = vld [vmem:[%s4774_s9] ss:$0 sm:$0xff] }
  0xa9   :  { %v208_v10 = vmul.f32 %v2982_v55, %v201_v9  ;;  %v93_v9 = vld [vmem:[%s4812_s3 + $0x10] sm:$0xff] }
  0xaa   :  { %v210_v17 = vmul.f32 %v2982_v55, %v203_v2 }
  0xab   :  { %2795 = vmatmul.msk.f32.gmra.mxu0 %vm132_vm0, %v208_v10  ;;  %2799 = vmatmul.msk.f32.gmra.mxu1 %vm132_vm0, %v208_v10 }
  0xac   :  { %2803 = vmatmul.msk.f32.gmra.mxu2 %vm132_vm0, %v208_v10 }
  0xb3   :  { %2796 = vmatmul.msk.f32.gmra.mxu0 %vm132_vm0, %v209_v15  ;;  %2800 = vmatmul.msk.f32.gmra.mxu1 %vm132_vm0, %v209_v15 }
  0xb4   :  { %2804 = vmatmul.msk.f32.gmra.mxu2 %vm132_vm0, %v209_v15 }
  0xbb   :  { %2797 = vmatmul.msk.f32.gmra.mxu0 %vm132_vm0, %v210_v17  ;;  %2801 = vmatmul.msk.f32.gmra.mxu1 %vm132_vm0, %v210_v17 }
  0xbc   :  { %2805 = vmatmul.msk.f32.gmra.mxu2 %vm132_vm0, %v210_v17  ;;  %v87_v17 = vld [vmem:[%s4811_s6] sm:$0xff] }
 0x120   :  { %v248_v1 = vpop.f32.mrf.mxu0  ;;  %v285_v18 = vpop.f32.mrf.mxu1 }
 0x121   :  { %v249_v44 = vadd.f32 %v2983_v5, %v248_v1  ;;  %v286_v45 = vadd.f32 %v2984_v25, %v285_v18  ;;  %v92_v1 = vld [vmem:[%s4812_s3 + $0x8] sm:$0xff] }
 0x123   :  { %v334_v55 = vmul.f32 %v249_v44, %v79_v47  ;;  %v338_v56 = vmul.f32 %v286_v45, %v83_v48 }
 0x125   :  { %v3560_v11 = vadd.f32 %v338_v56, %v334_v55  ;;  %v107_v55 = vld [vmem:[%s4813_s27 + $0x60] sm:$0xff] }
 0x127   :  { %v3502_v19 = vpop.f32.mrf.mxu2  ;;  %v378_v56 = vmul.f32 %v3560_v11, %v107_v55 }
 0x128   :  { %v251_v20 = vpop.f32.mrf.mxu0  ;;  %v288_v21 = vpop.f32.mrf.mxu1  ;;  %v323_v18 = vadd.f32 %v2985_v59, %v3502_v19 }
 0x129   :  { %v252_v31 = vadd.f32 %v2983_v5, %v251_v20  ;;  %v289_v33 = vadd.f32 %v2984_v25, %v288_v21  ;;  %v346_v20 = vmul.f32 %v3560_v11, %v79_v47  ;;  %v104_v47 = vld [vmem:[%s4813_s27 + $0x48] sm:$0xff] }
 0x12b   :  { %v335_v46 = vmul.f32 %v252_v31, %v80_v32  ;;  %v339_v49 = vmul.f32 %v289_v33, %v84_v37  ;;  %v351_v16 = vmul.f32 %v289_v33, %v88_v0  ;;  %v97_v33 = vld [vmem:[%s4813_s27 + $0x10] sm:$0xff]  ;;  %v99_v37 = vld [vmem:[%s4813_s27 + $0x20] sm:$0xff] }
 0x12d   :  { %v3550_v60 = vadd.f32 %v339_v49, %v335_v46  ;;  %v105_v49 = vld [vmem:[%s4813_s27 + $0x50] sm:$0xff] }
 0x12f   :  { %v325_v22 = vpop.f32.mrf.mxu2  ;;  %v347_v12 = vmul.f32 %v3550_v60, %v80_v32  ;;  %v375_v48 = vmul.f32 %v3550_v60, %v104_v47 }
 0x130   :  { %v254_v23 = vpop.f32.mrf.mxu0  ;;  %v291_v24 = vpop.f32.mrf.mxu1  ;;  %v326_v15 = vadd.f32 %v2985_v59, %v325_v22 }
 0x131   :  { %v255_v26 = vadd.f32 %v2983_v5, %v254_v23  ;;  %v292_v27 = vadd.f32 %v2984_v25, %v291_v24  ;;  %v355_v21 = vadd.f32 %v351_v16, %v347_v12  ;;  %v350_v23 = vmul.f32 %v286_v45, %v87_v17  ;;  %v103_v45 = vld [vmem:[%s4813_s27 + $0x40] sm:$0xff]  ;;  %v114_v16 = vld [vmem:[%s4814_s7 + $0x18] sm:$0xff] }
 0x132   :  { %v359_v24 = vmul.f32 %v252_v31, %v92_v1  ;;  %v374_v46 = vmul.f32 %v3560_v11, %v103_v45 }
 0x133   :  { %v336_v34 = vmul.f32 %v255_v26, %v81_v28  ;;  %v340_v35 = vmul.f32 %v292_v27, %v85_v29  ;;  %v352_v6 = vmul.f32 %v292_v27, %v89_v57  ;;  %v360_v2 = vmul.f32 %v255_v26, %v93_v9  ;;  %v96_v29 = vld [vmem:[%s4813_s27 + $0x8] sm:$0xff] }
 0x134   :  { %v363_v26 = vsub.f32 %v355_v21, %v359_v24  ;;  %v367_v32 = vmul.f32 %v3550_v60, %v96_v29  ;;  %v108_v57 = vld [vmem:[%s4813_s27 + $0x68] sm:$0xff] }
 0x135   :  { %v3534_v50 = vadd.f32 %v340_v35, %v336_v34  ;;  %v98_v35 = vld [vmem:[%s4813_s27 + $0x18] sm:$0xff] }
 0x137   :  { %v328_v36 = vpop.f32.mrf.mxu2  ;;  %v348_v61 = vmul.f32 %v3534_v50, %v81_v28  ;;  %v95_v28 = vld [vmem:[%s4813_s27] sm:$0xff]  ;;  %v368_v34 = vmul.f32 %v3534_v50, %v97_v33 }
 0x138   :  { %v257_v39 = vpop.f32.mrf.mxu0  ;;  %v294_v41 = vpop.f32.mrf.mxu1  ;;  %v329_v10 = vadd.f32 %v2985_v59, %v328_v36  ;;  %v366_v31 = vmul.f32 %v3560_v11, %v95_v28  ;;  %v117_v28 = vld [vmem:[%s4814_s7 + $0x30] sm:$0xff] }
 0x139   :  { %v258_v42 = vadd.f32 %v2983_v5, %v257_v39  ;;  %v295_v43 = vadd.f32 %v2984_v25, %v294_v41  ;;  %v356_v13 = vadd.f32 %v352_v6, %v348_v61  ;;  %v91_v5 = vld [vmem:[%s4812_s3] sm:$0xff]  ;;  %v354_v25 = vadd.f32 %v350_v23, %v346_v20  ;;  %v100_v39 = vld [vmem:[%s4813_s27 + $0x28] sm:$0xff]  ;;  %v101_v41 = vld [vmem:[%s4813_s27 + $0x30] sm:$0xff] }
 0x13a   :  { %v358_v27 = vmul.f32 %v249_v44, %v91_v5  ;;  %v115_v20 = vld [vmem:[%s4814_s7 + $0x20] sm:$0xff]  ;;  %v116_v5 = vld [vmem:[%s4814_s7 + $0x28] sm:$0xff] }
 0x13b   :  { %v337_v51 = vmul.f32 %v258_v42, %v82_v38  ;;  %v341_v52 = vmul.f32 %v295_v43, %v86_v40  ;;  %v353_v63 = vmul.f32 %v295_v43, %v90_v53  ;;  %v361_v7 = vmul.f32 %v258_v42, %v94_v58  ;;  %v102_v43 = vld [vmem:[%s4813_s27 + $0x38] sm:$0xff] }
 0x13c   :  { %v364_v22 = vsub.f32 %v356_v13, %v360_v2  ;;  %v362_v19 = vsub.f32 %v354_v25, %v358_v27  ;;  %v371_v40 = vmul.f32 %v3550_v60, %v100_v39  ;;  %v372_v42 = vmul.f32 %v3534_v50, %v101_v41 }
 0x13d   :  { %v3539_v54 = vadd.f32 %v341_v52, %v337_v51  ;;  %v376_v51 = vmul.f32 %v3534_v50, %v105_v49  ;;  %v106_v52 = vld [vmem:[%s4813_s27 + $0x58] sm:$0xff]  ;;  %v379_v58 = vmul.f32 %v3550_v60, %v108_v57  ;;  %v111_v60 = vld [vmem:[%s4814_s7] sm:$0xff] }
 0x13f   :  { %v349_v62 = vmul.f32 %v3539_v54, %v82_v38  ;;  %v331_v3 = vpop.f32.mrf.mxu2  ;;  %v369_v36 = vmul.f32 %v3539_v54, %v98_v35  ;;  %v370_v38 = vmul.f32 %v3560_v11, %v99_v37  ;;  %v373_v44 = vmul.f32 %v3539_v54, %v102_v43  ;;  %v113_v11 = vld [vmem:[%s4814_s7 + $0x10] sm:$0xff] }
 0x140   :  { %v332_v4 = vadd.f32 %v2985_v59, %v331_v3  ;;  %v377_v53 = vmul.f32 %v3539_v54, %v106_v52  ;;  %v109_v59 = vld [vmem:[%s4813_s27 + $0x70] sm:$0xff] }
 0x141   :  { %v357_v8 = vadd.f32 %v353_v63, %v349_v62  ;;  %v380_v61 = vmul.f32 %v3534_v50, %v109_v59  ;;  %v110_v62 = vld [vmem:[%s4813_s27 + $0x78] sm:$0xff] }
 0x142   :  { %983 = vmatpush.msrb.mxu0 %v332_v4  ;;  %v381_v63 = vmul.f32 %v3539_v54, %v110_v62  ;;  %v120_v62 = vld [vmem:[%s4814_s7 + $0x48] sm:$0xff] }
 0x143   :  { %v365_v14 = vsub.f32 %v357_v8, %v361_v7  ;;  %v112_v8 = vld [vmem:[%s4814_s7 + $0x8] sm:$0xff] }
 0x144   :  { %984 = vmatpush.msrb.mxu0 %v329_v10 }
 0x145   :  { %2806 = vmatpush.xpose.msk.msrb.mxu1 %vm132_vm0, %v365_v14  ;;  %2974 = vmatpush.xpose.msk.msra.mxu3 %vm132_vm0, %v365_v14 }
 0x146   :  { %985 = vmatpush.msrb.mxu0 %v326_v15 }
 0x148   :  { %986 = vmatpush.msrb.mxu0 %v323_v18 }
 0x149   :  { %2807 = vmatpush.xpose.msk.msrb.mxu1 %vm132_vm0, %v364_v22  ;;  %2975 = vmatpush.xpose.msk.msra.mxu3 %vm132_vm0, %v364_v22 }
 0x14d   :  { %2808 = vmatpush.xpose.msk.msrb.mxu1 %vm132_vm0, %v363_v26  ;;  %2976 = vmatpush.xpose.msk.msra.mxu3 %vm132_vm0, %v363_v26 }
 0x151   :  { %2809 = vmatpush.xpose.msk.msrb.mxu1 %vm132_vm0, %v362_v19  ;;  %2977 = vmatpush.xpose.msk.msra.mxu3 %vm132_vm0, %v362_v19 }
 0x154   :  { %2810 = vmatmul.msk.f32.vlgmr.msrb.gmra.mxu1 %vm132_vm0, %v366_v31  ;;  %2811 = vmatmul.msk.f32.vlgmr.msra.gmra.mxu3 %vm132_vm0, %v367_v32 }
 0x15c   :  { %2812 = vmatmul.msk.f32.gmra.mxu3 %vm132_vm0, %v368_v34  ;;  %v118_v34 = vld [vmem:[%s4814_s7 + $0x38] sm:$0xff] }
 0x164   :  { %2813 = vmatmul.msk.f32.gmra.mxu3 %vm132_vm0, %v369_v36 }
 0x16c   :  { %2814 = vmatmul.msk.f32.gmra.mxu3 %vm132_vm0, %v370_v38 }
 0x174   :  { %2815 = vmatmul.msk.f32.gmra.mxu3 %vm132_vm0, %v371_v40 }
 0x17c   :  { %2816 = vmatmul.msk.f32.gmra.mxu3 %vm132_vm0, %v372_v42 }
 0x184   :  { %2817 = vmatmul.msk.f32.gmra.mxu3 %vm132_vm0, %v373_v44 }
 0x18c   :  { %2818 = vmatmul.msk.f32.gmra.mxu3 %vm132_vm0, %v374_v46 }
 0x194   :  { %2819 = vmatmul.msk.f32.gmra.mxu3 %vm132_vm0, %v375_v48 }
 0x19c   :  { %2820 = vmatmul.msk.f32.gmra.mxu3 %vm132_vm0, %v376_v51  ;;  %v119_v51 = vld [vmem:[%s4814_s7 + $0x40] sm:$0xff] }
 0x1a4   :  { %2821 = vmatmul.msk.f32.gmra.mxu3 %vm132_vm0, %v377_v53 }
 0x1ac   :  { %2822 = vmatmul.msk.f32.gmra.mxu3 %vm132_vm0, %v378_v56 }
 0x1b4   :  { %2823 = vmatmul.msk.f32.gmra.mxu3 %vm132_vm0, %v379_v58 }
 0x1bc   :  { %2824 = vmatmul.msk.f32.gmra.mxu3 %vm132_vm0, %v380_v61 }
 0x1c4   :  { %2825 = vmatmul.msk.f32.gmra.mxu3 %vm132_vm0, %v381_v63 }
 0x1d1   :  { %v459_v3 = vpop.f32.mrf.mxu1 }
 0x1d2   :  { %v507_v4 = vmul.f32 0.35355338, %v459_v3 }
 0x1d4   :  { %v523_v6 = vadd.f32 %v507_v4, %v111_v60 }
 0x1d6   :  { %v539_v7 = vsel %vm132_vm0, %v523_v6, -inf }
 0x1d7   :  { %v462_v50 = vpop.f32.mrf.mxu3  ;;  %540 = vmax.xlane.f32.xlu2 %v539_v7 }
 0x1d8   :  { %v508_v0 = vmul.f32 0.35355338, %v462_v50 }
 0x1da   :  { %v524_v9 = vadd.f32 %v508_v0, %v112_v8  ;;  %v121_v0 = vld [vmem:[%s4814_s7 + $0x50] sm:$0xff] }
 0x1dc   :  { %v542_v54 = vsel %vm132_vm0, %v524_v9, -inf }
 0x1df   :  { %v465_v10 = vpop.f32.mrf.mxu3  ;;  %543 = vmax.xlane.f32.xlu2 %v542_v54 }
 0x1e0   :  { %v509_v12 = vmul.f32 0.35355338, %v465_v10 }
 0x1e2   :  { %v525_v13 = vadd.f32 %v509_v12, %v113_v11 }
 0x1e4   :  { %v545_v14 = vsel %vm132_vm0, %v525_v13, -inf }
 0x1e5   :  { %546 = vmax.xlane.f32.xlu0 %v545_v14 }
 0x1e7   :  { %v468_v15 = vpop.f32.mrf.mxu3 }
 0x1e8   :  { %v510_v2 = vmul.f32 0.35355338, %v468_v15 }
 0x1ea   :  { %v526_v17 = vadd.f32 %v510_v2, %v114_v16 }
 0x1ec   :  { %v548_v1 = vsel %vm132_vm0, %v526_v17, -inf }
 0x1ed   :  { %549 = vmax.xlane.f32.xlu1 %v548_v1 }
 0x1ef   :  { %v471_v18 = vpop.f32.mrf.mxu3 }
 0x1f0   :  { %v511_v21 = vmul.f32 0.35355338, %v471_v18 }
 0x1f2   :  { %v3681_v22 = vadd.f32 %v511_v21, %v115_v20 }
 0x1f4   :  { %v551_v23 = vsel %vm132_vm0, %v3681_v22, -inf }
 0x1f5   :  { %552 = vmax.xlane.f32.xlu2 %v551_v23 }
 0x1f7   :  { %v474_v24 = vpop.f32.mrf.mxu3 }
 0x1f8   :  { %v512_v25 = vmul.f32 0.35355338, %v474_v24 }
 0x1fa   :  { %v3688_v26 = vadd.f32 %v512_v25, %v116_v5 }
 0x1fc   :  { %v554_v27 = vsel %vm132_vm0, %v3688_v26, -inf }
 0x1fd   :  { %555 = vmax.xlane.f32.xlu0 %v554_v27  ;;  %v123_v27 = vld [vmem:[%s4814_s7 + $0x60] sm:$0xff] }
 0x1ff   :  { %v477_v19 = vpop.f32.mrf.mxu3 }
 0x200   :  { %v513_v29 = vmul.f32 0.35355338, %v477_v19 }
 0x202   :  { %v3695_v31 = vadd.f32 %v513_v29, %v117_v28 }
 0x204   :  { %v557_v32 = vsel %vm132_vm0, %v3695_v31, -inf }
 0x205   :  { %558 = vmax.xlane.f32.xlu1 %v557_v32 }
 0x207   :  { %v480_v33 = vpop.f32.mrf.mxu3 }
 0x208   :  { %v514_v35 = vmul.f32 0.35355338, %v480_v33 }
 0x20a   :  { %v3702_v36 = vadd.f32 %v514_v35, %v118_v34 }
 0x20c   :  { %v560_v37 = vsel %vm132_vm0, %v3702_v36, -inf }
 0x20d   :  { %561 = vmax.xlane.f32.xlu0 %v560_v37  ;;  %v124_v37 = vld [vmem:[%s4814_s7 + $0x68] sm:$0xff] }
 0x20f   :  { %v483_v38 = vpop.f32.mrf.mxu3 }
 0x210   :  { %v515_v47 = vmul.f32 0.35355338, %v483_v38 }
 0x212   :  { %v3713_v55 = vadd.f32 %v515_v47, %v119_v51  ;;  %v125_v47 = vld [vmem:[%s4814_s7 + $0x70] sm:$0xff] }
 0x214   :  { %v563_v59 = vsel %vm132_vm0, %v3713_v55, -inf }
 0x217   :  { %v486_v41 = vpop.f32.mrf.mxu3 }
 0x218   :  { %v516_v58 = vmul.f32 0.35355338, %v486_v41 }
 0x21a   :  { %v3724_v4 = vadd.f32 %v516_v58, %v120_v62 }
 0x21f   :  { %v489_v49 = vpop.f32.mrf.mxu3 }
 0x220   :  { %v517_v50 = vmul.f32 0.35355338, %v489_v49 }
 0x222   :  { %v3735_v10 = vadd.f32 %v517_v50, %v121_v0 }
 0x224   :  { %v569_v16 = vsel %vm132_vm0, %v3735_v10, -inf }
 0x227   :  { %v492_v3 = vpop.f32.mrf.mxu3 }
 0x228   :  { %v518_v15 = vmul.f32 0.35355338, %v492_v3 }
 0x24a   :  { %v541_v39 = vpop.xlane.xlu2 %540 }
 0x24b   :  { %v587_v40 = vsub.f32 %v523_v6, %v541_v39 }
 0x24d   :  { %v603_v42 = vmul.f32 1.442695, %v587_v40 }
 0x24f   :  { %3007 = vpow2.f32 %v603_v42 }
 0x252   :  { %v544_v43 = vpop.xlane.xlu2 %543 }
 0x253   :  { %v588_v44 = vsub.f32 %v524_v9, %v544_v43  ;;  %v566_v9 = vsel %vm132_vm0, %v3724_v4, -inf }
 0x255   :  { %v3706_v45 = vpop.eup %3007  ;;  %v605_v46 = vmul.f32 1.442695, %v588_v44 }
 0x256   :  { %v635_v48 = vsel %vm132_vm0, %v3706_v45, 0.0 }
 0x257   :  { %3009 = vpow2.f32 %v605_v46  ;;  %636 = vadd.xlane.f32.xlu2 %v635_v48 }
 0x258   :  { %v547_v52 = vpop.xlane.xlu0 %546 }
 0x259   :  { %v589_v53 = vsub.f32 %v525_v13, %v547_v52  ;;  %v495_v13 = vpop.f32.mrf.mxu3 }
 0x25a   :  { %v519_v23 = vmul.f32 0.35355338, %v495_v13 }
 0x25b   :  { %v607_v56 = vmul.f32 1.442695, %v589_v53 }
 0x25d   :  { %v3715_v57 = vpop.eup %3009  ;;  %3011 = vpow2.f32 %v607_v56  ;;  %v126_v56 = vld [vmem:[%s4814_s7 + $0x78] sm:$0xff] }
 0x25e   :  { %v638_v61 = vsel %vm132_vm0, %v3715_v57, 0.0 }
 0x25f   :  { %564 = vmax.xlane.f32.xlu2 %v563_v59  ;;  %639 = vadd.xlane.f32.xlu1 %v638_v61 }
 0x260   :  { %v550_v63 = vpop.xlane.xlu1 %549 }
 0x261   :  { %v590_v60 = vsub.f32 %v526_v17, %v550_v63  ;;  %v122_v17 = vld [vmem:[%s4814_s7 + $0x58] sm:$0xff]  ;;  %v498_v25 = vpop.f32.mrf.mxu3 }
 0x262   :  { %v3747_v18 = vadd.f32 %v518_v15, %v122_v17  ;;  %v520_v33 = vmul.f32 0.35355338, %v498_v25 }
 0x263   :  { %v3726_v6 = vpop.eup %3011  ;;  %v609_v7 = vmul.f32 1.442695, %v590_v60 }
 0x264   :  { %v641_v8 = vsel %vm132_vm0, %v3726_v6, 0.0  ;;  %v572_v24 = vsel %vm132_vm0, %v3747_v18, -inf }
 0x265   :  { %3013 = vpow2.f32 %v609_v7  ;;  %642 = vadd.xlane.f32.xlu0 %v641_v8 }
 0x267   :  { %567 = vmax.xlane.f32.xlu1 %v566_v9 }
 0x268   :  { %v553_v54 = vpop.xlane.xlu2 %552 }
 0x269   :  { %v591_v11 = vsub.f32 %v3681_v22, %v553_v54  ;;  %v501_v38 = vpop.f32.mrf.mxu3 }
 0x26a   :  { %v521_v43 = vmul.f32 0.35355338, %v501_v38 }
 0x26b   :  { %v3738_v12 = vpop.eup %3013  ;;  %v611_v14 = vmul.f32 1.442695, %v591_v11 }
 0x26c   :  { %v644_v2 = vsel %vm132_vm0, %v3738_v12, 0.0  ;;  %v3783_v48 = vadd.f32 %v521_v43, %v125_v47 }
 0x26d   :  { %3015 = vpow2.f32 %v611_v14  ;;  %570 = vmax.xlane.f32.xlu0 %v569_v16  ;;  %645 = vadd.xlane.f32.xlu2 %v644_v2 }
 0x26e   :  { %v581_v52 = vsel %vm132_vm0, %v3783_v48, -inf }
 0x270   :  { %v556_v1 = vpop.xlane.xlu0 %555 }
 0x271   :  { %v592_v20 = vsub.f32 %v3688_v26, %v556_v1  ;;  %v3759_v26 = vadd.f32 %v519_v23, %v123_v27 }
 0x273   :  { %v3750_v21 = vpop.eup %3015  ;;  %v613_v22 = vmul.f32 1.442695, %v592_v20  ;;  %v575_v35 = vsel %vm132_vm0, %v3759_v26, -inf }
 0x274   :  { %v647_v5 = vsel %vm132_vm0, %v3750_v21, 0.0 }
 0x275   :  { %3017 = vpow2.f32 %v613_v22  ;;  %573 = vmax.xlane.f32.xlu2 %v572_v24  ;;  %648 = vadd.xlane.f32.xlu1 %v647_v5 }
 0x278   :  { %v559_v19 = vpop.xlane.xlu1 %558 }
 0x279   :  { %v593_v28 = vsub.f32 %v3695_v31, %v559_v19  ;;  %v3771_v31 = vadd.f32 %v520_v33, %v124_v37 }
 0x27b   :  { %v3762_v29 = vpop.eup %3017  ;;  %v615_v32 = vmul.f32 1.442695, %v593_v28  ;;  %v578_v44 = vsel %vm132_vm0, %v3771_v31, -inf }
 0x27c   :  { %v650_v34 = vsel %vm132_vm0, %v3762_v29, 0.0 }
 0x27d   :  { %3019 = vpow2.f32 %v615_v32  ;;  %651 = vadd.xlane.f32.xlu0 %v650_v34  ;;  %576 = vmax.xlane.f32.xlu1 %v575_v35 }
 0x280   :  { %v562_v39 = vpop.xlane.xlu0 %561 }
 0x281   :  { %v594_v40 = vsub.f32 %v3702_v36, %v562_v39  ;;  %v504_v36 = vpop.f32.mrf.mxu3 }
 0x282   :  { %v522_v51 = vmul.f32 0.35355338, %v504_v36 }
 0x283   :  { %v3774_v41 = vpop.eup %3019  ;;  %v617_v42 = vmul.f32 1.442695, %v594_v40 }
 0x284   :  { %v653_v46 = vsel %vm132_vm0, %v3774_v41, 0.0  ;;  %v3794_v58 = vadd.f32 %v522_v51, %v126_v56 }
 0x285   :  { %3021 = vpow2.f32 %v617_v42  ;;  %579 = vmax.xlane.f32.xlu0 %v578_v44  ;;  %654 = vadd.xlane.f32.xlu2 %v653_v46 }
 0x286   :  { %v584_v59 = vsel %vm132_vm0, %v3794_v58, -inf }
 0x28b   :  { %v3785_v49 = vpop.eup %3021 }
 0x28c   :  { %v656_v53 = vsel %vm132_vm0, %v3785_v49, 0.0 }
 0x28d   :  { %582 = vmax.xlane.f32.xlu2 %v581_v52  ;;  %657 = vadd.xlane.f32.xlu1 %v656_v53 }
 0x295   :  { %585 = vmax.xlane.f32.xlu1 %v584_v59 }
 0x2ca   :  { %v637_v61 = vpop.xlane.xlu2 %636 }
 0x2cb   :  { %3023 = vrcp.f32 %v637_v61  ;;  %v694_v8 = vand.u32 2147483648, %v637_v61  ;;  %v692_v54 = vand.u32 2147483647, %v637_v61  ;;  %vm688_vm15 = vweird.f32 %v637_v61 }
 0x2cd   :  { %v695_v15 = vor.u32 1.1754944e-38, %v694_v8  ;;  %vm693_vm2 = vcmp.eq.f32.partialorder %v692_v54, 8.507059e+37 }
 0x2d1   :  { %v3024_v62 = vpop.eup %3023 }
 0x2d2   :  { %v684_v63 = vmul.f32 %v3024_v62, %v637_v61  ;;  %v640_v3 = vpop.xlane.xlu1 %639  ;;  %v565_v60 = vpop.xlane.xlu2 %564  ;;  %vm689_vm14 = vweird.f32 %v3024_v62 }
 0x2d3   :  { %3025 = vrcp.f32 %v640_v3  ;;  %v595_v7 = vsub.f32 %v3713_v55, %v565_v60  ;;  %vm690_vm1 = vmor %vm688_vm15, %vm689_vm14  ;;  %v708_v24 = vand.u32 2147483648, %v640_v3  ;;  %v706_v19 = vand.u32 2147483647, %v640_v3 }
 0x2d4   :  { %v685_v50 = vsub.f32 1.0, %v684_v63  ;;  %vm702_vm4 = vweird.f32 %v640_v3 }
 0x2d5   :  { %v619_v0 = vmul.f32 1.442695, %v595_v7  ;;  %v709_v34 = vor.u32 1.1754944e-38, %v708_v24  ;;  %vm707_vm6 = vcmp.eq.f32.partialorder %v706_v19, 8.507059e+37 }
 0x2d6   :  { %v686_v9 = vmul.f32 %v3024_v62, %v685_v50 }
 0x2d7   :  { %3027 = vpow2.f32 %v619_v0 }
 0x2d8   :  { %v687_v11 = vadd.f32 %v3024_v62, %v686_v9  ;;  %v643_v13 = vpop.xlane.xlu0 %642 }
 0x2d9   :  { %v3026_v14 = vpop.eup %3025  ;;  %3029 = vrcp.f32 %v643_v13  ;;  %v722_v43 = vand.u32 2147483648, %v643_v13  ;;  %v720_v47 = vand.u32 2147483647, %v643_v13  ;;  %vm716_vm8 = vweird.f32 %v643_v13 }
 0x2da   :  { %v698_v16 = vmul.f32 %v3026_v14, %v640_v3  ;;  %v568_v2 = vpop.xlane.xlu1 %567  ;;  %v691_v17 = vsel %vm690_vm1, %v3024_v62, %v687_v11  ;;  %vm703_vm3 = vweird.f32 %v3026_v14 }
 0x2db   :  { %v596_v55 = vsub.f32 %v3724_v4, %v568_v2  ;;  %v696_v1 = vsel %vm693_vm2, %v695_v15, %v691_v17  ;;  %vm704_vm5 = vmor %vm702_vm4, %vm703_vm3  ;;  %v723_v52 = vor.u32 1.1754944e-38, %v722_v43  ;;  %vm721_vm10 = vcmp.eq.f32.partialorder %v720_v47, 8.507059e+37 }
 0x2dc   :  { %v699_v20 = vsub.f32 1.0, %v698_v16  ;;  %v907_v22 = vmul.f32 %v3706_v45, %v696_v1 }
 0x2dd   :  { %v3801_v23 = vpop.eup %3027  ;;  %v621_v5 = vmul.f32 1.442695, %v596_v55 }
 0x2de   :  { %v700_v25 = vmul.f32 %v3026_v14, %v699_v20  ;;  %2826 = vmatmul.msk.f32.vlgmr.msrb.gmra.mxu0 %vm132_vm0, %v907_v22  ;;  %v659_v27 = vsel %vm132_vm0, %v3801_v23, 0.0 }
 0x2df   :  { %v3030_v28 = vpop.eup %3029  ;;  %3031 = vpow2.f32 %v621_v5  ;;  %660 = vadd.xlane.f32.xlu0 %v659_v27 }
 0x2e0   :  { %v712_v4 = vmul.f32 %v3030_v28, %v643_v13  ;;  %v571_v32 = vpop.xlane.xlu0 %570  ;;  %v646_v33 = vpop.xlane.xlu2 %645  ;;  %v701_v45 = vadd.f32 %v3026_v14, %v700_v25  ;;  %vm717_vm7 = vweird.f32 %v3030_v28 }
 0x2e1   :  { %v597_v35 = vsub.f32 %v3735_v10, %v571_v32  ;;  %3033 = vrcp.f32 %v646_v33  ;;  %vm718_vm9 = vmor %vm716_vm8, %vm717_vm7  ;;  %v736_v60 = vand.u32 2147483648, %v646_v33  ;;  %v734_v9 = vand.u32 2147483647, %v646_v33 }
 0x2e2   :  { %v713_v37 = vsub.f32 1.0, %v712_v4  ;;  %v705_v38 = vsel %vm704_vm5, %v3026_v14, %v701_v45  ;;  %vm730_vm12 = vweird.f32 %v646_v33 }
 0x2e3   :  { %v623_v39 = vmul.f32 1.442695, %v597_v35  ;;  %v710_v40 = vsel %vm707_vm6, %v709_v34, %v705_v38  ;;  %v737_v11 = vor.u32 1.1754944e-38, %v736_v60  ;;  %vm735_vm14 = vcmp.eq.f32.partialorder %v734_v9, 8.507059e+37 }
 0x2e4   :  { %v714_v42 = vmul.f32 %v3030_v28, %v713_v37  ;;  %v908_v44 = vmul.f32 %v3715_v57, %v710_v40 }
 0x2e5   :  { %v3808_v46 = vpop.eup %3031  ;;  %3035 = vpow2.f32 %v623_v39 }
 0x2e6   :  { %2827 = vmatmul.msk.f32.gmra.mxu0 %vm132_vm0, %v908_v44  ;;  %v662_v10 = vsel %vm132_vm0, %v3808_v46, 0.0  ;;  %v715_v36 = vadd.f32 %v3030_v28, %v714_v42 }
 0x2e7   :  { %v3034_v51 = vpop.eup %3033  ;;  %663 = vadd.xlane.f32.xlu2 %v662_v10 }
 0x2e8   :  { %v726_v53 = vmul.f32 %v3034_v51, %v646_v33  ;;  %v649_v56 = vpop.xlane.xlu1 %648  ;;  %v574_v59 = vpop.xlane.xlu2 %573  ;;  %v719_v57 = vsel %vm718_vm9, %v3030_v28, %v715_v36  ;;  %vm731_vm11 = vweird.f32 %v3034_v51 }
 0x2e9   :  { %3037 = vrcp.f32 %v649_v56  ;;  %v598_v61 = vsub.f32 %v3747_v18, %v574_v59  ;;  %v724_v63 = vsel %vm721_vm10, %v723_v52, %v719_v57  ;;  %vm732_vm13 = vmor %vm730_vm12, %vm731_vm11  ;;  %v750_v1 = vand.u32 2147483648, %v649_v56 }
 0x2ea   :  { %v727_v62 = vsub.f32 1.0, %v726_v53  ;;  %v909_v0 = vmul.f32 %v3726_v6, %v724_v63  ;;  %v748_v25 = vand.u32 2147483647, %v649_v56  ;;  %vm744_vm1 = vweird.f32 %v649_v56 }
 0x2eb   :  { %v3814_v3 = vpop.eup %3035  ;;  %v625_v7 = vmul.f32 1.442695, %v598_v61  ;;  %v751_v19 = vor.u32 1.1754944e-38, %v750_v1 }
 0x2ec   :  { %v728_v50 = vmul.f32 %v3034_v51, %v727_v62  ;;  %v665_v8 = vsel %vm132_vm0, %v3814_v3, 0.0  ;;  %vm749_vm3 = vcmp.eq.f32.partialorder %v748_v25, 8.507059e+37 }
 0x2ed   :  { %3039 = vpow2.f32 %v625_v7  ;;  %666 = vadd.xlane.f32.xlu0 %v665_v8 }
 0x2ee   :  { %2828 = vmatmul.msk.f32.gmra.mxu0 %vm132_vm0, %v909_v0  ;;  %v729_v18 = vadd.f32 %v3034_v51, %v728_v50 }
 0x2ef   :  { %v3038_v54 = vpop.eup %3037 }
 0x2f0   :  { %v740_v13 = vmul.f32 %v3038_v54, %v649_v56  ;;  %v652_v14 = vpop.xlane.xlu0 %651  ;;  %v577_v15 = vpop.xlane.xlu1 %576  ;;  %v733_v16 = vsel %vm732_vm13, %v3034_v51, %v729_v18  ;;  %vm745_vm15 = vweird.f32 %v3038_v54 }
 0x2f1   :  { %3041 = vrcp.f32 %v652_v14  ;;  %v599_v2 = vsub.f32 %v3759_v26, %v577_v15  ;;  %v738_v17 = vsel %vm735_vm14, %v737_v11, %v733_v16  ;;  %vm746_vm2 = vmor %vm744_vm1, %vm745_vm15  ;;  %v764_v37 = vand.u32 2147483648, %v652_v14 }
 0x2f2   :  { %v741_v6 = vsub.f32 1.0, %v740_v13  ;;  %v910_v5 = vmul.f32 %v3738_v12, %v738_v17  ;;  %v762_v43 = vand.u32 2147483647, %v652_v14  ;;  %vm758_vm5 = vweird.f32 %v652_v14 }
 0x2f3   :  { %v3821_v55 = vpop.eup %3039  ;;  %v627_v20 = vmul.f32 1.442695, %v599_v2  ;;  %v765_v47 = vor.u32 1.1754944e-38, %v764_v37 }
 0x2f4   :  { %v742_v22 = vmul.f32 %v3038_v54, %v741_v6  ;;  %v668_v24 = vsel %vm132_vm0, %v3821_v55, 0.0  ;;  %vm763_vm7 = vcmp.eq.f32.partialorder %v762_v43, 8.507059e+37 }
 0x2f5   :  { %3043 = vpow2.f32 %v627_v20  ;;  %669 = vadd.xlane.f32.xlu1 %v668_v24 }
 0x2f6   :  { %2829 = vmatmul.msk.f32.gmra.mxu0 %vm132_vm0, %v910_v5  ;;  %v743_v26 = vadd.f32 %v3038_v54, %v742_v22 }
 0x2f7   :  { %v3042_v27 = vpop.eup %3041 }
 0x2f8   :  { %v754_v28 = vmul.f32 %v3042_v27, %v652_v14  ;;  %v580_v4 = vpop.xlane.xlu0 %579  ;;  %v655_v32 = vpop.xlane.xlu2 %654  ;;  %v747_v33 = vsel %vm746_vm2, %v3038_v54, %v743_v26  ;;  %vm759_vm4 = vweird.f32 %v3042_v27 }
 0x2f9   :  { %v600_v45 = vsub.f32 %v3771_v31, %v580_v4  ;;  %3045 = vrcp.f32 %v655_v32  ;;  %v752_v34 = vsel %vm749_vm3, %v751_v19, %v747_v33  ;;  %vm760_vm6 = vmor %vm758_vm5, %vm759_vm4  ;;  %v778_v57 = vand.u32 2147483648, %v655_v32 }
 0x2fa   :  { %v755_v12 = vsub.f32 1.0, %v754_v28  ;;  %v911_v42 = vmul.f32 %v3750_v21, %v752_v34  ;;  %v776_v62 = vand.u32 2147483647, %v655_v32  ;;  %vm772_vm9 = vweird.f32 %v655_v32 }
 0x2fb   :  { %v3828_v35 = vpop.eup %3043  ;;  %v629_v38 = vmul.f32 1.442695, %v600_v45  ;;  %v779_v8 = vor.u32 1.1754944e-38, %v778_v57 }
 0x2fc   :  { %v756_v39 = vmul.f32 %v3042_v27, %v755_v12  ;;  %v671_v40 = vsel %vm132_vm0, %v3828_v35, 0.0  ;;  %vm777_vm11 = vcmp.eq.f32.partialorder %v776_v62, 8.507059e+37 }
 0x2fd   :  { %3047 = vpow2.f32 %v629_v38  ;;  %672 = vadd.xlane.f32.xlu2 %v671_v40 }
 0x2fe   :  { %2830 = vmatmul.msk.f32.gmra.mxu0 %vm132_vm0, %v911_v42  ;;  %v757_v31 = vadd.f32 %v3042_v27, %v756_v39 }
 0x2ff   :  { %v3046_v44 = vpop.eup %3045 }
 0x300   :  { %v768_v10 = vmul.f32 %v3046_v44, %v655_v32  ;;  %v658_v36 = vpop.xlane.xlu1 %657  ;;  %v583_v51 = vpop.xlane.xlu2 %582  ;;  %v761_v52 = vsel %vm760_vm6, %v3042_v27, %v757_v31  ;;  %vm773_vm8 = vweird.f32 %v3046_v44 }
 0x301   :  { %3049 = vrcp.f32 %v658_v36  ;;  %v601_v53 = vsub.f32 %v3783_v48, %v583_v51  ;;  %v766_v56 = vsel %vm763_vm7, %v765_v47, %v761_v52  ;;  %vm774_vm10 = vmor %vm772_vm9, %vm773_vm8  ;;  %v790_v16 = vand.u32 2147483647, %v658_v36 }
 0x302   :  { %v769_v21 = vsub.f32 1.0, %v768_v10  ;;  %v912_v7 = vmul.f32 %v3762_v29, %v766_v56  ;;  %v792_v29 = vand.u32 2147483648, %v658_v36  ;;  %vm786_vm13 = vweird.f32 %v658_v36 }
 0x303   :  { %v3835_v59 = vpop.eup %3047  ;;  %v631_v61 = vmul.f32 1.442695, %v601_v53  ;;  %vm791_vm15 = vcmp.eq.f32.partialorder %v790_v16, 8.507059e+37 }
 0x304   :  { %v770_v63 = vmul.f32 %v3046_v44, %v769_v21  ;;  %v674_v60 = vsel %vm132_vm0, %v3835_v59, 0.0  ;;  %v793_v1 = vor.u32 1.1754944e-38, %v792_v29 }
 0x305   :  { %3051 = vpow2.f32 %v631_v61  ;;  %675 = vadd.xlane.f32.xlu0 %v674_v60 }
 0x306   :  { %2831 = vmatmul.msk.f32.gmra.mxu0 %vm132_vm0, %v912_v7  ;;  %v771_v48 = vadd.f32 %v3046_v44, %v770_v63 }
 0x307   :  { %v3050_v50 = vpop.eup %3049 }
 0x308   :  { %v782_v0 = vmul.f32 %v3050_v50, %v658_v36  ;;  %v586_v9 = vpop.xlane.xlu1 %585  ;;  %v775_v18 = vsel %vm774_vm10, %v3046_v44, %v771_v48  ;;  %vm787_vm12 = vweird.f32 %v3050_v50 }
 0x309   :  { %v602_v54 = vsub.f32 %v3794_v58, %v586_v9  ;;  %v780_v11 = vsel %vm777_vm11, %v779_v8, %v775_v18  ;;  %vm788_vm14 = vmor %vm786_vm13, %vm787_vm12 }
 0x30a   :  { %v783_v13 = vsub.f32 1.0, %v782_v0  ;;  %v913_v17 = vmul.f32 %v3774_v41, %v780_v11 }
 0x30b   :  { %v3842_v14 = vpop.eup %3051  ;;  %v633_v15 = vmul.f32 1.442695, %v602_v54 }
 0x30c   :  { %v784_v2 = vmul.f32 %v3050_v50, %v783_v13  ;;  %v677_v6 = vsel %vm132_vm0, %v3842_v14, 0.0 }
 0x30d   :  { %3053 = vpow2.f32 %v633_v15  ;;  %678 = vadd.xlane.f32.xlu1 %v677_v6 }
 0x30e   :  { %2832 = vmatmul.msk.f32.gmra.mxu0 %vm132_vm0, %v913_v17  ;;  %v785_v58 = vadd.f32 %v3050_v50, %v784_v2 }
 0x310   :  { %v789_v20 = vsel %vm788_vm14, %v3050_v50, %v785_v58 }
 0x311   :  { %v794_v22 = vsel %vm791_vm15, %v793_v1, %v789_v20 }
 0x312   :  { %v914_v25 = vmul.f32 %v3785_v49, %v794_v22 }
 0x313   :  { %v3848_v24 = vpop.eup %3053 }
 0x314   :  { %v680_v5 = vsel %vm132_vm0, %v3848_v24, 0.0 }
 0x315   :  { %681 = vadd.xlane.f32.xlu2 %v680_v5 }
 0x316   :  { %2833 = vmatmul.msk.f32.gmra.mxu0 %vm132_vm0, %v914_v25 }
 0x352   :  { %v661_v41 = vpop.xlane.xlu0 %660 }
 0x353   :  { %3055 = vrcp.f32 %v661_v41  ;;  %v806_v4 = vand.u32 2147483648, %v661_v41  ;;  %v804_v33 = vand.u32 2147483647, %v661_v41  ;;  %vm800_vm2 = vweird.f32 %v661_v41 }
 0x355   :  { %v807_v37 = vor.u32 1.1754944e-38, %v806_v4  ;;  %vm805_vm4 = vcmp.eq.f32.partialorder %v804_v33, 8.507059e+37 }
 0x359   :  { %v3056_v26 = vpop.eup %3055 }
 0x35a   :  { %v796_v27 = vmul.f32 %v3056_v26, %v661_v41  ;;  %v664_v19 = vpop.xlane.xlu2 %663  ;;  %vm801_vm1 = vweird.f32 %v3056_v26 }
 0x35b   :  { %3057 = vrcp.f32 %v664_v19  ;;  %vm802_vm3 = vmor %vm800_vm2, %vm801_vm1  ;;  %v820_v43 = vand.u32 2147483648, %v664_v19  ;;  %v818_v44 = vand.u32 2147483647, %v664_v19  ;;  %vm814_vm6 = vweird.f32 %v664_v19 }
 0x35c   :  { %v797_v28 = vsub.f32 1.0, %v796_v27 }
 0x35d   :  { %v821_v52 = vor.u32 1.1754944e-38, %v820_v43  ;;  %vm819_vm8 = vcmp.eq.f32.partialorder %v818_v44, 8.507059e+37 }
 0x35e   :  { %v798_v32 = vmul.f32 %v3056_v26, %v797_v28 }
 0x360   :  { %v667_v45 = vpop.xlane.xlu0 %666  ;;  %v799_v12 = vadd.f32 %v3056_v26, %v798_v32 }
 0x361   :  { %v3058_v34 = vpop.eup %3057  ;;  %3059 = vrcp.f32 %v667_v45  ;;  %v834_v56 = vand.u32 2147483648, %v667_v45  ;;  %v832_v62 = vand.u32 2147483647, %v667_v45  ;;  %vm828_vm10 = vweird.f32 %v667_v45 }
 0x362   :  { %v810_v49 = vmul.f32 %v3058_v34, %v664_v19  ;;  %v803_v38 = vsel %vm802_vm3, %v3056_v26, %v799_v12  ;;  %vm815_vm5 = vweird.f32 %v3058_v34 }
 0x363   :  { %v808_v39 = vsel %vm805_vm4, %v807_v37, %v803_v38  ;;  %vm816_vm7 = vmor %vm814_vm6, %vm815_vm5  ;;  %v835_v7 = vor.u32 1.1754944e-38, %v834_v56  ;;  %vm833_vm12 = vcmp.eq.f32.partialorder %v832_v62, 8.507059e+37 }
 0x364   :  { %v811_v40 = vsub.f32 1.0, %v810_v49  ;;  %v915_v42 = vmul.f32 %v3801_v23, %v808_v39 }
 0x366   :  { %v812_v31 = vmul.f32 %v3058_v34, %v811_v40  ;;  %2834 = vmatmul.msk.f32.gmra.mxu0 %vm132_vm0, %v915_v42 }
 0x367   :  { %v3060_v47 = vpop.eup %3059 }
 0x368   :  { %v824_v10 = vmul.f32 %v3060_v47, %v667_v45  ;;  %v670_v36 = vpop.xlane.xlu1 %669  ;;  %v813_v51 = vadd.f32 %v3058_v34, %v812_v31  ;;  %vm829_vm9 = vweird.f32 %v3060_v47 }
 0x369   :  { %3061 = vrcp.f32 %v670_v36  ;;  %vm830_vm11 = vmor %vm828_vm10, %vm829_vm9  ;;  %v848_v18 = vand.u32 2147483648, %v670_v36  ;;  %v846_v11 = vand.u32 2147483647, %v670_v36  ;;  %vm842_vm14 = vweird.f32 %v670_v36 }
 0x36a   :  { %v825_v53 = vsub.f32 1.0, %v824_v10  ;;  %v817_v21 = vsel %vm816_vm7, %v3058_v34, %v813_v51 }
 0x36b   :  { %v822_v57 = vsel %vm819_vm8, %v821_v52, %v817_v21  ;;  %v849_v15 = vor.u32 1.1754944e-38, %v848_v18  ;;  %vm847_vm1 = vcmp.eq.f32.partialorder %v846_v11, 8.507059e+37 }
 0x36c   :  { %v826_v23 = vmul.f32 %v3060_v47, %v825_v53  ;;  %v916_v61 = vmul.f32 %v3808_v46, %v822_v57 }
 0x36e   :  { %2835 = vmatmul.msk.f32.gmra.mxu0 %vm132_vm0, %v916_v61  ;;  %v827_v63 = vadd.f32 %v3060_v47, %v826_v23  ;;  %v988_v61 = vpop.f32.mrf.mxu0 }
 0x36f   :  { %v3062_v60 = vpop.eup %3061 }
 0x370   :  { %v838_v48 = vmul.f32 %v3062_v60, %v670_v36  ;;  %v673_v50 = vpop.xlane.xlu2 %672  ;;  %v831_v8 = vsel %vm830_vm11, %v3060_v47, %v827_v63  ;;  %vm843_vm13 = vweird.f32 %v3062_v60 }
 0x371   :  { %3063 = vrcp.f32 %v673_v50  ;;  %v836_v0 = vsel %vm833_vm12, %v835_v7, %v831_v8  ;;  %vm844_vm15 = vmor %vm842_vm14, %vm843_vm13  ;;  %v862_v1 = vand.u32 2147483648, %v673_v50  ;;  %v860_v22 = vand.u32 2147483647, %v673_v50 }
 0x372   :  { %v839_v9 = vsub.f32 1.0, %v838_v48  ;;  %v917_v46 = vmul.f32 %v3814_v3, %v836_v0  ;;  %vm856_vm3 = vweird.f32 %v673_v50 }
 0x373   :  { %v863_v41 = vor.u32 1.1754944e-38, %v862_v1  ;;  %vm861_vm5 = vcmp.eq.f32.partialorder %v860_v22, 8.507059e+37 }
 0x374   :  { %v840_v54 = vmul.f32 %v3062_v60, %v839_v9 }
 0x376   :  { %2836 = vmatmul.msk.f32.gmra.mxu0 %vm132_vm0, %v917_v46  ;;  %v841_v13 = vadd.f32 %v3062_v60, %v840_v54  ;;  %v1067_v46 = vld [vmem:[%s4779_s14 + $0x18] sm:$0xff] }
 0x377   :  { %v3064_v29 = vpop.eup %3063  ;;  %1092 = vmatpush.msra.mxu1 %v1067_v46 }
 0x378   :  { %v852_v16 = vmul.f32 %v3064_v29, %v673_v50  ;;  %v676_v2 = vpop.xlane.xlu0 %675  ;;  %v845_v6 = vsel %vm844_vm15, %v3062_v60, %v841_v13  ;;  %vm857_vm2 = vweird.f32 %v3064_v29  ;;  %v991_v50 = vpop.f32.mrf.mxu0  ;;  %v1066_v13 = vld [vmem:[%s4779_s14 + $0x10] sm:$0xff] }
 0x379   :  { %3065 = vrcp.f32 %v676_v2  ;;  %v850_v17 = vsel %vm847_vm1, %v849_v15, %v845_v6  ;;  %vm858_vm4 = vmor %vm856_vm3, %vm857_vm2  ;;  %v876_v32 = vand.u32 2147483648, %v676_v2  ;;  %v874_v45 = vand.u32 2147483647, %v676_v2  ;;  %1093 = vmatpush.msra.mxu1 %v1066_v13  ;;  %v3885_v6 = vld [vmem:[%s4813_s27 + $0x20] sm:$0xff] }
 0x37a   :  { %v853_v58 = vsub.f32 1.0, %v852_v16  ;;  %v918_v3 = vmul.f32 %v3821_v55, %v850_v17  ;;  %vm870_vm7 = vweird.f32 %v676_v2 }
 0x37b   :  { %v877_v37 = vor.u32 1.1754944e-38, %v876_v32  ;;  %vm875_vm9 = vcmp.eq.f32.partialorder %v874_v45, 8.507059e+37 }
 0x37c   :  { %v854_v20 = vmul.f32 %v3064_v29, %v853_v58  ;;  %v3891_v58 = vld [vmem:[%s4813_s27] sm:$0xff] }
 0x37d   :  { %v1036_v1 = vmul.f32 %v3891_v58, %v988_v61 }
 0x37e   :  { %2837 = vmatmul.msk.f32.gmra.mxu0 %vm132_vm0, %v918_v3  ;;  %v855_v5 = vadd.f32 %v3064_v29, %v854_v20  ;;  %v3897_v20 = vld [vmem:[%s4813_s27 + $0x40] sm:$0xff] }
 0x37f   :  { %v3066_v25 = vpop.eup %3065 }
 0x380   :  { %v866_v26 = vmul.f32 %v3066_v25, %v676_v2  ;;  %v679_v27 = vpop.xlane.xlu1 %678  ;;  %v859_v19 = vsel %vm858_vm4, %v3064_v29, %v855_v5  ;;  %vm871_vm6 = vweird.f32 %v3066_v25  ;;  %v994_v8 = vpop.f32.mrf.mxu0  ;;  %v1064_v29 = vld [vmem:[%s4779_s14] sm:$0xff] }
 0x381   :  { %3067 = vrcp.f32 %v679_v27  ;;  %v864_v28 = vsel %vm861_vm5, %v863_v41, %v859_v19  ;;  %vm872_vm8 = vmor %vm870_vm7, %vm871_vm6  ;;  %v890_v43 = vand.u32 2147483648, %v679_v27  ;;  %v888_v44 = vand.u32 2147483647, %v679_v27  ;;  %v3903_v41 = vld [vmem:[%s4813_s27 + $0x60] sm:$0xff] }
 0x382   :  { %v867_v4 = vsub.f32 1.0, %v866_v26  ;;  %v919_v55 = vmul.f32 %v3828_v35, %v864_v28  ;;  %vm884_vm11 = vweird.f32 %v679_v27 }
 0x383   :  { %v891_v36 = vor.u32 1.1754944e-38, %v890_v43  ;;  %vm889_vm13 = vcmp.eq.f32.partialorder %v888_v44, 8.507059e+37 }
 0x384   :  { %v868_v33 = vmul.f32 %v3066_v25, %v867_v4  ;;  %v3915_v4 = vld [vmem:[%s4813_s27 + $0x8] sm:$0xff] }
 0x385   :  { %v1037_v32 = vmul.f32 %v3915_v4, %v991_v50  ;;  %v2986_v50 = vld [vmem:[%s4780_s15] ss:$0 sm:$0xff] }
 0x386   :  { %2838 = vmatmul.msk.f32.gmra.mxu0 %vm132_vm0, %v919_v55  ;;  %v869_v12 = vadd.f32 %v3066_v25, %v868_v33  ;;  %v3921_v33 = vld [vmem:[%s4813_s27 + $0x48] sm:$0xff] }
 0x387   :  { %v3068_v34 = vpop.eup %3067 }
 0x388   :  { %v880_v49 = vmul.f32 %v3068_v34, %v679_v27  ;;  %v682_v38 = vpop.xlane.xlu2 %681  ;;  %v873_v39 = vsel %vm872_vm8, %v3066_v25, %v869_v12  ;;  %vm885_vm10 = vweird.f32 %v3068_v34  ;;  %v997_v0 = vpop.f32.mrf.mxu0  ;;  %v3909_v27 = vld [vmem:[%s4813_s27 + $0x28] sm:$0xff] }
 0x389   :  { %3069 = vrcp.f32 %v682_v38  ;;  %v878_v40 = vsel %vm875_vm9, %v877_v37, %v873_v39  ;;  %vm886_vm12 = vmor %vm884_vm11, %vm885_vm10  ;;  %v904_v56 = vand.u32 2147483648, %v682_v38  ;;  %vm898_vm15 = vweird.f32 %v682_v38  ;;  %v3928_v37 = vld [vmem:[%s4813_s27 + $0x68] sm:$0xff] }
 0x38a   :  { %v881_v42 = vsub.f32 1.0, %v880_v49  ;;  %v920_v35 = vmul.f32 %v3835_v59, %v878_v40  ;;  %v902_v59 = vand.u32 2147483647, %v682_v38 }
 0x38b   :  { %v905_v63 = vor.u32 1.1754944e-38, %v904_v56  ;;  %v3965_v56 = vld [vmem:[%s4813_s27 + $0x18] sm:$0xff] }
 0x38c   :  { %v882_v31 = vmul.f32 %v3068_v34, %v881_v42  ;;  %vm903_vm2 = vcmp.eq.f32.partialorder %v902_v59, 8.507059e+37  ;;  %v3940_v42 = vld [vmem:[%s4813_s27 + $0x10] sm:$0xff] }
 0x38d   :  { %v1038_v43 = vmul.f32 %v3940_v42, %v994_v8 }
 0x38e   :  { %2839 = vmatmul.msk.f32.gmra.mxu0 %vm132_vm0, %v920_v35  ;;  %v883_v47 = vadd.f32 %v3068_v34, %v882_v31  ;;  %v3946_v31 = vld [vmem:[%s4813_s27 + $0x50] sm:$0xff] }
 0x38f   :  { %v3070_v10 = vpop.eup %3069 }
 0x390   :  { %v894_v51 = vmul.f32 %v3070_v10, %v682_v38  ;;  %v887_v52 = vsel %vm886_vm12, %v3068_v34, %v883_v47  ;;  %vm899_vm14 = vweird.f32 %v3070_v10  ;;  %v3934_v38 = vld [vmem:[%s4813_s27 + $0x30] sm:$0xff] }
 0x391   :  { %v892_v53 = vsel %vm889_vm13, %v891_v36, %v887_v52  ;;  %vm900_vm1 = vmor %vm898_vm15, %vm899_vm14  ;;  %v3953_v36 = vld [vmem:[%s4813_s27 + $0x70] sm:$0xff]  ;;  %v3959_v52 = vld [vmem:[%s4813_s27 + $0x38] sm:$0xff] }
 0x392   :  { %v895_v21 = vsub.f32 1.0, %v894_v51  ;;  %v921_v23 = vmul.f32 %v3842_v14, %v892_v53  ;;  %v1000_v14 = vpop.f32.mrf.mxu0 }
 0x393   :  { %v1040_v17 = vmul.f32 %v3885_v6, %v1000_v14 }
 0x394   :  { %v896_v57 = vmul.f32 %v3070_v10, %v895_v21 }
 0x395   :  { %v1052_v22 = vadd.f32 %v1040_v17, %v1036_v1 }
 0x396   :  { %2840 = vmatmul.msk.f32.gmra.mxu0 %vm132_vm0, %v921_v23  ;;  %v897_v62 = vadd.f32 %v3070_v10, %v896_v57  ;;  %v1039_v57 = vmul.f32 %v3965_v56, %v997_v0  ;;  %v3971_v23 = vld [vmem:[%s4813_s27 + $0x58] sm:$0xff]  ;;  %v3207_v0 = vld [vmem:[%s4807_s24] sm:$0xff] }
 0x398   :  { %v901_v60 = vsel %vm900_vm1, %v3070_v10, %v897_v62 }
 0x399   :  { %v906_v7 = vsel %vm903_vm2, %v905_v63, %v901_v60  ;;  %v3978_v60 = vld [vmem:[%s4813_s27 + $0x78] sm:$0xff] }
 0x39a   :  { %v922_v48 = vmul.f32 %v3848_v24, %v906_v7  ;;  %v1003_v9 = vpop.f32.mrf.mxu0  ;;  %v1065_v24 = vld [vmem:[%s4779_s14 + $0x8] sm:$0xff] }
 0x39b   :  { %1094 = vmatpush.msra.mxu1 %v1065_v24  ;;  %v1041_v19 = vmul.f32 %v3909_v27, %v1003_v9 }
 0x39d   :  { %1095 = vmatpush.msra.mxu1 %v1064_v29  ;;  %v1053_v45 = vadd.f32 %v1041_v19, %v1037_v32 }
 0x39e   :  { %2841 = vmatmul.msk.f32.gmra.mxu0 %vm132_vm0, %v922_v48 }
 0x3a2   :  { %v1006_v18 = vpop.f32.mrf.mxu0 }
 0x3a3   :  { %v1042_v39 = vmul.f32 %v3934_v38, %v1006_v18 }
 0x3a5   :  { %v1054_v44 = vadd.f32 %v1042_v39, %v1038_v43  ;;  %v1200_v39 = vld [vmem:[%s4782_s17 + $0x18] sm:$0xff]  ;;  %v1198_v43 = vld [vmem:[%s4782_s17 + $0x8] sm:$0xff] }
 0x3aa   :  { %v1009_v54 = vpop.f32.mrf.mxu0 }
 0x3ab   :  { %v1043_v53 = vmul.f32 %v3959_v52, %v1009_v54 }
 0x3ad   :  { %v1055_v61 = vadd.f32 %v1043_v53, %v1039_v57 }
 0x3e3   :  { %v1012_v11 = vpop.f32.mrf.mxu0 }
 0x3e4   :  { %v1044_v3 = vmul.f32 %v3897_v20, %v1012_v11  ;;  %v3208_v11 = vld [vmem:[%s4807_s24 + $0x8] sm:$0xff] }
 0x3e6   :  { %v1056_v25 = vadd.f32 %v1052_v22, %v1044_v3 }
 0x3eb   :  { %v1015_v15 = vpop.f32.mrf.mxu0 }
 0x3ec   :  { %v1045_v55 = vmul.f32 %v3921_v33, %v1015_v15 }
 0x3ee   :  { %v1057_v34 = vadd.f32 %v1053_v45, %v1045_v55  ;;  %v1204_v55 = vld [vmem:[%s4782_s17 + $0x38] sm:$0xff]  ;;  %v1203_v45 = vld [vmem:[%s4782_s17 + $0x30] sm:$0xff] }
 0x3ef   :  { %1264 = vmatpush.msrb.mxu1 %v1204_v55  ;;  %1235 = vmatpush.msrb.mxu2 %v1203_v45 }
 0x3f3   :  { %v1018_v16 = vpop.f32.mrf.mxu0 }
 0x3f4   :  { %v1046_v35 = vmul.f32 %v3946_v31, %v1018_v16 }
 0x3f6   :  { %v1058_v10 = vadd.f32 %v1054_v44, %v1046_v35 }
 0x3fb   :  { %v1021_v2 = vpop.f32.mrf.mxu0 }
 0x3fc   :  { %v1047_v59 = vmul.f32 %v3971_v23, %v1021_v2  ;;  %v3209_v2 = vld [vmem:[%s4807_s24 + $0x10] sm:$0xff] }
 0x3fe   :  { %v1059_v63 = vadd.f32 %v1055_v61, %v1047_v59 }
 0x403   :  { %v1024_v5 = vpop.f32.mrf.mxu0 }
 0x404   :  { %v1048_v26 = vmul.f32 %v3903_v41, %v1024_v5 }
 0x406   :  { %v1060_v28 = vadd.f32 %v1056_v25, %v1048_v26  ;;  %v3210_v25 = vld [vmem:[%s4807_s24 + $0x18] sm:$0xff] }
 0x408   :  { %2842 = vmatmul.msk.f32.vlgmr.msra.gmra.mxu1 %vm132_vm0, %v1060_v28 }
 0x40b   :  { %v1027_v12 = vpop.f32.mrf.mxu0 }
 0x40c   :  { %v1049_v49 = vmul.f32 %v3928_v37, %v1027_v12  ;;  %v1202_v12 = vld [vmem:[%s4782_s17 + $0x28] sm:$0xff] }
 0x40d   :  { %1265 = vmatpush.msrb.mxu1 %v1202_v12 }
 0x40e   :  { %v1061_v40 = vadd.f32 %v1057_v34, %v1049_v49  ;;  %v1201_v34 = vld [vmem:[%s4782_s17 + $0x20] sm:$0xff]  ;;  %v1199_v49 = vld [vmem:[%s4782_s17 + $0x10] sm:$0xff] }
 0x40f   :  { %1236 = vmatpush.msrb.mxu2 %v1201_v34  ;;  %1266 = vmatpush.msrb.mxu1 %v1200_v39 }
 0x410   :  { %2843 = vmatmul.msk.f32.gmra.mxu1 %vm132_vm0, %v1061_v40  ;;  %v1197_v40 = vld [vmem:[%s4782_s17] sm:$0xff] }
 0x411   :  { %1237 = vmatpush.msrb.mxu2 %v1199_v49  ;;  %1267 = vmatpush.msrb.mxu1 %v1198_v43 }
 0x413   :  { %v1030_v47 = vpop.f32.mrf.mxu0  ;;  %1238 = vmatpush.msrb.mxu2 %v1197_v40 }
 0x414   :  { %v1050_v51 = vmul.f32 %v3953_v36, %v1030_v47 }
 0x416   :  { %v1062_v21 = vadd.f32 %v1058_v10, %v1050_v51 }
 0x418   :  { %2844 = vmatmul.msk.f32.gmra.mxu1 %vm132_vm0, %v1062_v21 }
 0x41b   :  { %v1033_v62 = vpop.f32.mrf.mxu0 }
 0x41c   :  { %v1051_v7 = vmul.f32 %v3978_v60, %v1033_v62 }
 0x41e   :  { %v1063_v48 = vadd.f32 %v1059_v63, %v1051_v7 }
 0x420   :  { %2845 = vmatmul.msk.f32.gmra.mxu1 %vm132_vm0, %v1063_v48 }
 0x485   :  { %v1097_v8 = vpop.f32.mrf.mxu1 }
 0x486   :  { %v1109_v14 = vadd.f32 %v3207_v0, %v1097_v8 }
 0x488   :  { %v3988_v9 = vadd.f32 %v2986_v50, %v1109_v14  ;;  %v2987_v14 = vld [vmem:[%s4781_s16] ss:$0 sm:$0xff] }
 0x48a   :  { %v1122_v18 = vmul.f32 %v3988_v9, %v3988_v9 }
 0x48c   :  { %v1126_v54 = vsel %vm132_vm0, %v1122_v18, 0.0 }
 0x48d   :  { %1127 = vadd.xlane.f32.xlu0 %v1126_v54  ;;  %v1100_v46 = vpop.f32.mrf.mxu1 }
 0x48e   :  { %v1110_v13 = vadd.f32 %v3208_v11, %v1100_v46 }
 0x490   :  { %v3996_v24 = vadd.f32 %v2986_v50, %v1110_v13 }
 0x492   :  { %v1123_v29 = vmul.f32 %v3996_v24, %v3996_v24 }
 0x494   :  { %v1129_v15 = vsel %vm132_vm0, %v1123_v29, 0.0 }
 0x495   :  { %1130 = vadd.xlane.f32.xlu1 %v1129_v15  ;;  %v1103_v16 = vpop.f32.mrf.mxu1 }
 0x496   :  { %v1111_v17 = vadd.f32 %v3209_v2, %v1103_v16 }
 0x498   :  { %v4004_v1 = vadd.f32 %v2986_v50, %v1111_v17 }
 0x49a   :  { %v1124_v3 = vmul.f32 %v4004_v1, %v4004_v1 }
 0x49c   :  { %v1132_v22 = vsel %vm132_vm0, %v1124_v3, 0.0 }
 0x49d   :  { %1133 = vadd.xlane.f32.xlu2 %v1132_v22  ;;  %v1106_v5 = vpop.f32.mrf.mxu1 }
 0x49e   :  { %v1112_v26 = vadd.f32 %v3210_v25, %v1106_v5 }
 0x4a0   :  { %v4012_v19 = vadd.f32 %v2986_v50, %v1112_v26 }
 0x4a2   :  { %v1125_v28 = vmul.f32 %v4012_v19, %v4012_v19 }
 0x4a4   :  { %v1135_v32 = vsel %vm132_vm0, %v1125_v28, 0.0 }
 0x4a5   :  { %1136 = vadd.xlane.f32.xlu0 %v1135_v32 }
 0x500   :  { %v1128_v35 = vpop.xlane.xlu0 %1127 }
 0x501   :  { %v1138_v44 = vmul.f32 %v1128_v35, %v3477_v30 }
 0x503   :  { %v1142_v47 = vadd.f32 1.1920929e-07, %v1138_v44 }
 0x505   :  { %3071 = vrsqrt.f32 %v1142_v47  ;;  %vm1152_vm4 = vweird.f32 %v1142_v47 }
 0x508   :  { %v1131_v10 = vpop.xlane.xlu1 %1130 }
 0x509   :  { %v1139_v51 = vmul.f32 %v1131_v10, %v3477_v30 }
 0x50b   :  { %v3072_v53 = vpop.eup %3071  ;;  %v1143_v21 = vadd.f32 1.1920929e-07, %v1139_v51 }
 0x50c   :  { %v1147_v57 = vmul.f32 %v3072_v53, %v1142_v47  ;;  %vm1153_vm3 = vweird.f32 %v3072_v53 }
 0x50d   :  { %3073 = vrsqrt.f32 %v1143_v21  ;;  %vm1154_vm5 = vmor %vm1152_vm4, %vm1153_vm3  ;;  %vm1162_vm7 = vweird.f32 %v1143_v21 }
 0x50e   :  { %v1148_v59 = vmul.f32 %v3072_v53, %v1147_v57  ;;  %v1379_v57 = vld [vmem:[%s4784_s19 + $0x70] sm:$0xff] }
 0x510   :  { %v1149_v61 = vmul.f32 0.5, %v1148_v59  ;;  %v1134_v62 = vpop.xlane.xlu2 %1133  ;;  %v1378_v59 = vld [vmem:[%s4784_s19 + $0x68] sm:$0xff] }
 0x511   :  { %v1140_v63 = vmul.f32 %v1134_v62, %v3477_v30  ;;  %v1376_v62 = vld [vmem:[%s4784_s19 + $0x58] sm:$0xff] }
 0x512   :  { %v1150_v7 = vsub.f32 1.5, %v1149_v61  ;;  %v1377_v61 = vld [vmem:[%s4784_s19 + $0x60] sm:$0xff] }
 0x513   :  { %v3074_v48 = vpop.eup %3073  ;;  %v1144_v50 = vadd.f32 1.1920929e-07, %v1140_v63  ;;  %v1375_v63 = vld [vmem:[%s4784_s19 + $0x50] sm:$0xff] }
 0x514   :  { %v1151_v8 = vmul.f32 %v3072_v53, %v1150_v7  ;;  %v1157_v0 = vmul.f32 %v3074_v48, %v1143_v21  ;;  %vm1163_vm6 = vweird.f32 %v3074_v48  ;;  %v1380_v21 = vld [vmem:[%s4784_s19 + $0x78] sm:$0xff]  ;;  %v1374_v7 = vld [vmem:[%s4784_s19 + $0x48] sm:$0xff] }
 0x515   :  { %3075 = vrsqrt.f32 %v1144_v50  ;;  %vm1164_vm8 = vmor %vm1162_vm7, %vm1163_vm6  ;;  %vm1172_vm10 = vweird.f32 %v1144_v50  ;;  %1381 = vmatpush.msra.mxu2 %v1380_v21 }
 0x516   :  { %v1155_v18 = vsel %vm1154_vm5, %v3072_v53, %v1151_v8  ;;  %v1158_v54 = vmul.f32 %v3074_v48, %v1157_v0  ;;  %v1371_v8 = vld [vmem:[%s4784_s19 + $0x30] sm:$0xff]  ;;  %v1370_v0 = vld [vmem:[%s4784_s19 + $0x28] sm:$0xff] }
 0x517   :  { %v1186_v46 = vmul.f32 %v1155_v18, %v3988_v9  ;;  %1382 = vmatpush.msra.mxu2 %v1379_v57  ;;  %v1369_v18 = vld [vmem:[%s4784_s19 + $0x20] sm:$0xff] }
 0x518   :  { %v1159_v11 = vmul.f32 0.5, %v1158_v54  ;;  %v1137_v13 = vpop.xlane.xlu0 %1136  ;;  %v1368_v54 = vld [vmem:[%s4784_s19 + $0x18] sm:$0xff] }
 0x519   :  { %v1141_v29 = vmul.f32 %v1137_v13, %v3477_v30  ;;  %v1193_v15 = vmul.f32 %v2987_v14, %v1186_v46  ;;  %1383 = vmatpush.msra.mxu2 %v1378_v59 }
 0x51a   :  { %v1160_v16 = vsub.f32 1.5, %v1159_v11  ;;  %v1367_v11 = vld [vmem:[%s4784_s19 + $0x10] sm:$0xff] }
 0x51b   :  { %v3076_v2 = vpop.eup %3075  ;;  %v1145_v17 = vadd.f32 1.1920929e-07, %v1141_v29  ;;  %2846 = vmatmul.msk.f32.vlgmr.msrb.gmra.mxu2 %vm132_vm0, %v1193_v15  ;;  %2850 = vmatmul.msk.f32.vlgmr.msrb.gmra.mxu1 %vm132_vm0, %v1193_v15  ;;  %v1366_v29 = vld [vmem:[%s4784_s19 + $0x8] sm:$0xff] }
 0x51c   :  { %v1161_v3 = vmul.f32 %v3074_v48, %v1160_v16  ;;  %v1167_v22 = vmul.f32 %v3076_v2, %v1144_v50  ;;  %vm1173_vm9 = vweird.f32 %v3076_v2  ;;  %1384 = vmatpush.msra.mxu2 %v1377_v61  ;;  %v1372_v50 = vld [vmem:[%s4784_s19 + $0x38] sm:$0xff]  ;;  %v1365_v16 = vld [vmem:[%s4784_s19] sm:$0xff] }
 0x51d   :  { %3077 = vrsqrt.f32 %v1145_v17  ;;  %vm1174_vm11 = vmor %vm1172_vm10, %vm1173_vm9  ;;  %vm1182_vm13 = vweird.f32 %v1145_v17 }
 0x51e   :  { %v1168_v5 = vmul.f32 %v3076_v2, %v1167_v22  ;;  %v1165_v25 = vsel %vm1164_vm8, %v3074_v48, %v1161_v3  ;;  %1385 = vmatpush.msra.mxu2 %v1376_v62  ;;  %v1373_v48 = vld [vmem:[%s4784_s19 + $0x40] sm:$0xff] }
 0x51f   :  { %v1187_v26 = vmul.f32 %v1165_v25, %v3996_v24 }
 0x520   :  { %v1169_v28 = vmul.f32 0.5, %v1168_v5  ;;  %1386 = vmatpush.msra.mxu2 %v1375_v63 }
 0x521   :  { %v1194_v32 = vmul.f32 %v2987_v14, %v1187_v26 }
 0x522   :  { %v1170_v55 = vsub.f32 1.5, %v1169_v28  ;;  %1387 = vmatpush.msra.mxu2 %v1374_v7 }
 0x523   :  { %v3078_v45 = vpop.eup %3077  ;;  %2847 = vmatmul.msk.f32.gmra.mxu2 %vm132_vm0, %v1194_v32  ;;  %2851 = vmatmul.msk.f32.gmra.mxu1 %vm132_vm0, %v1194_v32 }
 0x524   :  { %v1171_v12 = vmul.f32 %v3076_v2, %v1170_v55  ;;  %v1177_v34 = vmul.f32 %v3078_v45, %v1145_v17  ;;  %vm1183_vm12 = vweird.f32 %v3078_v45  ;;  %1388 = vmatpush.msra.mxu2 %v1373_v48 }
 0x525   :  { %vm1184_vm14 = vmor %vm1182_vm13, %vm1183_vm12 }
 0x526   :  { %v1178_v49 = vmul.f32 %v3078_v45, %v1177_v34  ;;  %v1175_v39 = vsel %vm1174_vm11, %v3076_v2, %v1171_v12  ;;  %1389 = vmatpush.msra.mxu2 %v1372_v50 }
 0x527   :  { %v1188_v40 = vmul.f32 %v1175_v39, %v4004_v1 }
 0x528   :  { %v1179_v43 = vmul.f32 0.5, %v1178_v49  ;;  %1390 = vmatpush.msra.mxu2 %v1371_v8 }
 0x529   :  { %v1195_v35 = vmul.f32 %v2987_v14, %v1188_v40 }
 0x52a   :  { %v1180_v44 = vsub.f32 1.5, %v1179_v43  ;;  %1391 = vmatpush.msra.mxu2 %v1370_v0 }
 0x52b   :  { %2848 = vmatmul.msk.f32.gmra.mxu2 %vm132_vm0, %v1195_v35  ;;  %2852 = vmatmul.msk.f32.gmra.mxu1 %vm132_vm0, %v1195_v35 }
 0x52c   :  { %v1181_v47 = vmul.f32 %v3078_v45, %v1180_v44  ;;  %1392 = vmatpush.msra.mxu2 %v1369_v18 }
 0x52e   :  { %v1185_v10 = vsel %vm1184_vm14, %v3078_v45, %v1181_v47  ;;  %1393 = vmatpush.msra.mxu2 %v1368_v54 }
 0x52f   :  { %v1189_v51 = vmul.f32 %v1185_v10, %v4012_v19 }
 0x530   :  { %1394 = vmatpush.msra.mxu2 %v1367_v11 }
 0x531   :  { %v1196_v53 = vmul.f32 %v2987_v14, %v1189_v51  ;;  %v1205_v14 = vld [vmem:[%s4783_s18] sm:$0x3] }
 0x532   :  { %v1208_v46 = vperm.slane %v1205_v14, 1  ;;  %1395 = vmatpush.msra.mxu2 %v1366_v29 }
 0x533   :  { %2849 = vmatmul.msk.f32.gmra.mxu2 %vm132_vm0, %v1196_v53  ;;  %2853 = vmatmul.msk.f32.gmra.mxu1 %vm132_vm0, %v1196_v53  ;;  %v4116_v53 = vperm.slane %v1205_v14, 0 }
 0x534   :  { %1396 = vmatpush.msra.mxu2 %v1365_v16 }
 0x598   :  { %v1269_v13 = vpop.f32.mrf.mxu1 }
 0x599   :  { %v1270_v15 = vadd.f32 %v1269_v13, %v1208_v46 }
 0x59b   :  { %v2854_v2 = vmul.f32 -1.442695, %v1270_v15 }
 0x59d   :  { %3079 = vpow2.f32 %v2854_v2 }
 0x59e   :  { %v1240_v49 = vpop.f32.mrf.mxu2 }
 0x59f   :  { %v1241_v50 = vadd.f32 %v1240_v49, %v4116_v53 }
 0x5a0   :  { %v1272_v17 = vpop.f32.mrf.mxu1 }
 0x5a1   :  { %v1273_v3 = vadd.f32 %v1272_v17, %v1208_v46 }
 0x5a3   :  { %v3080_v22 = vpop.eup %3079  ;;  %v2855_v5 = vmul.f32 -1.442695, %v1273_v3 }
 0x5a4   :  { %v1293_v25 = vadd.f32 1.0, %v3080_v22 }
 0x5a5   :  { %3081 = vpow2.f32 %v2855_v5 }
 0x5a6   :  { %3083 = vrcp.f32 %v1293_v25  ;;  %v1308_v40 = vand.u32 2147483648, %v1293_v25  ;;  %v1306_v44 = vand.u32 2147483647, %v1293_v25  ;;  %vm1302_vm1 = vweird.f32 %v1293_v25  ;;  %v1243_v18 = vpop.f32.mrf.mxu2 }
 0x5a8   :  { %v1275_v26 = vpop.f32.mrf.mxu1  ;;  %v1309_v59 = vor.u32 1.1754944e-38, %v1308_v40  ;;  %vm1307_vm3 = vcmp.eq.f32.partialorder %v1306_v44, 8.507059e+37 }
 0x5a9   :  { %v4111_v28 = vadd.f32 %v1275_v26, %v1208_v46 }
 0x5ab   :  { %v3082_v32 = vpop.eup %3081  ;;  %v2856_v55 = vmul.f32 -1.442695, %v4111_v28 }
 0x5ac   :  { %v3084_v45 = vpop.eup %3083  ;;  %v1294_v12 = vadd.f32 1.0, %v3082_v32 }
 0x5ad   :  { %v1298_v34 = vmul.f32 %v3084_v45, %v1293_v25  ;;  %3085 = vpow2.f32 %v2856_v55  ;;  %vm1303_vm15 = vweird.f32 %v3084_v45  ;;  %v1244_v25 = vadd.f32 %v1243_v18, %v4116_v53  ;;  %v2988_v18 = vld [vmem:[%s4785_s20] ss:$0 sm:$0xff] }
 0x5ae   :  { %3087 = vrcp.f32 %v1294_v12  ;;  %vm1304_vm2 = vmor %vm1302_vm1, %vm1303_vm15  ;;  %v1323_v0 = vand.u32 2147483648, %v1294_v12  ;;  %vm1317_vm5 = vweird.f32 %v1294_v12 }
 0x5af   :  { %v1299_v39 = vsub.f32 1.0, %v1298_v34 }
 0x5b0   :  { %v1278_v43 = vpop.f32.mrf.mxu1  ;;  %v1324_v16 = vor.u32 1.1754944e-38, %v1323_v0 }
 0x5b1   :  { %v1300_v35 = vmul.f32 %v3084_v45, %v1299_v39  ;;  %v4114_v47 = vadd.f32 %v1278_v43, %v1208_v46  ;;  %v1321_v46 = vand.u32 2147483647, %v1294_v12 }
 0x5b3   :  { %v3086_v10 = vpop.eup %3085  ;;  %v1301_v51 = vadd.f32 %v3084_v45, %v1300_v35  ;;  %v2857_v21 = vmul.f32 -1.442695, %v4114_v47  ;;  %vm1322_vm7 = vcmp.eq.f32.partialorder %v1321_v46, 8.507059e+37 }
 0x5b4   :  { %v3088_v57 = vpop.eup %3087  ;;  %v1295_v61 = vadd.f32 1.0, %v3086_v10 }
 0x5b5   :  { %v1305_v62 = vsel %vm1304_vm2, %v3084_v45, %v1301_v51  ;;  %v1313_v63 = vmul.f32 %v3088_v57, %v1294_v12  ;;  %3089 = vpow2.f32 %v2857_v21  ;;  %vm1318_vm4 = vweird.f32 %v3088_v57  ;;  %v1246_v12 = vpop.f32.mrf.mxu2 }
 0x5b6   :  { %v1310_v7 = vsel %vm1307_vm3, %v1309_v59, %v1305_v62  ;;  %3091 = vrcp.f32 %v1295_v61  ;;  %vm1319_vm6 = vmor %vm1317_vm5, %vm1318_vm4  ;;  %v1338_v32 = vand.u32 2147483648, %v1295_v61  ;;  %v1336_v45 = vand.u32 2147483647, %v1295_v61 }
 0x5b7   :  { %v1357_v48 = vmul.f32 %v1310_v7, %v1270_v15  ;;  %v1314_v8 = vsub.f32 1.0, %v1313_v63  ;;  %vm1332_vm9 = vweird.f32 %v1295_v61  ;;  %v1247_v10 = vadd.f32 %v1246_v12, %v4116_v53  ;;  %v2860_v12 = vld [vmem:[%s4773_s8 + $0x28] sm:$0xff] }
 0x5b8   :  { %v1339_v40 = vor.u32 1.1754944e-38, %v1338_v32  ;;  %vm1337_vm11 = vcmp.eq.f32.partialorder %v1336_v45, 8.507059e+37  ;;  %v2862_v45 = vld [vmem:[%s4773_s8 + $0x38] sm:$0xff] }
 0x5b9   :  { %v1361_v14 = vmul.f32 %v1357_v48, %v1241_v50  ;;  %v1315_v54 = vmul.f32 %v3088_v57, %v1314_v8  ;;  %1533 = vmatpush.msra.mxu1 %v2862_v45 }
 0x5bb   :  { %v3090_v11 = vpop.eup %3089  ;;  %v1316_v13 = vadd.f32 %v3088_v57, %v1315_v54  ;;  %1397 = vmatmul.f32.vlgmr.msra.gmra.mxu2 %v1361_v14 }
 0x5bc   :  { %v3092_v29 = vpop.eup %3091  ;;  %v1296_v2 = vadd.f32 1.0, %v3090_v11 }
 0x5bd   :  { %v1320_v17 = vsel %vm1319_vm6, %v3088_v57, %v1316_v13  ;;  %v1328_v15 = vmul.f32 %v3092_v29, %v1295_v61  ;;  %vm1333_vm8 = vweird.f32 %v3092_v29  ;;  %v1249_v7 = vpop.f32.mrf.mxu2 }
 0x5be   :  { %v1325_v22 = vsel %vm1322_vm7, %v1324_v16, %v1320_v17  ;;  %3093 = vrcp.f32 %v1296_v2  ;;  %vm1334_vm10 = vmor %vm1332_vm9, %vm1333_vm8  ;;  %v1353_v21 = vand.u32 2147483648, %v1296_v2  ;;  %v1351_v59 = vand.u32 2147483647, %v1296_v2 }
 0x5bf   :  { %v1358_v5 = vmul.f32 %v1325_v22, %v1273_v3  ;;  %v1329_v26 = vsub.f32 1.0, %v1328_v15  ;;  %vm1347_vm13 = vweird.f32 %v1296_v2 }
 0x5c0   :  { %v1354_v61 = vor.u32 1.1754944e-38, %v1353_v21  ;;  %vm1352_vm15 = vcmp.eq.f32.partialorder %v1351_v59, 8.507059e+37 }
 0x5c1   :  { %v1330_v55 = vmul.f32 %v3092_v29, %v1329_v26  ;;  %v1362_v34 = vmul.f32 %v1358_v5, %v1244_v25 }
 0x5c3   :  { %v1331_v49 = vadd.f32 %v3092_v29, %v1330_v55  ;;  %1400 = vmatmul.f32.gmra.mxu2 %v1362_v34  ;;  %v2861_v34 = vld [vmem:[%s4773_s8 + $0x30] sm:$0xff] }
 0x5c4   :  { %v3094_v39 = vpop.eup %3093  ;;  %1534 = vmatpush.msra.mxu1 %v2861_v34 }
 0x5c5   :  { %v1335_v43 = vsel %vm1334_vm10, %v3092_v29, %v1331_v49  ;;  %v1343_v35 = vmul.f32 %v3094_v39, %v1296_v2  ;;  %vm1348_vm12 = vweird.f32 %v3094_v39  ;;  %v2869_v49 = vld [vmem:[%s4775_s10 + $0x28] sm:$0xff] }
 0x5c6   :  { %v1340_v44 = vsel %vm1337_vm11, %v1339_v40, %v1335_v43  ;;  %vm1349_vm14 = vmor %vm1347_vm13, %vm1348_vm12  ;;  %1535 = vmatpush.msra.mxu1 %v2860_v12  ;;  %v2868_v40 = vld [vmem:[%s4775_s10 + $0x20] sm:$0xff] }
 0x5c7   :  { %v1359_v3 = vmul.f32 %v1340_v44, %v4111_v28  ;;  %v1344_v51 = vsub.f32 1.0, %v1343_v35  ;;  %v1250_v28 = vadd.f32 %v1249_v7, %v4116_v53 }
 0x5c9   :  { %v1345_v57 = vmul.f32 %v3094_v39, %v1344_v51  ;;  %v1363_v62 = vmul.f32 %v1359_v3, %v1247_v10 }
 0x5cb   :  { %v1346_v63 = vadd.f32 %v3094_v39, %v1345_v57  ;;  %1403 = vmatmul.f32.gmra.mxu2 %v1363_v62 }
 0x5cd   :  { %v1350_v48 = vsel %vm1349_vm14, %v3094_v39, %v1346_v63  ;;  %v2859_v39 = vld [vmem:[%s4773_s8 + $0x20] sm:$0xff] }
 0x5ce   :  { %v1355_v50 = vsel %vm1352_vm15, %v1354_v61, %v1350_v48  ;;  %1536 = vmatpush.msra.mxu1 %v2859_v39 }
 0x5cf   :  { %v1360_v8 = vmul.f32 %v1355_v50, %v4114_v47 }
 0x5d1   :  { %v1364_v0 = vmul.f32 %v1360_v8, %v1250_v28  ;;  %v2880_v8 = vld [vmem:[%s4777_s12 + $0x38] sm:$0xff]  ;;  %v2879_v28 = vld [vmem:[%s4777_s12 + $0x30] sm:$0xff] }
 0x5d2   :  { %1611 = vmatpush.msrb.mxu1 %v2880_v8 }
 0x5d3   :  { %1406 = vmatmul.f32.gmra.mxu2 %v1364_v0 }
 0x5d4   :  { %1612 = vmatpush.msrb.mxu1 %v2879_v28  ;;  %v2991_v28 = vld [vmem:[%s4776_s11 + $0x1] ss:$0 sm:$0xff] }
 0x63e   :  { %v1398_v14 = vpop.f32.mrf.mxu2 }
 0x63f   :  { %v1410_v54 = vadd.f32 %v1398_v14, %v3988_v9  ;;  %v2989_v14 = vld [vmem:[%s4808_s2 + $0x1] ss:$0 sm:$0xff]  ;;  %s3288_s2 = smov 8  }
 0x641   :  { %v4129_v46 = vadd.f32 %v2988_v18, %v1410_v54  ;;  %v2878_v54 = vld [vmem:[%s4777_s12 + $0x28] sm:$0xff] }
 0x642   :  { %1613 = vmatpush.msrb.mxu1 %v2878_v54 }
 0x643   :  { %v1424_v11 = vmul.f32 %v4129_v46, %v4129_v46 }
 0x645   :  { %v1428_v13 = vsel %vm132_vm0, %v1424_v11, 0.0 }
 0x646   :  { %1429 = vadd.xlane.f32.xlu1 %v1428_v13  ;;  %v1401_v47 = vpop.f32.mrf.mxu2 }
 0x647   :  { %v1411_v53 = vadd.f32 %v1401_v47, %v3996_v24 }
 0x649   :  { %v4135_v29 = vadd.f32 %v2988_v18, %v1411_v53  ;;  %v2877_v53 = vld [vmem:[%s4777_s12 + $0x20] sm:$0xff]  ;;  %s3287_s12 = smov 128  }
 0x64a   :  { %1614 = vmatpush.msrb.mxu1 %v2877_v53 }
 0x64b   :  { %v1425_v16 = vmul.f32 %v4135_v29, %v4135_v29 }
 0x64d   :  { %v1431_v2 = vsel %vm132_vm0, %v1425_v16, 0.0 }
 0x64e   :  { %1432 = vadd.xlane.f32.xlu2 %v1431_v2  ;;  %v1404_v9 = vpop.f32.mrf.mxu2 }
 0x64f   :  { %v1412_v17 = vadd.f32 %v1404_v9, %v4004_v1  ;;  %v2871_v1 = vld [vmem:[%s4775_s10 + $0x38] sm:$0xff] }
 0x650   :  { %1572 = vmatpush.msrb.mxu2 %v2871_v1 }
 0x651   :  { %v4141_v15 = vadd.f32 %v2988_v18, %v1412_v17 }
 0x653   :  { %v1426_v22 = vmul.f32 %v4141_v15, %v4141_v15 }
 0x655   :  { %v1434_v5 = vsel %vm132_vm0, %v1426_v22, 0.0 }
 0x656   :  { %1435 = vadd.xlane.f32.xlu0 %v1434_v5  ;;  %v1407_v24 = vpop.f32.mrf.mxu2 }
 0x657   :  { %v1413_v25 = vadd.f32 %v1407_v24, %v4012_v19  ;;  %v2870_v19 = vld [vmem:[%s4775_s10 + $0x30] sm:$0xff] }
 0x658   :  { %1573 = vmatpush.msrb.mxu2 %v2870_v19 }
 0x659   :  { %v4147_v26 = vadd.f32 %v2988_v18, %v1413_v25 }
 0x65a   :  { %1574 = vmatpush.msrb.mxu2 %v2869_v49 }
 0x65b   :  { %v1427_v32 = vmul.f32 %v4147_v26, %v4147_v26 }
 0x65c   :  { %1575 = vmatpush.msrb.mxu2 %v2868_v40 }
 0x65d   :  { %v1437_v55 = vsel %vm132_vm0, %v1427_v32, 0.0 }
 0x65e   :  { %1438 = vadd.xlane.f32.xlu1 %v1437_v55 }
 0x6b9   :  { %v1430_v43 = vpop.xlane.xlu1 %1429 }
 0x6ba   :  { %v1440_v35 = vmul.f32 %v1430_v43, %v3477_v30 }
 0x6bc   :  { %v1444_v44 = vadd.f32 1.1920929e-07, %v1440_v35 }
 0x6be   :  { %3095 = vrsqrt.f32 %v1444_v44  ;;  %vm1454_vm2 = vweird.f32 %v1444_v44 }
 0x6c1   :  { %v1433_v3 = vpop.xlane.xlu2 %1432 }
 0x6c2   :  { %v1441_v10 = vmul.f32 %v1433_v3, %v3477_v30 }
 0x6c4   :  { %v3096_v51 = vpop.eup %3095  ;;  %v1445_v21 = vadd.f32 1.1920929e-07, %v1441_v10 }
 0x6c5   :  { %v1449_v57 = vmul.f32 %v3096_v51, %v1444_v44  ;;  %vm1455_vm1 = vweird.f32 %v3096_v51 }
 0x6c6   :  { %3097 = vrsqrt.f32 %v1445_v21  ;;  %vm1456_vm3 = vmor %vm1454_vm2, %vm1455_vm1  ;;  %vm1464_vm5 = vweird.f32 %v1445_v21 }
 0x6c7   :  { %v1450_v59 = vmul.f32 %v3096_v51, %v1449_v57 }
 0x6c9   :  { %v1451_v62 = vmul.f32 0.5, %v1450_v59  ;;  %v1436_v63 = vpop.xlane.xlu0 %1435 }
 0x6ca   :  { %v1442_v61 = vmul.f32 %v1436_v63, %v3477_v30 }
 0x6cb   :  { %v1452_v7 = vsub.f32 1.5, %v1451_v62 }
 0x6cc   :  { %v3098_v48 = vpop.eup %3097  ;;  %v1446_v50 = vadd.f32 1.1920929e-07, %v1442_v61 }
 0x6cd   :  { %v1453_v0 = vmul.f32 %v3096_v51, %v1452_v7  ;;  %v1459_v18 = vmul.f32 %v3098_v48, %v1445_v21  ;;  %vm1465_vm4 = vweird.f32 %v3098_v48 }
 0x6ce   :  { %3099 = vrsqrt.f32 %v1446_v50  ;;  %vm1466_vm6 = vmor %vm1464_vm5, %vm1465_vm4  ;;  %vm1474_vm8 = vweird.f32 %v1446_v50 }
 0x6cf   :  { %v1457_v11 = vsel %vm1456_vm3, %v3096_v51, %v1453_v0  ;;  %v1460_v13 = vmul.f32 %v3098_v48, %v1459_v18  ;;  %v2990_v18 = vld [vmem:[%s4774_s9 + $0x1] ss:$0 sm:$0xff] }
 0x6d0   :  { %v1488_v47 = vmul.f32 %v1457_v11, %v4129_v46 }
 0x6d1   :  { %v1461_v16 = vmul.f32 0.5, %v1460_v13  ;;  %v1439_v2 = vpop.xlane.xlu1 %1438  ;;  %v3211_v13 = vld [vmem:[%s4810_s25 + $0x10] sm:$0xff] }
 0x6d2   :  { %v1495_v9 = vmul.f32 %v2989_v14, %v1488_v47  ;;  %v1443_v17 = vmul.f32 %v1439_v2, %v3477_v30 }
 0x6d3   :  { %v1462_v22 = vsub.f32 1.5, %v1461_v16 }
 0x6d4   :  { %v3100_v5 = vpop.eup %3099  ;;  %v1447_v24 = vadd.f32 1.1920929e-07, %v1443_v17  ;;  %2864 = vmatmul.msk.f32.vlgmr.msra.gmra.mxu1 %vm132_vm0, %v1495_v9  ;;  %2873 = vmatmul.msk.f32.vlgmr.msrb.gmra.mxu2 %vm132_vm0, %v1495_v9 }
 0x6d5   :  { %v1463_v25 = vmul.f32 %v3098_v48, %v1462_v22  ;;  %v1469_v32 = vmul.f32 %v3100_v5, %v1446_v50  ;;  %vm1475_vm7 = vweird.f32 %v3100_v5 }
 0x6d6   :  { %3101 = vrsqrt.f32 %v1447_v24  ;;  %vm1476_vm9 = vmor %vm1474_vm8, %vm1475_vm7  ;;  %vm1484_vm11 = vweird.f32 %v1447_v24 }
 0x6d7   :  { %v1470_v55 = vmul.f32 %v3100_v5, %v1469_v32  ;;  %v1467_v1 = vsel %vm1466_vm6, %v3098_v48, %v1463_v25  ;;  %v3213_v25 = vld [vmem:[%s4810_s25 + $0x8] sm:$0xff] }
 0x6d8   :  { %v1489_v45 = vmul.f32 %v1467_v1, %v4135_v29  ;;  %v3214_v1 = vld [vmem:[%s4809_s0 + $0x18] sm:$0xff] }
 0x6d9   :  { %v1471_v19 = vmul.f32 0.5, %v1470_v55 }
 0x6da   :  { %v1496_v34 = vmul.f32 %v2989_v14, %v1489_v45 }
 0x6db   :  { %v1472_v12 = vsub.f32 1.5, %v1471_v19  ;;  %v3215_v19 = vld [vmem:[%s4810_s25 + $0x18] sm:$0xff] }
 0x6dc   :  { %v3102_v49 = vpop.eup %3101  ;;  %2865 = vmatmul.msk.f32.gmra.mxu1 %vm132_vm0, %v1496_v34  ;;  %2874 = vmatmul.msk.f32.gmra.mxu2 %vm132_vm0, %v1496_v34 }
 0x6dd   :  { %v1473_v39 = vmul.f32 %v3100_v5, %v1472_v12  ;;  %v1479_v40 = vmul.f32 %v3102_v49, %v1447_v24  ;;  %vm1485_vm10 = vweird.f32 %v3102_v49 }
 0x6de   :  { %vm1486_vm12 = vmor %vm1484_vm11, %vm1485_vm10 }
 0x6df   :  { %v1480_v43 = vmul.f32 %v3102_v49, %v1479_v40  ;;  %v1477_v35 = vsel %vm1476_vm9, %v3100_v5, %v1473_v39 }
 0x6e0   :  { %v1490_v44 = vmul.f32 %v1477_v35, %v4141_v15 }
 0x6e1   :  { %v1481_v3 = vmul.f32 0.5, %v1480_v43  ;;  %v3217_v43 = vld [vmem:[%s4810_s25] sm:$0xff] }
 0x6e2   :  { %v1497_v10 = vmul.f32 %v2989_v14, %v1490_v44 }
 0x6e3   :  { %v1482_v51 = vsub.f32 1.5, %v1481_v3 }
 0x6e4   :  { %2866 = vmatmul.msk.f32.gmra.mxu1 %vm132_vm0, %v1497_v10  ;;  %2875 = vmatmul.msk.f32.gmra.mxu2 %vm132_vm0, %v1497_v10 }
 0x6e5   :  { %v1483_v21 = vmul.f32 %v3102_v49, %v1482_v51  ;;  %v3218_v51 = vld [vmem:[%s4811_s6 + $0x18] sm:$0xff] }
 0x6e7   :  { %v1487_v57 = vsel %vm1486_vm12, %v3102_v49, %v1483_v21  ;;  %v3216_v49 = vld [vmem:[%s4809_s0 + $0x8] sm:$0xff] }
 0x6e8   :  { %v1491_v59 = vmul.f32 %v1487_v57, %v4147_v26  ;;  %v3219_v57 = vld [vmem:[%s4809_s0] sm:$0xff] }
 0x6ea   :  { %v1498_v62 = vmul.f32 %v2989_v14, %v1491_v59 }
 0x6ec   :  { %2867 = vmatmul.msk.f32.gmra.mxu1 %vm132_vm0, %v1498_v62  ;;  %2876 = vmatmul.msk.f32.gmra.mxu2 %vm132_vm0, %v1498_v62 }
 0x6f4   :  { %2882 = vmatmul.msk.f32.vlgmr.msrb.gmra.mxu1 %vm132_vm0, %v1495_v9  ;;  %v3212_v9 = vld [vmem:[%s4809_s0 + $0x10] sm:$0xff] }
 0x6fc   :  { %2883 = vmatmul.msk.f32.gmra.mxu1 %vm132_vm0, %v1496_v34 }
 0x704   :  { %2884 = vmatmul.msk.f32.gmra.mxu1 %vm132_vm0, %v1497_v10 }
 0x70c   :  { %2885 = vmatmul.msk.f32.gmra.mxu1 %vm132_vm0, %v1498_v62  ;;  %v3220_v62 = vld [vmem:[%s4811_s6 + $0x10] sm:$0xff] }
 0x751   :  { %v1538_v63 = vpop.f32.mrf.mxu1 }
 0x752   :  { %v1539_v12 = vadd.f32 %v2990_v18, %v1538_v63 }
 0x754   :  { %v1628_v59 = vmul.f32 %v3219_v57, %v1539_v12 }
 0x757   :  { %v1577_v61 = vpop.f32.mrf.mxu2 }
 0x758   :  { %v1578_v5 = vadd.f32 %v2991_v28, %v1577_v61  ;;  %v3221_v61 = vld [vmem:[%s4812_s3 + $0x18] sm:$0xff] }
 0x759   :  { %v1541_v7 = vpop.f32.mrf.mxu1 }
 0x75a   :  { %v1542_v2 = vadd.f32 %v2990_v18, %v1541_v7  ;;  %v1632_v35 = vmul.f32 %v3217_v43, %v1578_v5 }
 0x75c   :  { %v1629_v39 = vmul.f32 %v3216_v49, %v1542_v2 }
 0x75f   :  { %v1580_v48 = vpop.f32.mrf.mxu2 }
 0x760   :  { %v1581_v11 = vadd.f32 %v2991_v28, %v1580_v48 }
 0x761   :  { %v1544_v50 = vpop.f32.mrf.mxu1 }
 0x762   :  { %v1545_v54 = vadd.f32 %v2990_v18, %v1544_v50  ;;  %v1633_v32 = vmul.f32 %v3213_v25, %v1581_v11 }
 0x764   :  { %v1630_v17 = vmul.f32 %v3212_v9, %v1545_v54  ;;  %v4242_v44 = vadd.f32 %v1633_v32, %v1629_v39  ;;  %v3225_v32 = vld [vmem:[%s4812_s3 + $0x8] sm:$0xff] }
 0x767   :  { %v1583_v8 = vpop.f32.mrf.mxu2 }
 0x768   :  { %v1584_v14 = vadd.f32 %v2991_v28, %v1583_v8  ;;  %v1636_v8 = vadd.f32 %v1632_v35, %v1628_v59 }
 0x769   :  { %v1547_v0 = vpop.f32.mrf.mxu1 }
 0x76a   :  { %v1634_v47 = vmul.f32 %v3211_v13, %v1584_v14  ;;  %v1548_v53 = vadd.f32 %v2990_v18, %v1547_v0  ;;  %v1646_v63 = vmul.f32 %v3220_v62, %v1584_v14  ;;  %v3222_v13 = vld [vmem:[%s4811_s6 + $0x8] sm:$0xff]  ;;  %v3223_v14 = vld [vmem:[%s4812_s3 + $0x10] sm:$0xff]  ;;  %v1660_v39 = vmul.f32 %v3891_v58, %v1636_v8 }
 0x76c   :  { %v4226_v55 = vadd.f32 %v1634_v47, %v1630_v17  ;;  %v1631_v45 = vmul.f32 %v3214_v1, %v1548_v53  ;;  %v1655_v7 = vmul.f32 %v3221_v61, %v1548_v53  ;;  %v1645_v47 = vmul.f32 %v3222_v13, %v1581_v11  ;;  %v3229_v61 = vld [vmem:[%s4814_s7 + $0x10] sm:$0xff] }
 0x76d   :  { %v1640_v53 = vmul.f32 %v3219_v57, %v1636_v8  ;;  %v1653_v11 = vmul.f32 %v3225_v32, %v1542_v2 }
 0x76e   :  { %v1642_v3 = vmul.f32 %v3212_v9, %v4226_v55 }
 0x76f   :  { %v1586_v16 = vpop.f32.mrf.mxu2 }
 0x770   :  { %v1587_v22 = vadd.f32 %v2991_v28, %v1586_v16  ;;  %v1641_v28 = vmul.f32 %v3216_v49, %v4242_v44  ;;  %v1650_v0 = vadd.f32 %v1646_v63, %v1642_v3  ;;  %v1654_v16 = vmul.f32 %v3223_v14, %v1545_v54  ;;  %v3231_v14 = vld [vmem:[%s4814_s7 + $0x20] sm:$0xff] }
 0x771   :  { %v1616_v24 = vpop.f32.mrf.mxu1 }
 0x772   :  { %v1635_v34 = vmul.f32 %v3215_v19, %v1587_v22  ;;  %v1647_v21 = vmul.f32 %v3218_v51, %v1587_v22  ;;  %v1649_v9 = vadd.f32 %v1645_v47, %v1641_v28  ;;  %v1658_v17 = vsub.f32 %v1650_v0, %v1654_v16  ;;  %v3224_v22 = vld [vmem:[%s4811_s6] sm:$0xff]  ;;  %v3230_v28 = vld [vmem:[%s4814_s7 + $0x18] sm:$0xff] }
 0x773   :  { %v1644_v25 = vmul.f32 %v3224_v22, %v1578_v5  ;;  %v3226_v19 = vld [vmem:[%s4812_s3] sm:$0xff]  ;;  %v1662_v51 = vmul.f32 %v3940_v42, %v4226_v55  ;;  %v3232_v22 = vld [vmem:[%s4814_s7 + $0x28] sm:$0xff] }
 0x774   :  { %v4237_v40 = vadd.f32 %v1635_v34, %v1631_v45  ;;  %v1657_v54 = vsub.f32 %v1649_v9, %v1653_v11  ;;  %v1652_v34 = vmul.f32 %v3226_v19, %v1539_v12  ;;  %v2992_v5 = vld [vmem:[%s4778_s13 + $0x1] ss:$0 sm:$0xff] }
 0x775   :  { %v1648_v45 = vadd.f32 %v1644_v25, %v1640_v53  ;;  %v1617_v12 = vadd.f32 %v2992_v5, %v1616_v24  ;;  %v1666_v24 = vmul.f32 %v3934_v38, %v4226_v55 }
 0x776   :  { %v1643_v10 = vmul.f32 %v3214_v1, %v4237_v40  ;;  %v1663_v58 = vmul.f32 %v3965_v56, %v4237_v40  ;;  %v1667_v42 = vmul.f32 %v3959_v52, %v4237_v40  ;;  %v1668_v56 = vmul.f32 %v3897_v20, %v1636_v8 }
 0x777   :  { %v1656_v49 = vsub.f32 %v1648_v45, %v1652_v34  ;;  %v1671_v38 = vmul.f32 %v3971_v23, %v4237_v40  ;;  %v1672_v52 = vmul.f32 %v3903_v41, %v1636_v8  ;;  %v1673_v20 = vmul.f32 %v3928_v37, %v4242_v44  ;;  %v3227_v41 = vld [vmem:[%s4814_s7] sm:$0xff]  ;;  %v3233_v45 = vld [vmem:[%s4814_s7 + $0x30] sm:$0xff] }
 0x778   :  { %v1651_v48 = vadd.f32 %v1647_v21, %v1643_v10  ;;  %v1661_v10 = vmul.f32 %v3915_v4, %v4242_v44  ;;  %v1664_v21 = vmul.f32 %v3885_v6, %v1636_v8  ;;  %v1665_v4 = vmul.f32 %v3909_v27, %v4242_v44 }
 0x779   :  { %v1619_v50 = vpop.f32.mrf.mxu1  ;;  %v1669_v6 = vmul.f32 %v3921_v33, %v4242_v44  ;;  %v1670_v27 = vmul.f32 %v3946_v31, %v4226_v55  ;;  %v1674_v33 = vmul.f32 %v3953_v36, %v4226_v55  ;;  %v1675_v31 = vmul.f32 %v3978_v60, %v4237_v40  ;;  %v3228_v36 = vld [vmem:[%s4814_s7 + $0x8] sm:$0xff] }
 0x77a   :  { %v1659_v18 = vsub.f32 %v1651_v48, %v1655_v7  ;;  %v1620_v3 = vadd.f32 %v2992_v5, %v1619_v50 }
 0x77c   :  { %2886 = vmatpush.xpose.msk.msra.mxu2 %vm132_vm0, %v1659_v18 }
 0x780   :  { %2887 = vmatpush.xpose.msk.msra.mxu2 %vm132_vm0, %v1658_v17 }
 0x781   :  { %v1622_v1 = vpop.f32.mrf.mxu1 }
 0x782   :  { %v1623_v35 = vadd.f32 %v2992_v5, %v1622_v1 }
 0x784   :  { %2888 = vmatpush.xpose.msk.msra.mxu2 %vm132_vm0, %v1657_v54 }
 0x788   :  { %2889 = vmatpush.xpose.msk.msra.mxu2 %vm132_vm0, %v1656_v49 }
 0x789   :  { %v1625_v2 = vpop.f32.mrf.mxu1 }
 0x78a   :  { %v1626_v43 = vadd.f32 %v2992_v5, %v1625_v2  ;;  %v3234_v5 = vld [vmem:[%s4814_s7 + $0x38] sm:$0xff] }
 0x78b   :  { %2890 = vmatmul.msk.f32.vlgmr.msra.gmra.mxu2 %vm132_vm0, %v1660_v39 }
 0x78c   :  { %2277 = vmatpush.msrb.mxu3 %v1626_v43 }
 0x78e   :  { %2278 = vmatpush.msrb.mxu3 %v1623_v35 }
 0x790   :  { %2279 = vmatpush.msrb.mxu3 %v1620_v3 }
 0x792   :  { %2280 = vmatpush.msrb.mxu3 %v1617_v12 }
 0x793   :  { %2891 = vmatmul.msk.f32.gmra.mxu2 %vm132_vm0, %v1661_v10 }
 0x79b   :  { %2892 = vmatmul.msk.f32.gmra.mxu2 %vm132_vm0, %v1662_v51 }
 0x7a3   :  { %2893 = vmatmul.msk.f32.gmra.mxu2 %vm132_vm0, %v1663_v58 }
 0x7ab   :  { %2894 = vmatmul.msk.f32.gmra.mxu2 %vm132_vm0, %v1664_v21 }
 0x7b3   :  { %2895 = vmatmul.msk.f32.gmra.mxu2 %vm132_vm0, %v1665_v4 }
 0x7bb   :  { %2896 = vmatmul.msk.f32.gmra.mxu2 %vm132_vm0, %v1666_v24 }
 0x7c3   :  { %2897 = vmatmul.msk.f32.gmra.mxu2 %vm132_vm0, %v1667_v42 }
 0x7cb   :  { %2898 = vmatmul.msk.f32.gmra.mxu2 %vm132_vm0, %v1668_v56 }
 0x7d3   :  { %2899 = vmatmul.msk.f32.gmra.mxu2 %vm132_vm0, %v1669_v6 }
 0x7db   :  { %2900 = vmatmul.msk.f32.gmra.mxu2 %vm132_vm0, %v1670_v27  ;;  %v3235_v27 = vld [vmem:[%s4814_s7 + $0x40] sm:$0xff] }
 0x7e3   :  { %2901 = vmatmul.msk.f32.gmra.mxu2 %vm132_vm0, %v1671_v38 }
 0x7eb   :  { %2902 = vmatmul.msk.f32.gmra.mxu2 %vm132_vm0, %v1672_v52 }
 0x7f3   :  { %2903 = vmatmul.msk.f32.gmra.mxu2 %vm132_vm0, %v1673_v20 }
 0x7fb   :  { %2904 = vmatmul.msk.f32.gmra.mxu2 %vm132_vm0, %v1674_v33 }
 0x803   :  { %2905 = vmatmul.msk.f32.gmra.mxu2 %vm132_vm0, %v1675_v31 }
 0x80e   :  { %v1753_v23 = vpop.f32.mrf.mxu2 }
 0x80f   :  { %v1801_v57 = vmul.f32 0.35355338, %v1753_v23 }
 0x811   :  { %v1817_v59 = vadd.f32 %v3227_v41, %v1801_v57 }
 0x813   :  { %v1833_v37 = vsel %vm132_vm0, %v1817_v59, -inf }
 0x814   :  { %1834 = vmax.xlane.f32.xlu2 %v1833_v37 }
 0x816   :  { %v1756_v44 = vpop.f32.mrf.mxu2 }
 0x817   :  { %v1802_v62 = vmul.f32 0.35355338, %v1756_v44 }
 0x819   :  { %v1818_v55 = vadd.f32 %v3228_v36, %v1802_v62 }
 0x81b   :  { %v1836_v60 = vsel %vm132_vm0, %v1818_v55, -inf }
 0x81c   :  { %1837 = vmax.xlane.f32.xlu0 %v1836_v60 }
 0x81e   :  { %v1759_v40 = vpop.f32.mrf.mxu2 }
 0x81f   :  { %v1803_v63 = vmul.f32 0.35355338, %v1759_v40 }
 0x821   :  { %v1819_v7 = vadd.f32 %v3229_v61, %v1803_v63 }
 0x823   :  { %v1839_v48 = vsel %vm132_vm0, %v1819_v7, -inf }
 0x824   :  { %1840 = vmax.xlane.f32.xlu1 %v1839_v48 }
 0x826   :  { %v1762_v50 = vpop.f32.mrf.mxu2 }
 0x827   :  { %v1804_v8 = vmul.f32 0.35355338, %v1762_v50 }
 0x829   :  { %v1820_v0 = vadd.f32 %v3230_v28, %v1804_v8 }
 0x82b   :  { %v1842_v18 = vsel %vm132_vm0, %v1820_v0, -inf }
 0x82c   :  { %1843 = vmax.xlane.f32.xlu2 %v1842_v18 }
 0x82e   :  { %v1765_v13 = vpop.f32.mrf.mxu2 }
 0x82f   :  { %v1805_v47 = vmul.f32 0.35355338, %v1765_v13 }
 0x831   :  { %v4344_v16 = vadd.f32 %v3231_v14, %v1805_v47 }
 0x833   :  { %v1845_v53 = vsel %vm132_vm0, %v4344_v16, -inf }
 0x834   :  { %1846 = vmax.xlane.f32.xlu0 %v1845_v53  ;;  %v3238_v53 = vld [vmem:[%s4814_s7 + $0x58] sm:$0xff] }
 0x836   :  { %v1768_v9 = vpop.f32.mrf.mxu2 }
 0x837   :  { %v1806_v17 = vmul.f32 0.35355338, %v1768_v9 }
 0x839   :  { %v4351_v25 = vadd.f32 %v3232_v22, %v1806_v17 }
 0x83b   :  { %v1848_v32 = vsel %vm132_vm0, %v4351_v25, -inf }
 0x83c   :  { %1849 = vmax.xlane.f32.xlu1 %v1848_v32 }
 0x83e   :  { %v1771_v11 = vpop.f32.mrf.mxu2 }
 0x83f   :  { %v1807_v1 = vmul.f32 0.35355338, %v1771_v11 }
 0x841   :  { %v4358_v54 = vadd.f32 %v3233_v45, %v1807_v1 }
 0x843   :  { %v1851_v19 = vsel %vm132_vm0, %v4358_v54, -inf }
 0x844   :  { %1852 = vmax.xlane.f32.xlu2 %v1851_v19 }
 0x846   :  { %v1774_v34 = vpop.f32.mrf.mxu2 }
 0x847   :  { %v1808_v49 = vmul.f32 0.35355338, %v1774_v34  ;;  %v3239_v34 = vld [vmem:[%s4814_s7 + $0x60] sm:$0xff] }
 0x849   :  { %v4365_v2 = vadd.f32 %v3234_v5, %v1808_v49 }
 0x84b   :  { %v1854_v39 = vsel %vm132_vm0, %v4365_v2, -inf }
 0x84c   :  { %1855 = vmax.xlane.f32.xlu1 %v1854_v39 }
 0x84e   :  { %v1777_v43 = vpop.f32.mrf.mxu2 }
 0x84f   :  { %v1809_v24 = vmul.f32 0.35355338, %v1777_v43 }
 0x851   :  { %v4376_v38 = vadd.f32 %v3235_v27, %v1809_v24  ;;  %v3241_v27 = vld [vmem:[%s4814_s7 + $0x70] sm:$0xff] }
 0x853   :  { %v1857_v57 = vsel %vm132_vm0, %v4376_v38, -inf }
 0x856   :  { %v1780_v10 = vpop.f32.mrf.mxu2 }
 0x857   :  { %v1810_v31 = vmul.f32 0.35355338, %v1780_v10 }
 0x85e   :  { %v1783_v56 = vpop.f32.mrf.mxu2 }
 0x85f   :  { %v1811_v60 = vmul.f32 0.35355338, %v1783_v56 }
 0x866   :  { %v1786_v44 = vpop.f32.mrf.mxu2 }
 0x867   :  { %v1812_v18 = vmul.f32 0.35355338, %v1786_v44 }
 0x86e   :  { %v1789_v28 = vpop.f32.mrf.mxu2 }
 0x86f   :  { %v1813_v32 = vmul.f32 0.35355338, %v1789_v28 }
 0x876   :  { %v1792_v45 = vpop.f32.mrf.mxu2 }
 0x877   :  { %v1814_v43 = vmul.f32 0.35355338, %v1792_v45 }
 0x887   :  { %v1835_v35 = vpop.xlane.xlu2 %1834 }
 0x888   :  { %v1881_v3 = vsub.f32 %v1817_v59, %v1835_v35  ;;  %v3236_v59 = vld [vmem:[%s4814_s7 + $0x48] sm:$0xff] }
 0x889   :  { %v4387_v37 = vadd.f32 %v3236_v59, %v1810_v31 }
 0x88a   :  { %v1897_v12 = vmul.f32 1.442695, %v1881_v3 }
 0x88b   :  { %v1860_v63 = vsel %vm132_vm0, %v4387_v37, -inf }
 0x88c   :  { %3103 = vpow2.f32 %v1897_v12  ;;  %v1795_v12 = vpop.f32.mrf.mxu2 }
 0x88f   :  { %v1838_v51 = vpop.xlane.xlu0 %1837 }
 0x890   :  { %v1882_v58 = vsub.f32 %v1818_v55, %v1838_v51  ;;  %v3240_v51 = vld [vmem:[%s4814_s7 + $0x68] sm:$0xff] }
 0x892   :  { %v4369_v21 = vpop.eup %3103  ;;  %v1899_v4 = vmul.f32 1.442695, %v1882_v58 }
 0x893   :  { %v1929_v42 = vsel %vm132_vm0, %v4369_v21, 0.0 }
 0x894   :  { %3105 = vpow2.f32 %v1899_v4  ;;  %1930 = vadd.xlane.f32.xlu0 %v1929_v42  ;;  %v1815_v42 = vmul.f32 0.35355338, %v1795_v12 }
 0x897   :  { %v1841_v6 = vpop.xlane.xlu1 %1840 }
 0x898   :  { %v1883_v52 = vsub.f32 %v1819_v7, %v1841_v6  ;;  %v3237_v7 = vld [vmem:[%s4814_s7 + $0x50] sm:$0xff] }
 0x899   :  { %v4398_v48 = vadd.f32 %v3237_v7, %v1811_v60 }
 0x89a   :  { %v4378_v20 = vpop.eup %3105  ;;  %v1901_v33 = vmul.f32 1.442695, %v1883_v52  ;;  %v4446_v52 = vadd.f32 %v3241_v27, %v1815_v42 }
 0x89b   :  { %v1932_v23 = vsel %vm132_vm0, %v4378_v20, 0.0  ;;  %v1863_v47 = vsel %vm132_vm0, %v4398_v48, -inf }
 0x89c   :  { %3107 = vpow2.f32 %v1901_v33  ;;  %1933 = vadd.xlane.f32.xlu2 %v1932_v23  ;;  %1858 = vmax.xlane.f32.xlu0 %v1857_v57  ;;  %v1875_v57 = vsel %vm132_vm0, %v4446_v52, -inf }
 0x89f   :  { %v1844_v41 = vpop.xlane.xlu2 %1843 }
 0x8a0   :  { %v1884_v62 = vsub.f32 %v1820_v0, %v1844_v41  ;;  %v3242_v41 = vld [vmem:[%s4814_s7 + $0x78] sm:$0xff]  ;;  %s4815_s7 = sld [smem:[#allocation13_spill]] }
 0x8a2   :  { %v4389_v36 = vpop.eup %3107  ;;  %v1903_v55 = vmul.f32 1.442695, %v1884_v62 }
 0x8a3   :  { %v1935_v40 = vsel %vm132_vm0, %v4389_v36, 0.0 }
 0x8a4   :  { %3109 = vpow2.f32 %v1903_v55  ;;  %1936 = vadd.xlane.f32.xlu1 %v1935_v40  ;;  %1861 = vmax.xlane.f32.xlu2 %v1860_v63 }
 0x8a7   :  { %v1847_v61 = vpop.xlane.xlu0 %1846 }
 0x8a8   :  { %v1885_v50 = vsub.f32 %v4344_v16, %v1847_v61  ;;  %v4410_v16 = vadd.f32 %v3238_v53, %v1812_v18 }
 0x8aa   :  { %v4401_v8 = vpop.eup %3109  ;;  %v1905_v0 = vmul.f32 1.442695, %v1885_v50  ;;  %v1866_v1 = vsel %vm132_vm0, %v4410_v16, -inf }
 0x8ab   :  { %v1938_v13 = vsel %vm132_vm0, %v4401_v8, 0.0 }
 0x8ac   :  { %3111 = vpow2.f32 %v1905_v0  ;;  %1939 = vadd.xlane.f32.xlu0 %v1938_v13  ;;  %1864 = vmax.xlane.f32.xlu1 %v1863_v47 }
 0x8af   :  { %v1850_v14 = vpop.xlane.xlu1 %1849 }
 0x8b0   :  { %v1886_v9 = vsub.f32 %v4351_v25, %v1850_v14  ;;  %v4422_v25 = vadd.f32 %v3239_v34, %v1813_v32 }
 0x8b2   :  { %v4413_v17 = vpop.eup %3111  ;;  %v1907_v22 = vmul.f32 1.442695, %v1886_v9  ;;  %v1869_v3 = vsel %vm132_vm0, %v4422_v25, -inf }
 0x8b3   :  { %v1941_v11 = vsel %vm132_vm0, %v4413_v17, 0.0 }
 0x8b4   :  { %3113 = vpow2.f32 %v1907_v22  ;;  %1942 = vadd.xlane.f32.xlu2 %v1941_v11  ;;  %1867 = vmax.xlane.f32.xlu0 %v1866_v1 }
 0x8b7   :  { %v1853_v19 = vpop.xlane.xlu2 %1852 }
 0x8b8   :  { %v1887_v49 = vsub.f32 %v4358_v54, %v1853_v19  ;;  %v4434_v54 = vadd.f32 %v3240_v51, %v1814_v43 }
 0x8ba   :  { %v4425_v5 = vpop.eup %3113  ;;  %v1909_v39 = vmul.f32 1.442695, %v1887_v49  ;;  %v1872_v6 = vsel %vm132_vm0, %v4434_v54, -inf }
 0x8bb   :  { %v1944_v35 = vsel %vm132_vm0, %v4425_v5, 0.0 }
 0x8bc   :  { %3115 = vpow2.f32 %v1909_v39  ;;  %1945 = vadd.xlane.f32.xlu1 %v1944_v35  ;;  %1870 = vmax.xlane.f32.xlu2 %v1869_v3 }
 0x8bf   :  { %v1856_v10 = vpop.xlane.xlu1 %1855 }
 0x8c0   :  { %v1888_v58 = vsub.f32 %v4365_v2, %v1856_v10  ;;  %v1798_v2 = vpop.f32.mrf.mxu2 }
 0x8c1   :  { %v1816_v31 = vmul.f32 0.35355338, %v1798_v2 }
 0x8c2   :  { %v4437_v4 = vpop.eup %3115  ;;  %v1911_v24 = vmul.f32 1.442695, %v1888_v58 }
 0x8c3   :  { %v1947_v56 = vsel %vm132_vm0, %v4437_v4, 0.0  ;;  %v4457_v59 = vadd.f32 %v3242_v41, %v1816_v31 }
 0x8c4   :  { %3117 = vpow2.f32 %v1911_v24  ;;  %1948 = vadd.xlane.f32.xlu0 %v1947_v56  ;;  %1873 = vmax.xlane.f32.xlu1 %v1872_v6 }
 0x8c5   :  { %v1878_v44 = vsel %vm132_vm0, %v4457_v59, -inf }
 0x8ca   :  { %v4448_v33 = vpop.eup %3117 }
 0x8cb   :  { %v1950_v23 = vsel %vm132_vm0, %v4448_v33, 0.0 }
 0x8cc   :  { %1951 = vadd.xlane.f32.xlu2 %v1950_v23  ;;  %1876 = vmax.xlane.f32.xlu0 %v1875_v57 }
 0x8d4   :  { %1879 = vmax.xlane.f32.xlu2 %v1878_v44 }
 0x907   :  { %v1931_v62 = vpop.xlane.xlu0 %1930 }
 0x908   :  { %3119 = vrcp.f32 %v1931_v62  ;;  %v1988_v0 = vand.u32 2147483648, %v1931_v62  ;;  %v1986_v18 = vand.u32 2147483647, %v1931_v62  ;;  %vm1982_vm14 = vweird.f32 %v1931_v62 }
 0x90a   :  { %v1989_v14 = vor.u32 1.1754944e-38, %v1988_v0  ;;  %vm1987_vm1 = vcmp.eq.f32.partialorder %v1986_v18, 8.507059e+37 }
 0x90e   :  { %v3120_v55 = vpop.eup %3119 }
 0x90f   :  { %v1978_v60 = vmul.f32 %v3120_v55, %v1931_v62  ;;  %v1934_v40 = vpop.xlane.xlu2 %1933  ;;  %v1859_v63 = vpop.xlane.xlu0 %1858  ;;  %vm1983_vm13 = vweird.f32 %v3120_v55 }
 0x910   :  { %3121 = vrcp.f32 %v1934_v40  ;;  %v1889_v61 = vsub.f32 %v4376_v38, %v1859_v63  ;;  %vm1984_vm15 = vmor %vm1982_vm14, %vm1983_vm13  ;;  %v2002_v39 = vand.u32 2147483648, %v1934_v40  ;;  %v2000_v35 = vand.u32 2147483647, %v1934_v40 }
 0x911   :  { %v1979_v7 = vsub.f32 1.0, %v1978_v60  ;;  %vm1996_vm3 = vweird.f32 %v1934_v40 }
 0x912   :  { %v1913_v50 = vmul.f32 1.442695, %v1889_v61  ;;  %v2003_v12 = vor.u32 1.1754944e-38, %v2002_v39  ;;  %vm2001_vm5 = vcmp.eq.f32.partialorder %v2000_v35, 8.507059e+37 }
 0x913   :  { %v1980_v28 = vmul.f32 %v3120_v55, %v1979_v7 }
 0x914   :  { %3123 = vpow2.f32 %v1913_v50 }
 0x915   :  { %v1981_v13 = vadd.f32 %v3120_v55, %v1980_v28 }
 0x916   :  { %v3122_v47 = vpop.eup %3121 }
 0x917   :  { %v1992_v53 = vmul.f32 %v3122_v47, %v1934_v40  ;;  %v1937_v9 = vpop.xlane.xlu1 %1936  ;;  %v1862_v22 = vpop.xlane.xlu2 %1861  ;;  %v1985_v32 = vsel %vm1984_vm15, %v3120_v55, %v1981_v13  ;;  %vm1997_vm2 = vweird.f32 %v3122_v47 }
 0x918   :  { %3125 = vrcp.f32 %v1937_v9  ;;  %v1890_v38 = vsub.f32 %v4387_v37, %v1862_v22  ;;  %v1990_v1 = vsel %vm1987_vm1, %v1989_v14, %v1985_v32  ;;  %vm1998_vm4 = vmor %vm1996_vm3, %vm1997_vm2  ;;  %v2016_v23 = vand.u32 2147483648, %v1937_v9 }
 0x919   :  { %v1993_v11 = vsub.f32 1.0, %v1992_v53  ;;  %v2201_v34 = vmul.f32 %v4369_v21, %v1990_v1  ;;  %v2014_v41 = vand.u32 2147483647, %v1937_v9  ;;  %vm2010_vm7 = vweird.f32 %v1937_v9 }
 0x91a   :  { %v4463_v45 = vpop.eup %3123  ;;  %v1915_v19 = vmul.f32 1.442695, %v1890_v38  ;;  %v2017_v62 = vor.u32 1.1754944e-38, %v2016_v23 }
 0x91b   :  { %v1994_v49 = vmul.f32 %v3122_v47, %v1993_v11  ;;  %v1953_v43 = vsel %vm132_vm0, %v4463_v45, 0.0  ;;  %2906 = vmatmul.msk.f32.vlgmr.msrb.gmra.mxu3 %vm132_vm0, %v2201_v34  ;;  %vm2015_vm9 = vcmp.eq.f32.partialorder %v2014_v41, 8.507059e+37 }
 0x91c   :  { %3127 = vpow2.f32 %v1915_v19  ;;  %1954 = vadd.xlane.f32.xlu1 %v1953_v43 }
 0x91d   :  { %v1995_v37 = vadd.f32 %v3122_v47, %v1994_v49 }
 0x91e   :  { %v3126_v3 = vpop.eup %3125 }
 0x91f   :  { %v2006_v10 = vmul.f32 %v3126_v3, %v1937_v9  ;;  %v1940_v51 = vpop.xlane.xlu0 %1939  ;;  %v1865_v58 = vpop.xlane.xlu1 %1864  ;;  %v1999_v21 = vsel %vm1998_vm4, %v3122_v47, %v1995_v37  ;;  %vm2011_vm6 = vweird.f32 %v3126_v3 }
 0x920   :  { %3129 = vrcp.f32 %v1940_v51  ;;  %v1891_v24 = vsub.f32 %v4398_v48, %v1865_v58  ;;  %v2004_v56 = vsel %vm2001_vm5, %v2003_v12, %v1999_v21  ;;  %vm2012_vm8 = vmor %vm2010_vm7, %vm2011_vm6  ;;  %v2030_v13 = vand.u32 2147483648, %v1940_v51 }
 0x921   :  { %v2007_v42 = vsub.f32 1.0, %v2006_v10  ;;  %v2202_v2 = vmul.f32 %v4378_v20, %v2004_v56  ;;  %v2028_v14 = vand.u32 2147483647, %v1940_v51  ;;  %vm2024_vm11 = vweird.f32 %v1940_v51 }
 0x922   :  { %v4470_v6 = vpop.eup %3127  ;;  %v1917_v27 = vmul.f32 1.442695, %v1891_v24  ;;  %v2031_v9 = vor.u32 1.1754944e-38, %v2030_v13 }
 0x923   :  { %v2008_v31 = vmul.f32 %v3126_v3, %v2007_v42  ;;  %v1956_v57 = vsel %vm132_vm0, %v4470_v6, 0.0  ;;  %2907 = vmatmul.msk.f32.gmra.mxu3 %vm132_vm0, %v2202_v2  ;;  %vm2029_vm13 = vcmp.eq.f32.partialorder %v2028_v14, 8.507059e+37 }
 0x924   :  { %3131 = vpow2.f32 %v1917_v27  ;;  %1957 = vadd.xlane.f32.xlu0 %v1956_v57 }
 0x925   :  { %v2009_v48 = vadd.f32 %v3126_v3, %v2008_v31 }
 0x926   :  { %v3130_v44 = vpop.eup %3129 }
 0x927   :  { %v2020_v55 = vmul.f32 %v3130_v44, %v1940_v51  ;;  %v1943_v60 = vpop.xlane.xlu2 %1942  ;;  %v1868_v40 = vpop.xlane.xlu0 %1867  ;;  %v2013_v20 = vsel %vm2012_vm8, %v3126_v3, %v2009_v48  ;;  %vm2025_vm10 = vweird.f32 %v3130_v44 }
 0x928   :  { %3133 = vrcp.f32 %v1943_v60  ;;  %v1892_v63 = vsub.f32 %v4410_v16, %v1868_v40  ;;  %v2018_v7 = vsel %vm2015_vm9, %v2017_v62, %v2013_v20  ;;  %vm2026_vm12 = vmor %vm2024_vm11, %vm2025_vm10  ;;  %v2044_v35 = vand.u32 2147483648, %v1943_v60 }
 0x929   :  { %v2021_v61 = vsub.f32 1.0, %v2020_v55  ;;  %v2203_v0 = vmul.f32 %v4389_v36, %v2018_v7  ;;  %v2042_v3 = vand.u32 2147483647, %v1943_v60  ;;  %vm2038_vm15 = vweird.f32 %v1943_v60 }
 0x92a   :  { %v4477_v50 = vpop.eup %3131  ;;  %v1919_v28 = vmul.f32 1.442695, %v1892_v63  ;;  %v2045_v10 = vor.u32 1.1754944e-38, %v2044_v35 }
 0x92b   :  { %v2022_v18 = vmul.f32 %v3130_v44, %v2021_v61  ;;  %v1959_v47 = vsel %vm132_vm0, %v4477_v50, 0.0  ;;  %2908 = vmatmul.msk.f32.gmra.mxu3 %vm132_vm0, %v2203_v0  ;;  %vm2043_vm2 = vcmp.eq.f32.partialorder %v2042_v3, 8.507059e+37 }
 0x92c   :  { %3135 = vpow2.f32 %v1919_v28  ;;  %1960 = vadd.xlane.f32.xlu1 %v1959_v47 }
 0x92d   :  { %v2023_v16 = vadd.f32 %v3130_v44, %v2022_v18 }
 0x92e   :  { %v3134_v53 = vpop.eup %3133 }
 0x92f   :  { %v2034_v22 = vmul.f32 %v3134_v53, %v1943_v60  ;;  %v1946_v32 = vpop.xlane.xlu1 %1945  ;;  %v1871_v38 = vpop.xlane.xlu2 %1870  ;;  %v2027_v36 = vsel %vm2026_vm12, %v3130_v44, %v2023_v16  ;;  %vm2039_vm14 = vweird.f32 %v3134_v53 }
 0x930   :  { %3137 = vrcp.f32 %v1946_v32  ;;  %v1893_v11 = vsub.f32 %v4422_v25, %v1871_v38  ;;  %v2032_v19 = vsel %vm2029_vm13, %v2031_v9, %v2027_v36  ;;  %vm2040_vm1 = vmor %vm2038_vm15, %vm2039_vm14  ;;  %v2058_v57 = vand.u32 2147483648, %v1946_v32 }
 0x931   :  { %v2035_v1 = vsub.f32 1.0, %v2034_v22  ;;  %v2204_v39 = vmul.f32 %v4401_v8, %v2032_v19  ;;  %v2056_v48 = vand.u32 2147483647, %v1946_v32  ;;  %vm2052_vm4 = vweird.f32 %v1946_v32 }
 0x932   :  { %v4484_v34 = vpop.eup %3135  ;;  %v1921_v49 = vmul.f32 1.442695, %v1893_v11  ;;  %v2059_v62 = vor.u32 1.1754944e-38, %v2058_v57 }
 0x933   :  { %v2036_v43 = vmul.f32 %v3134_v53, %v2035_v1  ;;  %v1962_v37 = vsel %vm132_vm0, %v4484_v34, 0.0  ;;  %2909 = vmatmul.msk.f32.gmra.mxu3 %vm132_vm0, %v2204_v39  ;;  %vm2057_vm6 = vcmp.eq.f32.partialorder %v2056_v48, 8.507059e+37 }
 0x934   :  { %3139 = vpow2.f32 %v1921_v49  ;;  %1963 = vadd.xlane.f32.xlu2 %v1962_v37 }
 0x935   :  { %v2037_v25 = vadd.f32 %v3134_v53, %v2036_v43 }
 0x936   :  { %v3138_v12 = vpop.eup %3137 }
 0x937   :  { %v2048_v51 = vmul.f32 %v3138_v12, %v1946_v32  ;;  %v1949_v58 = vpop.xlane.xlu0 %1948  ;;  %v1874_v21 = vpop.xlane.xlu1 %1873  ;;  %v2041_v8 = vsel %vm2040_vm1, %v3134_v53, %v2037_v25  ;;  %vm2053_vm3 = vweird.f32 %v3138_v12 }
 0x938   :  { %3141 = vrcp.f32 %v1949_v58  ;;  %v1894_v24 = vsub.f32 %v4434_v54, %v1874_v21  ;;  %v2046_v56 = vsel %vm2043_vm2, %v2045_v10, %v2041_v8  ;;  %vm2054_vm5 = vmor %vm2052_vm4, %vm2053_vm3  ;;  %v2072_v28 = vand.u32 2147483648, %v1949_v58 }
 0x939   :  { %v2049_v42 = vsub.f32 1.0, %v2048_v51  ;;  %v2205_v31 = vmul.f32 %v4413_v17, %v2046_v56  ;;  %v2070_v14 = vand.u32 2147483647, %v1949_v58  ;;  %vm2066_vm8 = vweird.f32 %v1949_v58 }
 0x93a   :  { %v4491_v27 = vpop.eup %3139  ;;  %v1923_v2 = vmul.f32 1.442695, %v1894_v24  ;;  %v2073_v53 = vor.u32 1.1754944e-38, %v2072_v28 }
 0x93b   :  { %v2050_v23 = vmul.f32 %v3138_v12, %v2049_v42  ;;  %v1965_v41 = vsel %vm132_vm0, %v4491_v27, 0.0  ;;  %2910 = vmatmul.msk.f32.gmra.mxu3 %vm132_vm0, %v2205_v31  ;;  %vm2071_vm10 = vcmp.eq.f32.partialorder %v2070_v14, 8.507059e+37 }
 0x93c   :  { %3143 = vpow2.f32 %v1923_v2  ;;  %1966 = vadd.xlane.f32.xlu0 %v1965_v41 }
 0x93d   :  { %v2051_v54 = vadd.f32 %v3138_v12, %v2050_v23 }
 0x93e   :  { %v3142_v44 = vpop.eup %3141 }
 0x93f   :  { %v2062_v55 = vmul.f32 %v3142_v44, %v1949_v58  ;;  %v1952_v60 = vpop.xlane.xlu2 %1951  ;;  %v1877_v40 = vpop.xlane.xlu0 %1876  ;;  %v2055_v17 = vsel %vm2054_vm5, %v3138_v12, %v2051_v54  ;;  %vm2067_vm7 = vweird.f32 %v3142_v44 }
 0x940   :  { %3145 = vrcp.f32 %v1952_v60  ;;  %v1895_v20 = vsub.f32 %v4446_v52, %v1877_v40  ;;  %v2060_v61 = vsel %vm2057_vm6, %v2059_v62, %v2055_v17  ;;  %vm2068_vm9 = vmor %vm2066_vm8, %vm2067_vm7  ;;  %v2086_v19 = vand.u32 2147483648, %v1952_v60 }
 0x941   :  { %v2063_v63 = vsub.f32 1.0, %v2062_v55  ;;  %v2206_v18 = vmul.f32 %v4425_v5, %v2060_v61  ;;  %v2084_v35 = vand.u32 2147483647, %v1952_v60  ;;  %vm2080_vm12 = vweird.f32 %v1952_v60 }
 0x942   :  { %v4498_v7 = vpop.eup %3143  ;;  %v1925_v0 = vmul.f32 1.442695, %v1895_v20  ;;  %v2087_v37 = vor.u32 1.1754944e-38, %v2086_v19 }
 0x943   :  { %v2064_v13 = vmul.f32 %v3142_v44, %v2063_v63  ;;  %v1968_v47 = vsel %vm132_vm0, %v4498_v7, 0.0  ;;  %2911 = vmatmul.msk.f32.gmra.mxu3 %vm132_vm0, %v2206_v18  ;;  %vm2085_vm14 = vcmp.eq.f32.partialorder %v2084_v35, 8.507059e+37 }
 0x944   :  { %3147 = vpow2.f32 %v1925_v0  ;;  %1969 = vadd.xlane.f32.xlu1 %v1968_v47 }
 0x945   :  { %v2065_v52 = vadd.f32 %v3142_v44, %v2064_v13 }
 0x946   :  { %v3146_v16 = vpop.eup %3145 }
 0x947   :  { %v2076_v9 = vmul.f32 %v3146_v16, %v1952_v60  ;;  %v1880_v22 = vpop.xlane.xlu2 %1879  ;;  %v2069_v32 = vsel %vm2068_vm9, %v3142_v44, %v2065_v52  ;;  %vm2081_vm11 = vweird.f32 %v3146_v16 }
 0x948   :  { %v1896_v5 = vsub.f32 %v4457_v59, %v1880_v22  ;;  %v2074_v38 = vsel %vm2071_vm10, %v2073_v53, %v2069_v32  ;;  %vm2082_vm13 = vmor %vm2080_vm12, %vm2081_vm11 }
 0x949   :  { %v2077_v36 = vsub.f32 1.0, %v2076_v9  ;;  %v2207_v11 = vmul.f32 %v4437_v4, %v2074_v38 }
 0x94a   :  { %v4506_v1 = vpop.eup %3147  ;;  %v1927_v49 = vmul.f32 1.442695, %v1896_v5 }
 0x94b   :  { %v2078_v39 = vmul.f32 %v3146_v16, %v2077_v36  ;;  %v1971_v43 = vsel %vm132_vm0, %v4506_v1, 0.0  ;;  %2912 = vmatmul.msk.f32.gmra.mxu3 %vm132_vm0, %v2207_v11 }
 0x94c   :  { %3149 = vpow2.f32 %v1927_v49  ;;  %1972 = vadd.xlane.f32.xlu2 %v1971_v43 }
 0x94d   :  { %v2079_v59 = vadd.f32 %v3146_v16, %v2078_v39 }
 0x94f   :  { %v2083_v3 = vsel %vm2082_vm13, %v3146_v16, %v2079_v59 }
 0x950   :  { %v2088_v4 = vsel %vm2085_vm14, %v2087_v37, %v2083_v3 }
 0x951   :  { %v2208_v25 = vmul.f32 %v4448_v33, %v2088_v4 }
 0x952   :  { %v4512_v12 = vpop.eup %3149 }
 0x953   :  { %v1974_v10 = vsel %vm132_vm0, %v4512_v12, 0.0  ;;  %2913 = vmatmul.msk.f32.gmra.mxu3 %vm132_vm0, %v2208_v25 }
 0x954   :  { %1975 = vadd.xlane.f32.xlu0 %v1974_v10 }
 0x98f   :  { %v1955_v51 = vpop.xlane.xlu1 %1954 }
 0x990   :  { %3151 = vrcp.f32 %v1955_v51  ;;  %v2100_v56 = vand.u32 2147483648, %v1955_v51  ;;  %v2098_v2 = vand.u32 2147483647, %v1955_v51  ;;  %vm2094_vm1 = vweird.f32 %v1955_v51 }
 0x992   :  { %v2101_v23 = vor.u32 1.1754944e-38, %v2100_v56  ;;  %vm2099_vm3 = vcmp.eq.f32.partialorder %v2098_v2, 8.507059e+37 }
 0x996   :  { %v3152_v58 = vpop.eup %3151 }
 0x997   :  { %v2090_v21 = vmul.f32 %v3152_v58, %v1955_v51  ;;  %v1958_v8 = vpop.xlane.xlu0 %1957  ;;  %vm2095_vm15 = vweird.f32 %v3152_v58 }
 0x998   :  { %3153 = vrcp.f32 %v1958_v8  ;;  %vm2096_vm2 = vmor %vm2094_vm1, %vm2095_vm15  ;;  %v2114_v60 = vand.u32 2147483648, %v1958_v8  ;;  %v2112_v40 = vand.u32 2147483647, %v1958_v8  ;;  %vm2108_vm5 = vweird.f32 %v1958_v8 }
 0x999   :  { %v2091_v24 = vsub.f32 1.0, %v2090_v21  ;;  %v2925_v21 = vld [vmem:[%s4779_s14 + $0x38] sm:$0xff] }
 0x99a   :  { %v2115_v63 = vor.u32 1.1754944e-38, %v2114_v60  ;;  %vm2113_vm7 = vcmp.eq.f32.partialorder %v2112_v40, 8.507059e+37  ;;  %2387 = vmatpush.msra.mxu0 %v2925_v21 }
 0x99b   :  { %v2092_v42 = vmul.f32 %v3152_v58, %v2091_v24 }
 0x99d   :  { %v2093_v33 = vadd.f32 %v3152_v58, %v2092_v42 }
 0x99e   :  { %v3154_v31 = vpop.eup %3153 }
 0x99f   :  { %v2104_v57 = vmul.f32 %v3154_v31, %v1958_v8  ;;  %v1961_v41 = vpop.xlane.xlu1 %1960  ;;  %v2097_v48 = vsel %vm2096_vm2, %v3152_v58, %v2093_v33  ;;  %vm2109_vm4 = vweird.f32 %v3154_v31  ;;  %v2924_v8 = vld [vmem:[%s4779_s14 + $0x30] sm:$0xff] }
 0x9a0   :  { %3155 = vrcp.f32 %v1961_v41  ;;  %v2102_v44 = vsel %vm2099_vm3, %v2101_v23, %v2097_v48  ;;  %vm2110_vm6 = vmor %vm2108_vm5, %vm2109_vm4  ;;  %v2128_v14 = vand.u32 2147483648, %v1961_v41  ;;  %v2126_v52 = vand.u32 2147483647, %v1961_v41  ;;  %2388 = vmatpush.msra.mxu0 %v2924_v8  ;;  %v3245_v8 = vld [vmem:[%s4813_s27 + $0x40] sm:$0xff] }
 0x9a1   :  { %v2105_v54 = vsub.f32 1.0, %v2104_v57  ;;  %v2209_v62 = vmul.f32 %v4463_v45, %v2102_v44  ;;  %vm2122_vm9 = vweird.f32 %v1961_v41 }
 0x9a2   :  { %v2129_v9 = vor.u32 1.1754944e-38, %v2128_v14  ;;  %vm2127_vm11 = vcmp.eq.f32.partialorder %v2126_v52, 8.507059e+37 }
 0x9a3   :  { %v2106_v55 = vmul.f32 %v3154_v31, %v2105_v54  ;;  %2914 = vmatmul.msk.f32.gmra.mxu3 %vm132_vm0, %v2209_v62 }
 0x9a5   :  { %v2107_v17 = vadd.f32 %v3154_v31, %v2106_v55 }
 0x9a6   :  { %v3156_v20 = vpop.eup %3155 }
 0x9a7   :  { %v2118_v61 = vmul.f32 %v3156_v20, %v1961_v41  ;;  %v1964_v28 = vpop.xlane.xlu2 %1963  ;;  %v2111_v0 = vsel %vm2110_vm6, %v3154_v31, %v2107_v17  ;;  %vm2123_vm8 = vweird.f32 %v3156_v20 }
 0x9a8   :  { %3157 = vrcp.f32 %v1964_v28  ;;  %v2116_v13 = vsel %vm2113_vm7, %v2115_v63, %v2111_v0  ;;  %vm2124_vm10 = vmor %vm2122_vm9, %vm2123_vm8  ;;  %v2142_v19 = vand.u32 2147483648, %v1964_v28  ;;  %v2140_v49 = vand.u32 2147483647, %v1964_v28 }
 0x9a9   :  { %v2119_v18 = vsub.f32 1.0, %v2118_v61  ;;  %v2210_v45 = vmul.f32 %v4470_v6, %v2116_v13  ;;  %vm2136_vm13 = vweird.f32 %v1964_v28 }
 0x9aa   :  { %v2143_v35 = vor.u32 1.1754944e-38, %v2142_v19  ;;  %vm2141_vm15 = vcmp.eq.f32.partialorder %v2140_v49, 8.507059e+37 }
 0x9ab   :  { %v2120_v47 = vmul.f32 %v3156_v20, %v2119_v18  ;;  %2915 = vmatmul.msk.f32.gmra.mxu3 %vm132_vm0, %v2210_v45 }
 0x9ad   :  { %v2121_v16 = vadd.f32 %v3156_v20, %v2120_v47 }
 0x9ae   :  { %v3158_v53 = vpop.eup %3157 }
 0x9af   :  { %v2132_v22 = vmul.f32 %v3158_v53, %v1964_v28  ;;  %v1967_v32 = vpop.xlane.xlu0 %1966  ;;  %v2125_v5 = vsel %vm2124_vm10, %v3156_v20, %v2121_v16  ;;  %vm2137_vm12 = vweird.f32 %v3158_v53 }
 0x9b0   :  { %3159 = vrcp.f32 %v1967_v32  ;;  %v2130_v36 = vsel %vm2127_vm11, %v2129_v9, %v2125_v5  ;;  %vm2138_vm14 = vmor %vm2136_vm13, %vm2137_vm12  ;;  %v2156_v51 = vand.u32 2147483648, %v1967_v32  ;;  %v2154_v58 = vand.u32 2147483647, %v1967_v32 }
 0x9b1   :  { %v2133_v38 = vsub.f32 1.0, %v2132_v22  ;;  %v2211_v6 = vmul.f32 %v4477_v50, %v2130_v36  ;;  %vm2150_vm2 = vweird.f32 %v1967_v32 }
 0x9b2   :  { %v2157_v56 = vor.u32 1.1754944e-38, %v2156_v51  ;;  %vm2155_vm4 = vcmp.eq.f32.partialorder %v2154_v58, 8.507059e+37  ;;  %v3244_v58 = vld [vmem:[%s4813_s27] sm:$0xff] }
 0x9b3   :  { %v2134_v11 = vmul.f32 %v3158_v53, %v2133_v38  ;;  %2916 = vmatmul.msk.f32.gmra.mxu3 %vm132_vm0, %v2211_v6 }
 0x9b5   :  { %v2135_v39 = vadd.f32 %v3158_v53, %v2134_v11  ;;  %v2282_v11 = vpop.f32.mrf.mxu3 }
 0x9b6   :  { %v3160_v43 = vpop.eup %3159  ;;  %v2330_v21 = vmul.f32 %v3244_v58, %v2282_v11  ;;  %v3258_v11 = vld [vmem:[%s4813_s27 + $0x78] sm:$0xff] }
 0x9b7   :  { %v2146_v59 = vmul.f32 %v3160_v43, %v1967_v32  ;;  %v1970_v37 = vpop.xlane.xlu1 %1969  ;;  %v2139_v3 = vsel %vm2138_vm14, %v3158_v53, %v2135_v39  ;;  %vm2151_vm1 = vweird.f32 %v3160_v43 }
 0x9b8   :  { %3161 = vrcp.f32 %v1970_v37  ;;  %v2144_v25 = vsel %vm2141_vm15, %v2143_v35, %v2139_v3  ;;  %vm2152_vm3 = vmor %vm2150_vm2, %vm2151_vm1  ;;  %v2170_v54 = vand.u32 2147483648, %v1970_v37  ;;  %v2168_v44 = vand.u32 2147483647, %v1970_v37 }
 0x9b9   :  { %v2147_v4 = vsub.f32 1.0, %v2146_v59  ;;  %v2212_v50 = vmul.f32 %v4484_v34, %v2144_v25  ;;  %v2923_v34 = vld [vmem:[%s4779_s14 + $0x28] sm:$0xff]  ;;  %vm2164_vm6 = vweird.f32 %v1970_v37 }
 0x9ba   :  { %2389 = vmatpush.msra.mxu0 %v2923_v34  ;;  %v2171_v60 = vor.u32 1.1754944e-38, %v2170_v54  ;;  %vm2169_vm8 = vcmp.eq.f32.partialorder %v2168_v44, 8.507059e+37  ;;  %v3249_v54 = vld [vmem:[%s4813_s27 + $0x48] sm:$0xff] }
 0x9bb   :  { %v2148_v10 = vmul.f32 %v3160_v43, %v2147_v4  ;;  %2917 = vmatmul.msk.f32.gmra.mxu3 %vm132_vm0, %v2212_v50 }
 0x9bd   :  { %v2149_v24 = vadd.f32 %v3160_v43, %v2148_v10  ;;  %v2285_v49 = vpop.f32.mrf.mxu3 }
 0x9be   :  { %v3162_v42 = vpop.eup %3161 }
 0x9bf   :  { %v2160_v2 = vmul.f32 %v3162_v42, %v1970_v37  ;;  %v1973_v33 = vpop.xlane.xlu2 %1972  ;;  %v2153_v31 = vsel %vm2152_vm3, %v3160_v43, %v2149_v24  ;;  %vm2165_vm5 = vweird.f32 %v3162_v42  ;;  %v2922_v37 = vld [vmem:[%s4779_s14 + $0x20] sm:$0xff] }
 0x9c0   :  { %3163 = vrcp.f32 %v1973_v33  ;;  %v2158_v57 = vsel %vm2155_vm4, %v2157_v56, %v2153_v31  ;;  %vm2166_vm7 = vmor %vm2164_vm6, %vm2165_vm5  ;;  %v2184_v28 = vand.u32 2147483648, %v1973_v33  ;;  %v2182_v18 = vand.u32 2147483647, %v1973_v33  ;;  %2390 = vmatpush.msra.mxu0 %v2922_v37  ;;  %v3247_v31 = vld [vmem:[%s4813_s27 + $0x28] sm:$0xff] }
 0x9c1   :  { %v2161_v23 = vsub.f32 1.0, %v2160_v2  ;;  %v2213_v41 = vmul.f32 %v4491_v27, %v2158_v57  ;;  %vm2178_vm10 = vweird.f32 %v1973_v33  ;;  %v3246_v2 = vld [vmem:[%s4813_s27 + $0x60] sm:$0xff] }
 0x9c2   :  { %v2185_v47 = vor.u32 1.1754944e-38, %v2184_v28  ;;  %vm2183_vm12 = vcmp.eq.f32.partialorder %v2182_v18, 8.507059e+37  ;;  %v3252_v28 = vld [vmem:[%s4813_s27 + $0x10] sm:$0xff] }
 0x9c3   :  { %v2162_v48 = vmul.f32 %v3162_v42, %v2161_v23  ;;  %2918 = vmatmul.msk.f32.gmra.mxu3 %vm132_vm0, %v2213_v41  ;;  %v3248_v41 = vld [vmem:[%s4813_s27 + $0x8] sm:$0xff] }
 0x9c5   :  { %v2163_v62 = vadd.f32 %v3162_v42, %v2162_v48  ;;  %v2331_v48 = vmul.f32 %v3248_v41, %v2285_v49 }
 0x9c6   :  { %v3164_v55 = vpop.eup %3163 }
 0x9c7   :  { %v2174_v40 = vmul.f32 %v3164_v55, %v1973_v33  ;;  %v1976_v17 = vpop.xlane.xlu0 %1975  ;;  %v2167_v20 = vsel %vm2166_vm7, %v3162_v42, %v2163_v62  ;;  %vm2179_vm9 = vweird.f32 %v3164_v55 }
 0x9c8   :  { %3165 = vrcp.f32 %v1976_v17  ;;  %v2172_v61 = vsel %vm2169_vm8, %v2171_v60, %v2167_v20  ;;  %vm2180_vm11 = vmor %vm2178_vm10, %vm2179_vm9  ;;  %v2198_v22 = vand.u32 2147483648, %v1976_v17  ;;  %vm2192_vm14 = vweird.f32 %v1976_v17  ;;  %v3251_v20 = vld [vmem:[%s4813_s27 + $0x30] sm:$0xff] }
 0x9c9   :  { %v2175_v63 = vsub.f32 1.0, %v2174_v40  ;;  %v2214_v27 = vmul.f32 %v4498_v7, %v2172_v61  ;;  %v2196_v7 = vand.u32 2147483647, %v1976_v17  ;;  %v3250_v40 = vld [vmem:[%s4813_s27 + $0x68] sm:$0xff] }
 0x9ca   :  { %v2199_v38 = vor.u32 1.1754944e-38, %v2198_v22  ;;  %v3256_v22 = vld [vmem:[%s4813_s27 + $0x18] sm:$0xff] }
 0x9cb   :  { %v2176_v0 = vmul.f32 %v3164_v55, %v2175_v63  ;;  %2919 = vmatmul.msk.f32.gmra.mxu3 %vm132_vm0, %v2214_v27  ;;  %vm2197_vm1 = vcmp.eq.f32.partialorder %v2196_v7, 8.507059e+37  ;;  %v3257_v7 = vld [vmem:[%s4813_s27 + $0x58] sm:$0xff] }
 0x9cd   :  { %v2177_v13 = vadd.f32 %v3164_v55, %v2176_v0  ;;  %v3253_v0 = vld [vmem:[%s4813_s27 + $0x50] sm:$0xff] }
 0x9ce   :  { %v3166_v45 = vpop.eup %3165 }
 0x9cf   :  { %v2188_v14 = vmul.f32 %v3166_v45, %v1976_v17  ;;  %v2181_v52 = vsel %vm2180_vm11, %v3164_v55, %v2177_v13  ;;  %vm2193_vm13 = vweird.f32 %v3166_v45 }
 0x9d0   :  { %v2186_v16 = vsel %vm2183_vm12, %v2185_v47, %v2181_v52  ;;  %vm2194_vm15 = vmor %vm2192_vm14, %vm2193_vm13 }
 0x9d1   :  { %v2189_v53 = vsub.f32 1.0, %v2188_v14  ;;  %v2215_v9 = vmul.f32 %v4506_v1, %v2186_v16  ;;  %v2288_v1 = vpop.f32.mrf.mxu3  ;;  %v3254_v14 = vld [vmem:[%s4813_s27 + $0x70] sm:$0xff]  ;;  %v3255_v16 = vld [vmem:[%s4813_s27 + $0x38] sm:$0xff] }
 0x9d2   :  { %v2332_v27 = vmul.f32 %v3252_v28, %v2288_v1  ;;  %v2993_v1 = vld [vmem:[%s4780_s15 + $0x1] ss:$0 sm:$0xff] }
 0x9d3   :  { %v2190_v32 = vmul.f32 %v3166_v45, %v2189_v53  ;;  %2920 = vmatmul.msk.f32.gmra.mxu3 %vm132_vm0, %v2215_v9 }
 0x9d5   :  { %v2191_v5 = vadd.f32 %v3166_v45, %v2190_v32 }
 0x9d7   :  { %v2195_v36 = vsel %vm2194_vm15, %v3166_v45, %v2191_v5 }
 0x9d8   :  { %v2200_v6 = vsel %vm2197_vm1, %v2199_v38, %v2195_v36 }
 0x9d9   :  { %v2216_v19 = vmul.f32 %v4512_v12, %v2200_v6  ;;  %v2291_v39 = vpop.f32.mrf.mxu3  ;;  %v3243_v12 = vld [vmem:[%s4813_s27 + $0x20] sm:$0xff] }
 0x9da   :  { %v2333_v32 = vmul.f32 %v3256_v22, %v2291_v39 }
 0x9db   :  { %2921 = vmatmul.msk.f32.gmra.mxu3 %vm132_vm0, %v2216_v19 }
 0x9e1   :  { %v2294_v43 = vpop.f32.mrf.mxu3 }
 0x9e2   :  { %v2334_v51 = vmul.f32 %v3243_v12, %v2294_v43 }
 0x9e4   :  { %v2346_v42 = vadd.f32 %v2334_v51, %v2330_v21 }
 0x9e9   :  { %v2297_v35 = vpop.f32.mrf.mxu3 }
 0x9ea   :  { %v2335_v23 = vmul.f32 %v3247_v31, %v2297_v35  ;;  %v2935_v31 = vld [vmem:[%s4782_s17 + $0x58] sm:$0xff] }
 0x9ec   :  { %v2347_v62 = vadd.f32 %v2335_v23, %v2331_v48  ;;  %v2932_v23 = vld [vmem:[%s4782_s17 + $0x40] sm:$0xff] }
 0x9f1   :  { %v2300_v59 = vpop.f32.mrf.mxu3 }
 0x9f2   :  { %v2336_v63 = vmul.f32 %v3251_v20, %v2300_v59 }
 0x9f4   :  { %v2348_v13 = vadd.f32 %v2336_v63, %v2332_v27 }
 0x9f9   :  { %v2303_v3 = vpop.f32.mrf.mxu3 }
 0x9fa   :  { %v2337_v53 = vmul.f32 %v3255_v16, %v2303_v3 }
 0x9fc   :  { %v2349_v38 = vadd.f32 %v2337_v53, %v2333_v32 }
 0xa26   :  { %v2306_v4 = vpop.f32.mrf.mxu3 }
 0xa27   :  { %v2338_v24 = vmul.f32 %v3245_v8, %v2306_v4 }
 0xa29   :  { %v2350_v56 = vadd.f32 %v2346_v42, %v2338_v24 }
 0xa2e   :  { %v2309_v25 = vpop.f32.mrf.mxu3 }
 0xa2f   :  { %v2339_v44 = vmul.f32 %v3249_v54, %v2309_v25 }
 0xa31   :  { %v2351_v60 = vadd.f32 %v2347_v62, %v2339_v44 }
 0xa36   :  { %v2312_v50 = vpop.f32.mrf.mxu3 }
 0xa37   :  { %v2340_v18 = vmul.f32 %v3253_v0, %v2312_v50 }
 0xa39   :  { %v2352_v47 = vadd.f32 %v2348_v13, %v2340_v18 }
 0xa3e   :  { %v2315_v10 = vpop.f32.mrf.mxu3 }
 0xa3f   :  { %v2341_v5 = vmul.f32 %v3257_v7, %v2315_v10 }
 0xa41   :  { %v2353_v6 = vadd.f32 %v2349_v38, %v2341_v5 }
 0xa46   :  { %v2318_v34 = vpop.f32.mrf.mxu3 }
 0xa47   :  { %v2342_v33 = vmul.f32 %v3246_v2, %v2318_v34  ;;  %v2936_v2 = vld [vmem:[%s4782_s17 + $0x60] sm:$0xff] }
 0xa49   :  { %v2354_v57 = vadd.f32 %v2350_v56, %v2342_v33  ;;  %v2938_v56 = vld [vmem:[%s4782_s17 + $0x70] sm:$0xff] }
 0xa4a   :  { %2534 = vmatpush.msra.mxu1 %v2938_v56  ;;  %v2934_v33 = vld [vmem:[%s4782_s17 + $0x50] sm:$0xff]  ;;  %v2964_v56 = vld [vmem:[%s4784_s19 + $0xd8] sm:$0xff] }
 0xa4b   :  { %2926 = vmatmul.msk.f32.vlgmr.msra.gmra.mxu0 %vm132_vm0, %v2354_v57  ;;  %v2933_v57 = vld [vmem:[%s4782_s17 + $0x48] sm:$0xff] }
 0xa4c   :  { %2535 = vmatpush.msra.mxu1 %v2936_v2  ;;  %v2962_v2 = vld [vmem:[%s4784_s19 + $0xc8] sm:$0xff] }
 0xa4e   :  { %v2321_v55 = vpop.f32.mrf.mxu3  ;;  %2536 = vmatpush.msra.mxu1 %v2934_v33  ;;  %v2961_v33 = vld [vmem:[%s4784_s19 + $0xc0] sm:$0xff] }
 0xa4f   :  { %v2343_v17 = vmul.f32 %v3250_v40, %v2321_v55 }
 0xa50   :  { %2537 = vmatpush.msra.mxu1 %v2932_v23  ;;  %v2959_v23 = vld [vmem:[%s4784_s19 + $0xb0] sm:$0xff] }
 0xa51   :  { %v2355_v61 = vadd.f32 %v2351_v60, %v2343_v17 }
 0xa53   :  { %2927 = vmatmul.msk.f32.gmra.mxu0 %vm132_vm0, %v2355_v61 }
 0xa56   :  { %v2324_v45 = vpop.f32.mrf.mxu3 }
 0xa57   :  { %v2344_v52 = vmul.f32 %v3254_v14, %v2324_v45  ;;  %v2994_v45 = vld [vmem:[%s4781_s16 + $0x1] ss:$0 sm:$0xff] }
 0xa59   :  { %v2356_v9 = vadd.f32 %v2352_v47, %v2344_v52 }
 0xa5b   :  { %2928 = vmatmul.msk.f32.gmra.mxu0 %vm132_vm0, %v2356_v9 }
 0xa5e   :  { %v2327_v36 = vpop.f32.mrf.mxu3 }
 0xa5f   :  { %v2345_v19 = vmul.f32 %v3258_v11, %v2327_v36 }
 0xa61   :  { %v2357_v49 = vadd.f32 %v2353_v6, %v2345_v19 }
 0xa63   :  { %2929 = vmatmul.msk.f32.gmra.mxu0 %vm132_vm0, %v2357_v49 }
 0xac8   :  { %v2392_v39 = vpop.f32.mrf.mxu0 }
 0xac9   :  { %v2404_v43 = vadd.f32 %v2392_v39, %v4129_v46 }
 0xacb   :  { %v4601_v35 = vadd.f32 %v2993_v1, %v2404_v43 }
 0xacd   :  { %v2419_v59 = vmul.f32 %v4601_v35, %v4601_v35 }
 0xacf   :  { %v2423_v37 = vsel %vm132_vm0, %v2419_v59, 0.0 }
 0xad0   :  { %2424 = vadd.xlane.f32.xlu1 %v2423_v37  ;;  %v2395_v3 = vpop.f32.mrf.mxu0 }
 0xad1   :  { %v2405_v4 = vadd.f32 %v2395_v3, %v4135_v29 }
 0xad3   :  { %v4607_v25 = vadd.f32 %v2993_v1, %v2405_v4 }
 0xad5   :  { %v2420_v50 = vmul.f32 %v4607_v25, %v4607_v25 }
 0xad7   :  { %v2426_v10 = vsel %vm132_vm0, %v2420_v50, 0.0 }
 0xad8   :  { %2427 = vadd.xlane.f32.xlu2 %v2426_v10  ;;  %v2398_v46 = vpop.f32.mrf.mxu0 }
 0xad9   :  { %v2406_v12 = vadd.f32 %v2398_v46, %v4141_v15  ;;  %v2939_v15 = vld [vmem:[%s4782_s17 + $0x78] sm:$0xff] }
 0xada   :  { %2563 = vmatpush.msrb.mxu0 %v2939_v15  ;;  %v2965_v15 = vld [vmem:[%s4784_s19 + $0xe0] sm:$0xff] }
 0xadb   :  { %v4613_v51 = vadd.f32 %v2993_v1, %v2406_v12 }
 0xadd   :  { %v2421_v58 = vmul.f32 %v4613_v51, %v4613_v51 }
 0xadf   :  { %v2429_v21 = vsel %vm132_vm0, %v2421_v58, 0.0 }
 0xae0   :  { %2430 = vadd.xlane.f32.xlu0 %v2429_v21  ;;  %v2401_v29 = vpop.f32.mrf.mxu0 }
 0xae1   :  { %v2407_v8 = vadd.f32 %v2401_v29, %v4147_v26  ;;  %v2937_v26 = vld [vmem:[%s4782_s17 + $0x68] sm:$0xff] }
 0xae2   :  { %2564 = vmatpush.msrb.mxu0 %v2937_v26  ;;  %v2963_v26 = vld [vmem:[%s4784_s19 + $0xd0] sm:$0xff] }
 0xae3   :  { %v4619_v24 = vadd.f32 %v2993_v1, %v2407_v8  ;;  %v2968_v8 = vld [vmem:[%s4784_s19 + $0xf8] sm:$0xff] }
 0xae4   :  { %2565 = vmatpush.msrb.mxu0 %v2935_v31  ;;  %2681 = vmatpush.msrb.mxu1 %v2968_v8  ;;  %v2960_v31 = vld [vmem:[%s4784_s19 + $0xb8] sm:$0xff] }
 0xae5   :  { %v2422_v42 = vmul.f32 %v4619_v24, %v4619_v24 }
 0xae6   :  { %2566 = vmatpush.msrb.mxu0 %v2933_v57  ;;  %v2958_v57 = vld [vmem:[%s4784_s19 + $0xa8] sm:$0xff] }
 0xae7   :  { %v2432_v34 = vsel %vm132_vm0, %v2422_v42, 0.0  ;;  %v2967_v42 = vld [vmem:[%s4784_s19 + $0xf0] sm:$0xff] }
 0xae8   :  { %2433 = vadd.xlane.f32.xlu1 %v2432_v34  ;;  %2682 = vmatpush.msrb.mxu1 %v2967_v42  ;;  %v2966_v34 = vld [vmem:[%s4784_s19 + $0xe8] sm:$0xff] }
 0xaea   :  { %2683 = vmatpush.msrb.mxu1 %v2966_v34 }
 0xaec   :  { %2684 = vmatpush.msrb.mxu1 %v2965_v15 }
 0xaee   :  { %2685 = vmatpush.msrb.mxu1 %v2964_v56 }
 0xaf0   :  { %2686 = vmatpush.msrb.mxu1 %v2963_v26 }
 0xaf2   :  { %2687 = vmatpush.msrb.mxu1 %v2962_v2 }
 0xaf4   :  { %2688 = vmatpush.msrb.mxu1 %v2961_v33 }
 0xaf6   :  { %2689 = vmatpush.msrb.mxu1 %v2960_v31 }
 0xaf8   :  { %2690 = vmatpush.msrb.mxu1 %v2959_v23 }
 0xafa   :  { %2691 = vmatpush.msrb.mxu1 %v2958_v57 }
 0xb43   :  { %v2425_v41 = vpop.xlane.xlu1 %2424 }
 0xb44   :  { %v2435_v48 = vmul.f32 %v2425_v41, %v3477_v30  ;;  %v2940_v41 = vld [vmem:[%s4783_s18 + $0x2] sm:$0x3] }
 0xb46   :  { %v2439_v54 = vadd.f32 1.1920929e-07, %v2435_v48  ;;  %v2957_v48 = vld [vmem:[%s4784_s19 + $0xa0] sm:$0xff] }
 0xb47   :  { %2692 = vmatpush.msrb.mxu1 %v2957_v48 }
 0xb48   :  { %3167 = vrsqrt.f32 %v2439_v54  ;;  %vm2449_vm3 = vweird.f32 %v2439_v54 }
 0xb4b   :  { %v2428_v44 = vpop.xlane.xlu2 %2427 }
 0xb4c   :  { %v2436_v62 = vmul.f32 %v2428_v44, %v3477_v30  ;;  %v2507_v44 = vperm.slane %v2940_v41, 1 }
 0xb4e   :  { %v3168_v55 = vpop.eup %3167  ;;  %v2440_v60 = vadd.f32 1.1920929e-07, %v2436_v62  ;;  %v2955_v62 = vld [vmem:[%s4784_s19 + $0x90] sm:$0xff] }
 0xb4f   :  { %v2444_v40 = vmul.f32 %v3168_v55, %v2439_v54  ;;  %vm2450_vm2 = vweird.f32 %v3168_v55  ;;  %v2956_v54 = vld [vmem:[%s4784_s19 + $0x98] sm:$0xff] }
 0xb50   :  { %3169 = vrsqrt.f32 %v2440_v60  ;;  %vm2451_vm4 = vmor %vm2449_vm3, %vm2450_vm2  ;;  %vm2459_vm6 = vweird.f32 %v2440_v60  ;;  %2693 = vmatpush.msrb.mxu1 %v2956_v54 }
 0xb51   :  { %v2445_v17 = vmul.f32 %v3168_v55, %v2444_v40 }
 0xb52   :  { %2694 = vmatpush.msrb.mxu1 %v2955_v62 }
 0xb53   :  { %v2446_v20 = vmul.f32 0.5, %v2445_v17  ;;  %v2431_v63 = vpop.xlane.xlu0 %2430  ;;  %v2953_v17 = vld [vmem:[%s4784_s19 + $0x80] sm:$0xff] }
 0xb54   :  { %v2437_v61 = vmul.f32 %v2431_v63, %v3477_v30 }
 0xb55   :  { %v2447_v28 = vsub.f32 1.5, %v2446_v20 }
 0xb56   :  { %v3170_v27 = vpop.eup %3169  ;;  %v2441_v0 = vadd.f32 1.1920929e-07, %v2437_v61 }
 0xb57   :  { %v2448_v18 = vmul.f32 %v3168_v55, %v2447_v28  ;;  %v2454_v13 = vmul.f32 %v3170_v27, %v2440_v60  ;;  %vm2460_vm5 = vweird.f32 %v3170_v27  ;;  %v2954_v60 = vld [vmem:[%s4784_s19 + $0x88] sm:$0xff] }
 0xb58   :  { %3171 = vrsqrt.f32 %v2441_v0  ;;  %vm2461_vm7 = vmor %vm2459_vm6, %vm2460_vm5  ;;  %vm2469_vm9 = vweird.f32 %v2441_v0  ;;  %2695 = vmatpush.msrb.mxu1 %v2954_v60 }
 0xb59   :  { %v2452_v47 = vsel %vm2451_vm4, %v3168_v55, %v2448_v18  ;;  %v2455_v14 = vmul.f32 %v3170_v27, %v2454_v13 }
 0xb5a   :  { %v2483_v52 = vmul.f32 %v2452_v47, %v4601_v35  ;;  %2696 = vmatpush.msrb.mxu1 %v2953_v17 }
 0xb5b   :  { %v2456_v16 = vmul.f32 0.5, %v2455_v14  ;;  %v2434_v53 = vpop.xlane.xlu1 %2433 }
 0xb5c   :  { %v2490_v9 = vmul.f32 %v2994_v45, %v2483_v52  ;;  %v2438_v22 = vmul.f32 %v2434_v53, %v3477_v30 }
 0xb5d   :  { %v2457_v32 = vsub.f32 1.5, %v2456_v16 }
 0xb5e   :  { %v3172_v7 = vpop.eup %3171  ;;  %v2442_v5 = vadd.f32 1.1920929e-07, %v2438_v22  ;;  %2941 = vmatmul.msk.f32.vlgmr.msra.gmra.mxu1 %vm132_vm0, %v2490_v9  ;;  %2945 = vmatmul.msk.f32.vlgmr.msrb.gmra.mxu0 %vm132_vm0, %v2490_v9 }
 0xb5f   :  { %v2458_v38 = vmul.f32 %v3170_v27, %v2457_v32  ;;  %v2464_v36 = vmul.f32 %v3172_v7, %v2441_v0  ;;  %vm2470_vm8 = vweird.f32 %v3172_v7 }
 0xb60   :  { %3173 = vrsqrt.f32 %v2442_v5  ;;  %vm2471_vm10 = vmor %vm2469_vm9, %vm2470_vm8  ;;  %vm2479_vm12 = vweird.f32 %v2442_v5 }
 0xb61   :  { %v2465_v6 = vmul.f32 %v3172_v7, %v2464_v36  ;;  %v2462_v11 = vsel %vm2461_vm7, %v3170_v27, %v2458_v38 }
 0xb62   :  { %v2484_v19 = vmul.f32 %v2462_v11, %v4607_v25 }
 0xb63   :  { %v2466_v49 = vmul.f32 0.5, %v2465_v6  ;;  %v4726_v6 = vperm.slane %v2940_v41, 0 }
 0xb64   :  { %v2491_v1 = vmul.f32 %v2994_v45, %v2484_v19 }
 0xb65   :  { %v2467_v30 = vsub.f32 1.5, %v2466_v49  ;;  %v2726_v49 = vld [vmem:[%s4786_s21 + $0x18] sm:$0xff] }
 0xb66   :  { %v3174_v39 = vpop.eup %3173  ;;  %2942 = vmatmul.msk.f32.gmra.mxu1 %vm132_vm0, %v2491_v1  ;;  %2946 = vmatmul.msk.f32.gmra.mxu0 %vm132_vm0, %v2491_v1  ;;  %v2725_v1 = vld [vmem:[%s4786_s21 + $0x10] sm:$0xff] }
 0xb67   :  { %v2468_v43 = vmul.f32 %v3172_v7, %v2467_v30  ;;  %v2474_v59 = vmul.f32 %v3174_v39, %v2442_v5  ;;  %vm2480_vm11 = vweird.f32 %v3174_v39  ;;  %2755 = vmatpush.msra.mxu0 %v2726_v49 }
 0xb68   :  { %vm2481_vm13 = vmor %vm2479_vm12, %vm2480_vm11 }
 0xb69   :  { %v2475_v37 = vmul.f32 %v3174_v39, %v2474_v59  ;;  %v2472_v3 = vsel %vm2471_vm10, %v3172_v7, %v2468_v43  ;;  %2756 = vmatpush.msra.mxu0 %v2725_v1 }
 0xb6a   :  { %v2485_v4 = vmul.f32 %v2472_v3, %v4613_v51 }
 0xb6b   :  { %v2476_v50 = vmul.f32 0.5, %v2475_v37 }
 0xb6c   :  { %v2492_v10 = vmul.f32 %v2994_v45, %v2485_v4 }
 0xb6d   :  { %v2477_v46 = vsub.f32 1.5, %v2476_v50 }
 0xb6e   :  { %2943 = vmatmul.msk.f32.gmra.mxu1 %vm132_vm0, %v2492_v10  ;;  %2947 = vmatmul.msk.f32.gmra.mxu0 %vm132_vm0, %v2492_v10 }
 0xb6f   :  { %v2478_v12 = vmul.f32 %v3174_v39, %v2477_v46 }
 0xb71   :  { %v2482_v58 = vsel %vm2481_vm13, %v3174_v39, %v2478_v12 }
 0xb72   :  { %v2486_v21 = vmul.f32 %v2482_v58, %v4619_v24 }
 0xb74   :  { %v2493_v29 = vmul.f32 %v2994_v45, %v2486_v21 }
 0xb76   :  { %2944 = vmatmul.msk.f32.gmra.mxu1 %vm132_vm0, %v2493_v29  ;;  %2948 = vmatmul.msk.f32.gmra.mxu0 %vm132_vm0, %v2493_v29 }
 0xbdb   :  { %v2568_v55 = vpop.f32.mrf.mxu0  ;;  %v2539_v53 = vpop.f32.mrf.mxu1 }
 0xbdc   :  { %v2569_v40 = vadd.f32 %v2568_v55, %v2507_v44  ;;  %v2540_v4 = vadd.f32 %v2539_v53, %v4726_v6 }
 0xbde   :  { %v2949_v20 = vmul.f32 -1.442695, %v2569_v40 }
 0xbe0   :  { %3175 = vpow2.f32 %v2949_v20 }
 0xbe3   :  { %v2571_v63 = vpop.f32.mrf.mxu0  ;;  %v2542_v46 = vpop.f32.mrf.mxu1 }
 0xbe4   :  { %v4718_v61 = vadd.f32 %v2571_v63, %v2507_v44  ;;  %v2543_v31 = vadd.f32 %v2542_v46, %v4726_v6 }
 0xbe6   :  { %v3176_v28 = vpop.eup %3175  ;;  %v2950_v27 = vmul.f32 -1.442695, %v4718_v61 }
 0xbe7   :  { %v2592_v0 = vadd.f32 1.0, %v3176_v28 }
 0xbe8   :  { %3177 = vpow2.f32 %v2950_v27 }
 0xbe9   :  { %3179 = vrcp.f32 %v2592_v0  ;;  %v2607_v22 = vand.u32 2147483648, %v2592_v0  ;;  %v2605_v5 = vand.u32 2147483647, %v2592_v0  ;;  %vm2601_vm15 = vweird.f32 %v2592_v0 }
 0xbeb   :  { %v2574_v18 = vpop.f32.mrf.mxu0  ;;  %v2608_v39 = vor.u32 1.1754944e-38, %v2607_v22  ;;  %vm2606_vm2 = vcmp.eq.f32.partialorder %v2605_v5, 8.507059e+37  ;;  %v2545_v62 = vpop.f32.mrf.mxu1  ;;  %v2723_v5 = vld [vmem:[%s4786_s21] sm:$0xff] }
 0xbec   :  { %v4721_v13 = vadd.f32 %v2574_v18, %v2507_v44  ;;  %v2546_v28 = vadd.f32 %v2545_v62, %v4726_v6 }
 0xbee   :  { %v3178_v45 = vpop.eup %3177  ;;  %v2951_v47 = vmul.f32 -1.442695, %v4721_v13 }
 0xbef   :  { %v3180_v14 = vpop.eup %3179  ;;  %v2593_v52 = vadd.f32 1.0, %v3178_v45 }
 0xbf0   :  { %v2597_v16 = vmul.f32 %v3180_v14, %v2592_v0  ;;  %3181 = vpow2.f32 %v2951_v47  ;;  %vm2602_vm14 = vweird.f32 %v3180_v14 }
 0xbf1   :  { %3183 = vrcp.f32 %v2593_v52  ;;  %vm2603_vm1 = vmor %vm2601_vm15, %vm2602_vm14  ;;  %v2622_v12 = vand.u32 2147483648, %v2593_v52  ;;  %v2620_v29 = vand.u32 2147483647, %v2593_v52  ;;  %vm2616_vm4 = vweird.f32 %v2593_v52 }
 0xbf2   :  { %v2598_v9 = vsub.f32 1.0, %v2597_v16 }
 0xbf3   :  { %v2577_v32 = vpop.f32.mrf.mxu0  ;;  %v2623_v15 = vor.u32 1.1754944e-38, %v2622_v12  ;;  %vm2621_vm6 = vcmp.eq.f32.partialorder %v2620_v29, 8.507059e+37 }
 0xbf4   :  { %v2599_v7 = vmul.f32 %v3180_v14, %v2598_v9  ;;  %v4724_v38 = vadd.f32 %v2577_v32, %v2507_v44 }
 0xbf6   :  { %v3182_v36 = vpop.eup %3181  ;;  %v2600_v11 = vadd.f32 %v3180_v14, %v2599_v7  ;;  %v2952_v19 = vmul.f32 -1.442695, %v4724_v38  ;;  %v2724_v7 = vld [vmem:[%s4786_s21 + $0x8] sm:$0xff] }
 0xbf7   :  { %v3184_v30 = vpop.eup %3183  ;;  %v2594_v43 = vadd.f32 1.0, %v3182_v36  ;;  %2757 = vmatpush.msra.mxu0 %v2724_v7  ;;  %v2995_v36 = vld [vmem:[%s4785_s20 + $0x1] ss:$0 sm:$0xff] }
 0xbf8   :  { %v2604_v59 = vsel %vm2603_vm1, %v3180_v14, %v2600_v11  ;;  %v2612_v37 = vmul.f32 %v3184_v30, %v2593_v52  ;;  %3185 = vpow2.f32 %v2952_v19  ;;  %vm2617_vm3 = vweird.f32 %v3184_v30  ;;  %v2548_v52 = vpop.f32.mrf.mxu1 }
 0xbf9   :  { %v2609_v3 = vsel %vm2606_vm2, %v2608_v39, %v2604_v59  ;;  %3187 = vrcp.f32 %v2594_v43  ;;  %vm2618_vm5 = vmor %vm2616_vm4, %vm2617_vm3  ;;  %v2637_v41 = vand.u32 2147483648, %v2594_v43  ;;  %v2635_v54 = vand.u32 2147483647, %v2594_v43  ;;  %2758 = vmatpush.msra.mxu0 %v2723_v5 }
 0xbfa   :  { %v2656_v50 = vmul.f32 %v2609_v3, %v2569_v40  ;;  %v2613_v10 = vsub.f32 1.0, %v2612_v37  ;;  %vm2631_vm8 = vweird.f32 %v2594_v43  ;;  %v2549_v22 = vadd.f32 %v2548_v52, %v4726_v6 }
 0xbfb   :  { %v2638_v40 = vor.u32 1.1754944e-38, %v2637_v41  ;;  %vm2636_vm10 = vcmp.eq.f32.partialorder %v2635_v54, 8.507059e+37 }
 0xbfc   :  { %v2660_v58 = vmul.f32 %v2656_v50, %v2540_v4  ;;  %v2614_v21 = vmul.f32 %v3184_v30, %v2613_v10 }
 0xbfe   :  { %v3186_v8 = vpop.eup %3185  ;;  %v2615_v42 = vadd.f32 %v3184_v30, %v2614_v21  ;;  %2697 = vmatmul.f32.vlgmr.msrb.gmra.mxu1 %v2660_v58 }
 0xbff   :  { %v3188_v34 = vpop.eup %3187  ;;  %v2595_v56 = vadd.f32 1.0, %v3186_v8 }
 0xc00   :  { %v2619_v26 = vsel %vm2618_vm5, %v3184_v30, %v2615_v42  ;;  %v2627_v2 = vmul.f32 %v3188_v34, %v2594_v43  ;;  %vm2632_vm7 = vweird.f32 %v3188_v34 }
 0xc01   :  { %v2624_v33 = vsel %vm2621_vm6, %v2623_v15, %v2619_v26  ;;  %3189 = vrcp.f32 %v2595_v56  ;;  %vm2633_vm9 = vmor %vm2631_vm8, %vm2632_vm7  ;;  %v2652_v0 = vand.u32 2147483648, %v2595_v56  ;;  %v2650_v45 = vand.u32 2147483647, %v2595_v56 }
 0xc02   :  { %v2657_v23 = vmul.f32 %v2624_v33, %v4718_v61  ;;  %v2628_v57 = vsub.f32 1.0, %v2627_v2  ;;  %vm2646_vm12 = vweird.f32 %v2595_v56 }
 0xc03   :  { %v2653_v16 = vor.u32 1.1754944e-38, %v2652_v0  ;;  %vm2651_vm14 = vcmp.eq.f32.partialorder %v2650_v45, 8.507059e+37 }
 0xc04   :  { %v2629_v48 = vmul.f32 %v3188_v34, %v2628_v57  ;;  %v2661_v44 = vmul.f32 %v2657_v23, %v2543_v31 }
 0xc06   :  { %v2630_v55 = vadd.f32 %v3188_v34, %v2629_v48  ;;  %2700 = vmatmul.f32.gmra.mxu1 %v2661_v44 }
 0xc07   :  { %v3190_v60 = vpop.eup %3189 }
 0xc08   :  { %v2634_v17 = vsel %vm2633_vm9, %v3188_v34, %v2630_v55  ;;  %v2642_v20 = vmul.f32 %v3190_v60, %v2595_v56  ;;  %vm2647_vm11 = vweird.f32 %v3190_v60 }
 0xc09   :  { %v2639_v63 = vsel %vm2636_vm10, %v2638_v40, %v2634_v17  ;;  %vm2648_vm13 = vmor %vm2646_vm12, %vm2647_vm11 }
 0xc0a   :  { %v2658_v61 = vmul.f32 %v2639_v63, %v4721_v13  ;;  %v2643_v27 = vsub.f32 1.0, %v2642_v20 }
 0xc0c   :  { %v2644_v18 = vmul.f32 %v3190_v60, %v2643_v27  ;;  %v2662_v47 = vmul.f32 %v2658_v61, %v2546_v28 }
 0xc0e   :  { %v2645_v14 = vadd.f32 %v3190_v60, %v2644_v18  ;;  %2703 = vmatmul.f32.gmra.mxu1 %v2662_v47 }
 0xc10   :  { %v2649_v53 = vsel %vm2648_vm13, %v3190_v60, %v2645_v14 }
 0xc11   :  { %v2654_v9 = vsel %vm2651_vm14, %v2653_v16, %v2649_v53 }
 0xc12   :  { %v2659_v32 = vmul.f32 %v2654_v9, %v4724_v38 }
 0xc14   :  { %v2663_v13 = vmul.f32 %v2659_v32, %v2549_v22 }
 0xc16   :  { %2706 = vmatmul.f32.gmra.mxu1 %v2663_v13 }
 0xc7b   :  { %v2698_v11 = vpop.f32.mrf.mxu1 }
 0xc7c   :  { %v2710_v6 = vadd.f32 %v2698_v11, %v4601_v35  ;;  %v2996_v35 = vld [vmem:[%s4815_s7] ss:$0 sm:$0xff] }
 0xc7e   :  { %v2719_v38 = vadd.f32 %v2995_v36, %v2710_v6 }
 0xc80   :  { %2970 = vmatmul.msk.f32.vlgmr.msra.gmra.mxu0 %vm132_vm0, %v2719_v38 }
 0xc83   :  { %v2701_v19 = vpop.f32.mrf.mxu1 }
 0xc84   :  { %v2711_v49 = vadd.f32 %v2701_v19, %v4607_v25 }
 0xc86   :  { %v2720_v1 = vadd.f32 %v2995_v36, %v2711_v49 }
 0xc88   :  { %2971 = vmatmul.msk.f32.gmra.mxu0 %vm132_vm0, %v2720_v1 }
 0xc8b   :  { %v2704_v30 = vpop.f32.mrf.mxu1 }
 0xc8c   :  { %v2712_v39 = vadd.f32 %v2704_v30, %v4613_v51 }
 0xc8e   :  { %v2721_v43 = vadd.f32 %v2995_v36, %v2712_v39 }
 0xc90   :  { %2972 = vmatmul.msk.f32.gmra.mxu0 %vm132_vm0, %v2721_v43 }
 0xc93   :  { %v2707_v59 = vpop.f32.mrf.mxu1 }
 0xc94   :  { %v2713_v37 = vadd.f32 %v2707_v59, %v4619_v24 }
 0xc96   :  { %v2722_v3 = vadd.f32 %v2995_v36, %v2713_v37 }
 0xc98   :  { %2973 = vmatmul.msk.f32.gmra.mxu0 %vm132_vm0, %v2722_v3 }
 0xcfd   :  { %v2760_v25 = vpop.f32.mrf.mxu0 }
 0xcfe   :  { %v2761_v4 = vadd.f32 %v2996_v35, %v2760_v25 }
 0xd00   :  { %2772 = vst [vmem:[#allocation2] sm:$0xff] %v2761_v4 }
 0xd05   :  { %v2763_v50 = vpop.f32.mrf.mxu0 }
 0xd06   :  { %v2764_v10 = vadd.f32 %v2996_v35, %v2763_v50 }
 0xd08   :  { %2773 = vst [vmem:[#allocation2 + $0x8] sm:$0xff] %v2764_v10 }
 0xd0d   :  { %v2766_v51 = vpop.f32.mrf.mxu0 }
 0xd0e   :  { %v2767_v46 = vadd.f32 %v2996_v35, %v2766_v51 }
 0xd10   :  { %2774 = vst [vmem:[#allocation2 + $0x10] sm:$0xff] %v2767_v46 }
 0xd15   :  { %v2769_v24 = vpop.f32.mrf.mxu0 }
 0xd16   :  { %v2770_v12 = vadd.f32 %v2996_v35, %v2769_v24 }
 0xd18   :  { %2775 = vst [vmem:[#allocation2 + $0x18] sm:$0xff] %v2770_v12 }
 0xd19   :  { %2788 = dma.vmem_to_hbm [thread:$0]  %s2781_s26, 512, %s2783_s29, [#allocation3], %s3287_s12, %s3287_s12, %s3288_s2  }
 0xd1a   :  { %3283 = dma.done.wait [#allocation3], 512  }
 0xd1b   :  { %3284 = vsyncadd [#allocation3], 4294966784 }
 0xd1c   :  { %2793 = vsyncpa [#allocation3], 1 }

</bundles_post_ra>
